<compile_context>
chip_gen: v7x
topology: tpu7x:2x2x1
jax: 0.10.0
libtpu: 0.0.40
codegen_flags: <defaults>
</compile_context>

<pallas_src>
import math
from functools import partial

import jax
import jax.numpy as jnp
from jax import lax
from jax.experimental import pallas as pl
from jax.experimental.pallas import tpu as pltpu

# ----------------------------- config --------------------------------------
S = 4             # spatial_size
P = 4             # patch_size
IN_CH = 32        # in_channels (backbone feature dim)
C_VOL = 8         # volume_channels
EMBED_CH = C_VOL * S            # 32 (= embed_channels)
DECODE_CH = (C_VOL + 1) * S     # 36 (= decode_channels)
PRED_CH = P * P * 4             # 64 (prediction head output)
NUM_PE = 8                      # num_pe_bases
CROP_DIM = 3                    # crop params dim
PE_DIM = 2 * CROP_DIM * NUM_PE  # 48
T_H1 = 128                      # (stand-in for 1024)
T_H2 = 64                       # (stand-in for 512)
N_TOK = S * S                   # 16 tokens per image
N_PTS = S * S * S               # 64 volume points
DK = C_VOL                      # d_k of the SVD-head scores
LANE = 128                      # lane-dense padding target

_VMEM = pl.BlockSpec(memory_space=pltpu.MemorySpace.VMEM)


def _leaky(x):
    return jnp.maximum(x, 0.01 * x)       # LeakyReLU(0.01), 2 VALU ops


def _bf16(x):
    return x.astype(jnp.bfloat16)


# --------------------------- Pallas kernels --------------------------------
def _main_kernel(tok_ref, w_enc_ref, b_enc_ref, ln_g_ref, ln_b_ref,
                 w_pred_ref, b_pred_ref, avg_ref, pe_src_ref, pe_tgt_ref,
                 w1a_ref, b1a_ref, w1b_ref, b1b_ref,
                 w2a_ref, b2a_ref, w2b_ref, b2b_ref, wr_ref, br_ref,
                 enc_ref, pred_ref, ts_ref, *, batch):
    """One fused launch for the whole token path.

    - fused (patch-embed @ encoder_embed) single matmul -> enc (lane-padded 128)
    - identity dec_blocks -> feat = enc[:, :EMBED_CH]
    - LayerNorm + prediction head (lane-padded)
    - per-image token means via a constant averaging-matrix matmul
    - translation MLP (t_block1, t_block2, skip, t_regressor), all weights bf16
    """
    # ---- fused patch-embed + encoder_embed (weights folded at init) ----
    enc = jnp.dot(tok_ref[...], w_enc_ref[...],
                  preferred_element_type=jnp.float32) + b_enc_ref[...]   # (2B*N_TOK, 128)
    enc_ref[...] = enc

    # TODO(synk): cross_att_blocks_src/_tgt and dec_blocks (RoPE attention) not provided;
    #             identity pass-through, so the decoder feature is the first EMBED_CH lanes.
    feat = enc[:, :EMBED_CH]                                             # (2B*N_TOK, 32)

    # LayerNorm(eps=1e-5) + prediction head, lane-dense store
    mu = jnp.mean(feat, axis=-1, keepdims=True)
    var = jnp.mean((feat - mu) ** 2, axis=-1, keepdims=True)
    xn = (feat - mu) * lax.rsqrt(var + 1e-5) * ln_g_ref[...] + ln_b_ref[...]
    pred_ref[...] = jnp.dot(_bf16(xn), w_pred_ref[...],
                            preferred_element_type=jnp.float32) + b_pred_ref[...]

    # ---- per-image token means (MXU contraction with a constant averaging matrix) ----
    means = jnp.dot(avg_ref[...], feat, preferred_element_type=jnp.float32)   # (2B, 32)
    fsrc = _bf16(means[:batch])
    ftgt = _bf16(means[batch:])
    pe_s = _bf16(pe_src_ref[...])
    pe_t = _bf16(pe_tgt_ref[...])

    # ---- translation MLP: feat_T = [fsrc | pe_src | ftgt | pe_tgt] realised as
    #      four row-block matmuls against W_t1a (avoids an in-kernel lane concat) ----
    w1a = w1a_ref[...]
    h1 = (jnp.dot(fsrc, w1a[0:EMBED_CH], preferred_element_type=jnp.float32)
          + jnp.dot(pe_s, w1a[EMBED_CH:EMBED_CH + PE_DIM],
                    preferred_element_type=jnp.float32)
          + jnp.dot(ftgt, w1a[EMBED_CH + PE_DIM:2 * EMBED_CH + PE_DIM],
                    preferred_element_type=jnp.float32)
          + jnp.dot(pe_t, w1a[2 * EMBED_CH + PE_DIM:],
                    preferred_element_type=jnp.float32)
          + b1a_ref[...])
    h1 = _leaky(h1)                                                      # t_block1: Lin->LeakyReLU
    t1 = jnp.dot(_bf16(h1), w1b_ref[...],
                 preferred_element_type=jnp.float32) + b1b_ref[...]      # t_block1: Lin
    h2 = jnp.dot(_bf16(_leaky(t1)), w2a_ref[...],
                 preferred_element_type=jnp.float32) + b2a_ref[...]      # t_block2: LReLU->Lin
    t2 = jnp.dot(_bf16(_leaky(h2)), w2b_ref[...],
                 preferred_element_type=jnp.float32) + b2b_ref[...]      # t_block2: LReLU->Lin
    f = t1 + t2                                                          # skip connection
    ts_ref[...] = jnp.dot(_bf16(_leaky(f)), wr_ref[...],
                          preferred_element_type=jnp.float32) + br_ref[...]   # t_regressor


def run_main(tok, p, pe_src, pe_tgt, avg, batch):
    M = tok.shape[0]
    return pl.pallas_call(
        partial(_main_kernel, batch=batch),
        out_shape=(jax.ShapeDtypeStruct((M, LANE), jnp.float32),       # enc (lane-padded)
                   jax.ShapeDtypeStruct((M, LANE), jnp.float32),       # pred (lane-padded)
                   jax.ShapeDtypeStruct((batch, LANE), jnp.float32)),  # pred_Ts (lane-padded)
        in_specs=[_VMEM] * 20,
        out_specs=(_VMEM, _VMEM, _VMEM),
    )(tok, p["W_enc"], p["b_enc"], p["ln_g"], p["ln_b"], p["W_pred"], p["b_pred"],
      avg, pe_src, pe_tgt,
      p["W_t1a"], p["b_t1a"], p["W_t1b"], p["b_t1b"],
      p["W_t2a"], p["b_t2a"], p["W_t2b"], p["b_t2b"], p["W_tr"], p["b_tr"])


def _svd_head_kernel(xyz_ref, srcT_ref, tgtE_ref, smask_ref, tgt_ext_ref, h_ref, *, batch):
    """SVDHead_Mask (transport=None, mask='both') hot path, all batches in one call.

    xyz_ref:     (3, N)        normalized grid coords (src = tgt constant)
    srcT_ref:    (B, N, dk)    src embedding, already point-major (standard matmul LHS)
    tgtE_ref:    (B, dk, N)    tgt embedding
    smask_ref:   (B, N, 2)     [src_depth_mask | src_img_mask] per point
    tgt_ext_ref: (B, N, 128)   [tgt_xyz(3) | tgt_depth(1) | tgt_img(1) | zeros]
    h_ref:       (B, 3, 128)   H in lanes 0:3 (lane-dense single store)
    """
    inv_sqrt_dk = 1.0 / math.sqrt(float(DK))
    xyz = xyz_ref[...]
    src_c = xyz - jnp.mean(xyz, axis=1, keepdims=True)                  # (3, N), batch-invariant
    rows = []
    for b in range(batch):                                              # static unroll (B tiny)
        sT = srcT_ref[b]                                                # (N, dk)
        tE = tgtE_ref[b]                                                # (dk, N)
        # scores[i, j] = <src_emb[:, i], tgt_emb[:, j]> / sqrt(dk); softmax over j
        scores = jnp.dot(sT, tE, preferred_element_type=jnp.float32) * inv_sqrt_dk
        smax = jnp.max(scores, axis=-1, keepdims=True)
        e = jnp.exp(scores - smax)
        probs = e / jnp.sum(e, axis=-1, keepdims=True)                  # exact recip (feeds SVD)

        # one standard MXU pass: proj^T = scores @ [tgt | tgt_depth | tgt_img | 0...]^T
        projw = jnp.dot(probs, tgt_ext_ref[b],
                        preferred_element_type=jnp.float32)             # (N, 128)

        sm = smask_ref[b]                                               # (N, 2)
        depth = 0.5 * (sm[:, 0:1] + projw[:, 3:4])
        imgm = 0.5 * (sm[:, 1:2] + projw[:, 4:5])

        # mask == 'both', temp_mask == 1.0
        mask = jax.nn.sigmoid(depth) * jax.nn.sigmoid(imgm)             # (N, 1)
        mmin = jnp.min(mask, axis=0, keepdims=True)
        mmax = jnp.max(mask, axis=0, keepdims=True)
        mask = (mask - mmin) / jnp.maximum(mmax - mmin, 1e-6)

        corr_c = projw - jnp.mean(projw, axis=0, keepdims=True)         # centered columns
        # H = src_centered @ diag(mask) @ src_corr_centered^T  (lanes 0:3 of hw)
        rows.append(jnp.dot(src_c, corr_c * mask,
                            preferred_element_type=jnp.float32))        # (3, 128)
    h_ref[...] = jnp.stack(rows, axis=0)                                # (B, 3, 128), one store


def run_svd_head(xyz, emb_srcT, emb_tgt, src_masks, tgt_ext):
    B = emb_srcT.shape[0]
    hwide = pl.pallas_call(
        partial(_svd_head_kernel, batch=B),
        out_shape=jax.ShapeDtypeStruct((B, 3, LANE), jnp.float32),
        in_specs=[_VMEM] * 5,
        out_specs=_VMEM,
    )(xyz, emb_srcT, emb_tgt, src_masks, tgt_ext)
    return hwide[:, :, :3]                                              # (B, 3, 3)


# ------------------------------ glue (JAX) ----------------------------------
def point_coordinates(D, H, W):
    gz, gy, gx = jnp.meshgrid(jnp.arange(D), jnp.arange(H), jnp.arange(W), indexing="ij")
    return jnp.stack([gx, gy, gz], axis=0).reshape(3, -1).astype(jnp.float32)


def positional_encoding(x, embedding):
    # x: (B, D), embedding: (1, 1, L) -> (B, 2*D*L)
    embed = (x[..., None] * embedding).reshape(x.shape[0], -1)
    return jnp.concatenate([jnp.sin(embed), jnp.cos(embed)], axis=-1)


def patchify(img):
    # (B, 3, S*P, S*P) -> (B, S*S, 3*P*P)
    B, C, _, _ = img.shape
    x = img.reshape(B, C, S, P, S, P)
    x = jnp.transpose(x, (0, 2, 4, 1, 3, 5)).reshape(B, S * S, C * P * P)
    return x


def init_params(key):
    def dense(k, fan_in, fan_out):
        kw, kb = jax.random.split(k)
        s = 1.0 / math.sqrt(fan_in)
        w = jax.random.uniform(kw, (fan_in, fan_out), jnp.float32, -s, s)
        b = jax.random.uniform(kb, (fan_out,), jnp.float32, -s, s)
        return w, b

    def pad_lane(a):
        c = a.shape[-1]
        return a if c >= LANE else jnp.pad(a, ((0, 0), (0, LANE - c)))

    ks = jax.random.split(key, 8)
    p = {}
    # Synthetic backbone patch-embed folded with encoder_embed into one affine.
    # NOTE: only valid while the cross-attention blocks are identity placeholders.
    w_pe, b_pe = dense(ks[0], 3 * P * P, IN_CH)
    w_enc, b_enc = dense(ks[1], IN_CH, DECODE_CH)
    w_enc_p = pad_lane(w_enc)
    b_enc_p = pad_lane(b_enc.reshape(1, -1))
    p["W_enc"] = (w_pe @ w_enc_p).astype(jnp.bfloat16)                 # (48, 128) bf16
    p["b_enc"] = b_pe.reshape(1, -1) @ w_enc_p + b_enc_p               # (1, 128) f32
    p["ln_g"] = jnp.ones((1, EMBED_CH), jnp.float32)                   # prediction_head LayerNorm
    p["ln_b"] = jnp.zeros((1, EMBED_CH), jnp.float32)
    w, b = dense(ks[2], EMBED_CH, PRED_CH)                             # prediction_head Linear
    p["W_pred"] = pad_lane(w).astype(jnp.bfloat16)
    p["b_pred"] = pad_lane(b.reshape(1, -1))
    w, b = dense(ks[3], 2 * (EMBED_CH + PE_DIM), T_H1)                 # t_block1 Linear 1
    p["W_t1a"], p["b_t1a"] = w.astype(jnp.bfloat16), b.reshape(1, -1)
    w, b = dense(ks[4], T_H1, T_H2)                                    # t_block1 Linear 2
    p["W_t1b"], p["b_t1b"] = w.astype(jnp.bfloat16), b.reshape(1, -1)
    w, b = dense(ks[5], T_H2, T_H2)                                    # t_block2 Linear 1
    p["W_t2a"], p["b_t2a"] = w.astype(jnp.bfloat16), b.reshape(1, -1)
    w, b = dense(ks[6], T_H2, T_H2)                                    # t_block2 Linear 2
    p["W_t2b"], p["b_t2b"] = w.astype(jnp.bfloat16), b.reshape(1, -1)
    w, b = dense(ks[7], T_H2, 6)                                       # t_regressor
    p["W_tr"] = pad_lane(w).astype(jnp.bfloat16)
    p["b_tr"] = pad_lane(b.reshape(1, -1))
    p["embed_crop"] = (2.0 ** jnp.arange(NUM_PE, dtype=jnp.float32)).reshape(1, 1, -1)
    return p


def dvmnet_forward(params, img_src, img_tgt, crop_src, crop_tgt):
    B = img_src.shape[0]

    # ---------------- launch 1: fused encode + decode + translation ----------------
    # TODO(synk): CroCoNet backbone replaced by a deterministic linear patch-embed.
    tok = jnp.concatenate([patchify(img_src), patchify(img_tgt)], axis=0)   # (2B, N_TOK, 48)
    tok = tok.reshape(2 * B * N_TOK, 3 * P * P).astype(jnp.bfloat16)

    crop_pe_src = positional_encoding(crop_src, params["embed_crop"])       # (B, 48)
    crop_pe_tgt = positional_encoding(crop_tgt, params["embed_crop"])
    # constant block-diagonal averaging matrix: means over the N_TOK tokens of each image
    avg = jnp.repeat(jnp.eye(2 * B, dtype=jnp.float32), N_TOK, axis=1) / float(N_TOK)

    enc, pred, ts_raw = run_main(tok, params, crop_pe_src, crop_pe_tgt, avg, B)

    # ---------------- wrapper layout plumbing for the SVD head ----------------
    encf = enc.reshape(2 * B, N_TOK, LANE)
    vol = encf[:, :, :EMBED_CH].reshape(2 * B, N_TOK, C_VOL, S)             # [img, hw, c, d]
    emb_srcT = vol[:B].transpose(0, 3, 1, 2).reshape(B, N_PTS, C_VOL)       # (B, N, dk)
    emb_tgt = vol[B:].transpose(0, 2, 3, 1).reshape(B, C_VOL, N_PTS)        # (B, dk, N)

    occ_pts = encf[:, :, EMBED_CH:DECODE_CH].transpose(0, 2, 1).reshape(2 * B, N_PTS)
    occupancy_src = occ_pts[:B].reshape(B, 1, N_PTS)
    occupancy_tgt = occ_pts[B:].reshape(B, 1, N_PTS)

    pred3 = pred[:, :PRED_CH].reshape(2 * B, N_TOK, PRED_CH)
    pred_src, pred_tgt = pred3[:B], pred3[B:]
    m2d = pred3.reshape(2 * B, N_TOK, PRED_CH // C_VOL, C_VOL)[..., -1].mean(axis=-1)  # (2B, 16)
    img_pts = jnp.broadcast_to(m2d[:, None, :], (2 * B, S, N_TOK)).reshape(2 * B, N_PTS)

    xyz = (point_coordinates(S, S, S) - (S - 1) / 2.0) / ((S - 1) / 2.0)    # (3, N_PTS)
    xyzT = jnp.broadcast_to(xyz.T[None], (B, N_PTS, 3))
    tgt5 = jnp.concatenate([xyzT, occ_pts[B:, :, None], img_pts[B:, :, None]], axis=-1)
    tgt_ext = jnp.pad(tgt5, ((0, 0), (0, 0), (0, LANE - 5)))                # (B, N, 128)
    src_masks = jnp.stack([occ_pts[:B], img_pts[:B]], axis=-1)              # (B, N, 2)

    # ---------------- launch 2: SVD-head correlation matrices ----------------
    H = run_svd_head(xyz, emb_srcT, emb_tgt, src_masks, tgt_ext)            # (B, 3, 3)

    # TODO(synk): 3x3 SVD / determinant have no Pallas equivalent; jnp.linalg used.
    u, s, vh = jnp.linalg.svd(H)
    v = jnp.swapaxes(vh, -1, -2)
    ut = jnp.swapaxes(u, -1, -2)
    r = jnp.matmul(v, ut)
    r_det = jnp.linalg.det(r)
    reflect = jnp.diag(jnp.array([1.0, 1.0, -1.0], jnp.float32))
    r_reflect = jnp.matmul(jnp.matmul(v, reflect), ut)
    pred_delta_R = jnp.where((r_det < 0)[:, None, None], r_reflect, r)

    # ---------------- translation output (already computed in launch 1) ----------------
    bias = jnp.array([[0.0, 0.0, 1.0, 0.0, 0.0, 1.0]], jnp.float32)
    pred_Ts = ts_raw[:, :6].reshape(-1, 6) + bias

    return pred_src, pred_tgt, occupancy_src, occupancy_tgt, pred_delta_R, pred_Ts


# ------------------------------ main ----------------------------------------
if __name__ == "__main__":
    key = jax.random.PRNGKey(0)
    k_param, k1, k2, k3, k4 = jax.random.split(key, 5)
    params = init_params(k_param)

    B = 2
    img_src = jax.random.normal(k1, (B, 3, S * P, S * P), jnp.float32)   # NCHW
    img_tgt = jax.random.normal(k2, (B, 3, S * P, S * P), jnp.float32)
    crop_src = jax.random.uniform(k3, (B, CROP_DIM), jnp.float32)
    crop_tgt = jax.random.uniform(k4, (B, CROP_DIM), jnp.float32)

    fwd = jax.jit(dvmnet_forward)
    outs = fwd(params, img_src, img_tgt, crop_src, crop_tgt)
    jax.block_until_ready(outs)

    pred_src, pred_tgt, occ_src, occ_tgt, pred_R, pred_Ts = outs
    assert pred_src.shape == (B, N_TOK, PRED_CH)
    assert pred_tgt.shape == (B, N_TOK, PRED_CH)
    assert occ_src.shape == (B, 1, N_PTS)
    assert occ_tgt.shape == (B, 1, N_PTS)
    assert pred_R.shape == (B, 3, 3)
    assert pred_Ts.shape == (B, 6)
    print("KERNEL_OK")
</pallas_src>

<mosaic_0001>
module attributes {stable_mosaic.version = 11 : i64} {
  func.func @_main_kernel(%arg0: memref<64x48xbf16, #tpu.memory_space<vmem>>, %arg1: memref<48x128xbf16, #tpu.memory_space<vmem>>, %arg2: memref<1x128xf32, #tpu.memory_space<vmem>>, %arg3: memref<1x32xf32, #tpu.memory_space<vmem>>, %arg4: memref<1x32xf32, #tpu.memory_space<vmem>>, %arg5: memref<32x128xbf16, #tpu.memory_space<vmem>>, %arg6: memref<1x128xf32, #tpu.memory_space<vmem>>, %arg7: memref<4x64xf32, #tpu.memory_space<vmem>>, %arg8: memref<2x48xf32, #tpu.memory_space<vmem>>, %arg9: memref<2x48xf32, #tpu.memory_space<vmem>>, %arg10: memref<160x128xbf16, #tpu.memory_space<vmem>>, %arg11: memref<1x128xf32, #tpu.memory_space<vmem>>, %arg12: memref<128x64xbf16, #tpu.memory_space<vmem>>, %arg13: memref<1x64xf32, #tpu.memory_space<vmem>>, %arg14: memref<64x64xbf16, #tpu.memory_space<vmem>>, %arg15: memref<1x64xf32, #tpu.memory_space<vmem>>, %arg16: memref<64x64xbf16, #tpu.memory_space<vmem>>, %arg17: memref<1x64xf32, #tpu.memory_space<vmem>>, %arg18: memref<64x128xbf16, #tpu.memory_space<vmem>>, %arg19: memref<1x128xf32, #tpu.memory_space<vmem>>, %arg20: memref<64x128xf32, #tpu.memory_space<vmem>>, %arg21: memref<64x128xf32, #tpu.memory_space<vmem>>, %arg22: memref<2x128xf32, #tpu.memory_space<vmem>>) attributes {dimension_semantics = [], scalar_prefetch = 0 : i64, scratch_operands = 0 : i64, tpu.core_type = #tpu.core_type<tc>} {
    %c0 = arith.constant 0 : index
    %c0_0 = arith.constant 0 : index
    %0 = vector.load %arg0[%c0, %c0_0] : memref<64x48xbf16, #tpu.memory_space<vmem>>, vector<64x48xbf16>
    %c0_1 = arith.constant 0 : index
    %c0_2 = arith.constant 0 : index
    %1 = vector.load %arg1[%c0_1, %c0_2] : memref<48x128xbf16, #tpu.memory_space<vmem>>, vector<48x128xbf16>
    %cst = arith.constant dense<0.000000e+00> : vector<64x128xf32>
    %2 = tpu.matmul %0, %1, %cst {dimension_numbers = #tpu.dot_dimension_numbers<[1], [0], [0], [1], [0, 0, 1, 1], [], []>} : vector<64x48xbf16>, vector<48x128xbf16>, vector<64x128xf32> -> vector<64x128xf32>
    %c0_3 = arith.constant 0 : index
    %c0_4 = arith.constant 0 : index
    %3 = vector.load %arg2[%c0_3, %c0_4] : memref<1x128xf32, #tpu.memory_space<vmem>>, vector<1x128xf32>
    %4 = vector.broadcast %3 : vector<1x128xf32> to vector<64x128xf32>
    %5 = arith.addf %2, %4 : vector<64x128xf32>
    %c0_5 = arith.constant 0 : index
    %c0_6 = arith.constant 0 : index
    %6 = vector.load %arg20[%c0_5, %c0_6] : memref<64x128xf32, #tpu.memory_space<vmem>>, vector<64x128xf32>
    tpu.vector_store %arg20[%c0_5, %c0_6], %5 {strides = array<i32>} : memref<64x128xf32, #tpu.memory_space<vmem>>, vector<64x128xf32>,
    %7 = vector.extract_strided_slice %5 {offsets = [0, 0], sizes = [64, 32], strides = [1, 1]} : vector<64x128xf32> to vector<64x32xf32>
    %cst_7 = arith.constant dense<0.000000e+00> : vector<64xf32>
    %8 = vector.multi_reduction <add>, %7, %cst_7 [1] : vector<64x32xf32> to vector<64xf32>
    %9 = vector.shape_cast %8 : vector<64xf32> to vector<64x1xf32>
    %cst_8 = arith.constant 3.200000e+01 : f32
    %10 = vector.broadcast %cst_8 : f32 to vector<64x1xf32>
    %11 = arith.divf %9, %10 : vector<64x1xf32>
    %12 = vector.broadcast %11 : vector<64x1xf32> to vector<64x32xf32>
    %13 = arith.subf %7, %12 : vector<64x32xf32>
    %14 = arith.mulf %13, %13 : vector<64x32xf32>
    %cst_9 = arith.constant dense<0.000000e+00> : vector<64xf32>
    %15 = vector.multi_reduction <add>, %14, %cst_9 [1] : vector<64x32xf32> to vector<64xf32>
    %16 = vector.shape_cast %15 : vector<64xf32> to vector<64x1xf32>
    %cst_10 = arith.constant 3.200000e+01 : f32
    %17 = vector.broadcast %cst_10 : f32 to vector<64x1xf32>
    %18 = arith.divf %16, %17 : vector<64x1xf32>
    %19 = vector.broadcast %11 : vector<64x1xf32> to vector<64x32xf32>
    %20 = arith.subf %7, %19 : vector<64x32xf32>
    %cst_11 = arith.constant 9.99999974E-6 : f32
    %21 = vector.broadcast %cst_11 : f32 to vector<64x1xf32>
    %22 = arith.addf %18, %21 : vector<64x1xf32>
    %23 = math.rsqrt %22 : vector<64x1xf32>
    %24 = vector.broadcast %23 : vector<64x1xf32> to vector<64x32xf32>
    %25 = arith.mulf %20, %24 : vector<64x32xf32>
    %c0_12 = arith.constant 0 : index
    %c0_13 = arith.constant 0 : index
    %26 = vector.load %arg3[%c0_12, %c0_13] : memref<1x32xf32, #tpu.memory_space<vmem>>, vector<1x32xf32>
    %27 = vector.broadcast %26 : vector<1x32xf32> to vector<64x32xf32>
    %28 = arith.mulf %25, %27 : vector<64x32xf32>
    %c0_14 = arith.constant 0 : index
    %c0_15 = arith.constant 0 : index
    %29 = vector.load %arg4[%c0_14, %c0_15] : memref<1x32xf32, #tpu.memory_space<vmem>>, vector<1x32xf32>
    %30 = vector.broadcast %29 : vector<1x32xf32> to vector<64x32xf32>
    %31 = arith.addf %28, %30 : vector<64x32xf32>
    %32 = arith.truncf %31 : vector<64x32xf32> to vector<64x32xbf16>
    %c0_16 = arith.constant 0 : index
    %c0_17 = arith.constant 0 : index
    %33 = vector.load %arg5[%c0_16, %c0_17] : memref<32x128xbf16, #tpu.memory_space<vmem>>, vector<32x128xbf16>
    %cst_18 = arith.constant dense<0.000000e+00> : vector<64x128xf32>
    %34 = tpu.matmul %32, %33, %cst_18 {dimension_numbers = #tpu.dot_dimension_numbers<[1], [0], [0], [1], [0, 0, 1, 1], [], []>} : vector<64x32xbf16>, vector<32x128xbf16>, vector<64x128xf32> -> vector<64x128xf32>
    %c0_19 = arith.constant 0 : index
    %c0_20 = arith.constant 0 : index
    %35 = vector.load %arg6[%c0_19, %c0_20] : memref<1x128xf32, #tpu.memory_space<vmem>>, vector<1x128xf32>
    %36 = vector.broadcast %35 : vector<1x128xf32> to vector<64x128xf32>
    %37 = arith.addf %34, %36 : vector<64x128xf32>
    %c0_21 = arith.constant 0 : index
    %c0_22 = arith.constant 0 : index
    %38 = vector.load %arg21[%c0_21, %c0_22] : memref<64x128xf32, #tpu.memory_space<vmem>>, vector<64x128xf32>
    tpu.vector_store %arg21[%c0_21, %c0_22], %37 {strides = array<i32>} : memref<64x128xf32, #tpu.memory_space<vmem>>, vector<64x128xf32>,
    %c0_23 = arith.constant 0 : index
    %c0_24 = arith.constant 0 : index
    %39 = vector.load %arg7[%c0_23, %c0_24] : memref<4x64xf32, #tpu.memory_space<vmem>>, vector<4x64xf32>
    %cst_25 = arith.constant dense<0.000000e+00> : vector<4x32xf32>
    %40 = tpu.matmul %39, %7, %cst_25 {dimension_numbers = #tpu.dot_dimension_numbers<[1], [0], [0], [1], [0, 0, 1, 1], [], []>} : vector<4x64xf32>, vector<64x32xf32>, vector<4x32xf32> -> vector<4x32xf32>
    %41 = vector.extract_strided_slice %40 {offsets = [0, 0], sizes = [2, 32], strides = [1, 1]} : vector<4x32xf32> to vector<2x32xf32>
    %42 = arith.truncf %41 : vector<2x32xf32> to vector<2x32xbf16>
    %43 = vector.extract_strided_slice %40 {offsets = [2, 0], sizes = [2, 32], strides = [1, 1]} : vector<4x32xf32> to vector<2x32xf32>
    %44 = arith.truncf %43 : vector<2x32xf32> to vector<2x32xbf16>
    %c0_26 = arith.constant 0 : index
    %c0_27 = arith.constant 0 : index
    %45 = vector.load %arg8[%c0_26, %c0_27] : memref<2x48xf32, #tpu.memory_space<vmem>>, vector<2x48xf32>
    %46 = arith.truncf %45 : vector<2x48xf32> to vector<2x48xbf16>
    %c0_28 = arith.constant 0 : index
    %c0_29 = arith.constant 0 : index
    %47 = vector.load %arg9[%c0_28, %c0_29] : memref<2x48xf32, #tpu.memory_space<vmem>>, vector<2x48xf32>
    %48 = arith.truncf %47 : vector<2x48xf32> to vector<2x48xbf16>
    %c0_30 = arith.constant 0 : index
    %c0_31 = arith.constant 0 : index
    %49 = vector.load %arg10[%c0_30, %c0_31] : memref<160x128xbf16, #tpu.memory_space<vmem>>, vector<160x128xbf16>
    %50 = vector.extract_strided_slice %49 {offsets = [0, 0], sizes = [32, 128], strides = [1, 1]} : vector<160x128xbf16> to vector<32x128xbf16>
    %cst_32 = arith.constant dense<0.000000e+00> : vector<2x128xf32>
    %51 = tpu.matmul %42, %50, %cst_32 {dimension_numbers = #tpu.dot_dimension_numbers<[1], [0], [0], [1], [0, 0, 1, 1], [], []>} : vector<2x32xbf16>, vector<32x128xbf16>, vector<2x128xf32> -> vector<2x128xf32>
    %52 = vector.extract_strided_slice %49 {offsets = [32, 0], sizes = [48, 128], strides = [1, 1]} : vector<160x128xbf16> to vector<48x128xbf16>
    %cst_33 = arith.constant dense<0.000000e+00> : vector<2x128xf32>
    %53 = tpu.matmul %46, %52, %cst_33 {dimension_numbers = #tpu.dot_dimension_numbers<[1], [0], [0], [1], [0, 0, 1, 1], [], []>} : vector<2x48xbf16>, vector<48x128xbf16>, vector<2x128xf32> -> vector<2x128xf32>
    %54 = arith.addf %51, %53 : vector<2x128xf32>
    %55 = vector.extract_strided_slice %49 {offsets = [80, 0], sizes = [32, 128], strides = [1, 1]} : vector<160x128xbf16> to vector<32x128xbf16>
    %cst_34 = arith.constant dense<0.000000e+00> : vector<2x128xf32>
    %56 = tpu.matmul %44, %55, %cst_34 {dimension_numbers = #tpu.dot_dimension_numbers<[1], [0], [0], [1], [0, 0, 1, 1], [], []>} : vector<2x32xbf16>, vector<32x128xbf16>, vector<2x128xf32> -> vector<2x128xf32>
    %57 = arith.addf %54, %56 : vector<2x128xf32>
    %58 = vector.extract_strided_slice %49 {offsets = [112, 0], sizes = [48, 128], strides = [1, 1]} : vector<160x128xbf16> to vector<48x128xbf16>
    %cst_35 = arith.constant dense<0.000000e+00> : vector<2x128xf32>
    %59 = tpu.matmul %48, %58, %cst_35 {dimension_numbers = #tpu.dot_dimension_numbers<[1], [0], [0], [1], [0, 0, 1, 1], [], []>} : vector<2x48xbf16>, vector<48x128xbf16>, vector<2x128xf32> -> vector<2x128xf32>
    %60 = arith.addf %57, %59 : vector<2x128xf32>
    %c0_36 = arith.constant 0 : index
    %c0_37 = arith.constant 0 : index
    %61 = vector.load %arg11[%c0_36, %c0_37] : memref<1x128xf32, #tpu.memory_space<vmem>>, vector<1x128xf32>
    %62 = vector.broadcast %61 : vector<1x128xf32> to vector<2x128xf32>
    %63 = arith.addf %60, %62 : vector<2x128xf32>
    %cst_38 = arith.constant 0.00999999977 : f32
    %64 = vector.broadcast %cst_38 : f32 to vector<2x128xf32>
    %65 = arith.mulf %64, %63 : vector<2x128xf32>
    %66 = arith.maximumf %63, %65 : vector<2x128xf32>
    %67 = arith.truncf %66 : vector<2x128xf32> to vector<2x128xbf16>
    %c0_39 = arith.constant 0 : index
    %c0_40 = arith.constant 0 : index
    %68 = vector.load %arg12[%c0_39, %c0_40] : memref<128x64xbf16, #tpu.memory_space<vmem>>, vector<128x64xbf16>
    %cst_41 = arith.constant dense<0.000000e+00> : vector<2x64xf32>
    %69 = tpu.matmul %67, %68, %cst_41 {dimension_numbers = #tpu.dot_dimension_numbers<[1], [0], [0], [1], [0, 0, 1, 1], [], []>} : vector<2x128xbf16>, vector<128x64xbf16>, vector<2x64xf32> -> vector<2x64xf32>
    %c0_42 = arith.constant 0 : index
    %c0_43 = arith.constant 0 : index
    %70 = vector.load %arg13[%c0_42, %c0_43] : memref<1x64xf32, #tpu.memory_space<vmem>>, vector<1x64xf32>
    %71 = vector.broadcast %70 : vector<1x64xf32> to vector<2x64xf32>
    %72 = arith.addf %69, %71 : vector<2x64xf32>
    %cst_44 = arith.constant 0.00999999977 : f32
    %73 = vector.broadcast %cst_44 : f32 to vector<2x64xf32>
    %74 = arith.mulf %73, %72 : vector<2x64xf32>
    %75 = arith.maximumf %72, %74 : vector<2x64xf32>
    %76 = arith.truncf %75 : vector<2x64xf32> to vector<2x64xbf16>
    %c0_45 = arith.constant 0 : index
    %c0_46 = arith.constant 0 : index
    %77 = vector.load %arg14[%c0_45, %c0_46] : memref<64x64xbf16, #tpu.memory_space<vmem>>, vector<64x64xbf16>
    %cst_47 = arith.constant dense<0.000000e+00> : vector<2x64xf32>
    %78 = tpu.matmul %76, %77, %cst_47 {dimension_numbers = #tpu.dot_dimension_numbers<[1], [0], [0], [1], [0, 0, 1, 1], [], []>} : vector<2x64xbf16>, vector<64x64xbf16>, vector<2x64xf32> -> vector<2x64xf32>
    %c0_48 = arith.constant 0 : index
    %c0_49 = arith.constant 0 : index
    %79 = vector.load %arg15[%c0_48, %c0_49] : memref<1x64xf32, #tpu.memory_space<vmem>>, vector<1x64xf32>
    %80 = vector.broadcast %79 : vector<1x64xf32> to vector<2x64xf32>
    %81 = arith.addf %78, %80 : vector<2x64xf32>
    %cst_50 = arith.constant 0.00999999977 : f32
    %82 = vector.broadcast %cst_50 : f32 to vector<2x64xf32>
    %83 = arith.mulf %82, %81 : vector<2x64xf32>
    %84 = arith.maximumf %81, %83 : vector<2x64xf32>
    %85 = arith.truncf %84 : vector<2x64xf32> to vector<2x64xbf16>
    %c0_51 = arith.constant 0 : index
    %c0_52 = arith.constant 0 : index
    %86 = vector.load %arg16[%c0_51, %c0_52] : memref<64x64xbf16, #tpu.memory_space<vmem>>, vector<64x64xbf16>
    %cst_53 = arith.constant dense<0.000000e+00> : vector<2x64xf32>
    %87 = tpu.matmul %85, %86, %cst_53 {dimension_numbers = #tpu.dot_dimension_numbers<[1], [0], [0], [1], [0, 0, 1, 1], [], []>} : vector<2x64xbf16>, vector<64x64xbf16>, vector<2x64xf32> -> vector<2x64xf32>
    %c0_54 = arith.constant 0 : index
    %c0_55 = arith.constant 0 : index
    %88 = vector.load %arg17[%c0_54, %c0_55] : memref<1x64xf32, #tpu.memory_space<vmem>>, vector<1x64xf32>
    %89 = vector.broadcast %88 : vector<1x64xf32> to vector<2x64xf32>
    %90 = arith.addf %87, %89 : vector<2x64xf32>
    %91 = arith.addf %72, %90 : vector<2x64xf32>
    %cst_56 = arith.constant 0.00999999977 : f32
    %92 = vector.broadcast %cst_56 : f32 to vector<2x64xf32>
    %93 = arith.mulf %92, %91 : vector<2x64xf32>
    %94 = arith.maximumf %91, %93 : vector<2x64xf32>
    %95 = arith.truncf %94 : vector<2x64xf32> to vector<2x64xbf16>
    %c0_57 = arith.constant 0 : index
    %c0_58 = arith.constant 0 : index
    %96 = vector.load %arg18[%c0_57, %c0_58] : memref<64x128xbf16, #tpu.memory_space<vmem>>, vector<64x128xbf16>
    %cst_59 = arith.constant dense<0.000000e+00> : vector<2x128xf32>
    %97 = tpu.matmul %95, %96, %cst_59 {dimension_numbers = #tpu.dot_dimension_numbers<[1], [0], [0], [1], [0, 0, 1, 1], [], []>} : vector<2x64xbf16>, vector<64x128xbf16>, vector<2x128xf32> -> vector<2x128xf32>
    %c0_60 = arith.constant 0 : index
    %c0_61 = arith.constant 0 : index
    %98 = vector.load %arg19[%c0_60, %c0_61] : memref<1x128xf32, #tpu.memory_space<vmem>>, vector<1x128xf32>
    %99 = vector.broadcast %98 : vector<1x128xf32> to vector<2x128xf32>
    %100 = arith.addf %97, %99 : vector<2x128xf32>
    %c0_62 = arith.constant 0 : index
    %c0_63 = arith.constant 0 : index
    %101 = vector.load %arg22[%c0_62, %c0_63] : memref<2x128xf32, #tpu.memory_space<vmem>>, vector<2x128xf32>
    tpu.vector_store %arg22[%c0_62, %c0_63], %100 {strides = array<i32>} : memref<2x128xf32, #tpu.memory_space<vmem>>, vector<2x128xf32>,
    return
  }
}

module attributes {stable_mosaic.version = 11 : i64} {
  func.func @_svd_head_kernel(%arg0: memref<3x64xf32, #tpu.memory_space<vmem>>, %arg1: memref<2x64x8xf32, #tpu.memory_space<vmem>>, %arg2: memref<2x8x64xf32, #tpu.memory_space<vmem>>, %arg3: memref<2x64x2xf32, #tpu.memory_space<vmem>>, %arg4: memref<2x64x128xf32, #tpu.memory_space<vmem>>, %arg5: memref<2x3x128xf32, #tpu.memory_space<vmem>>) attributes {dimension_semantics = [], scalar_prefetch = 0 : i64, scratch_operands = 0 : i64, tpu.core_type = #tpu.core_type<tc>} {
    %c0 = arith.constant 0 : index
    %c0_0 = arith.constant 0 : index
    %0 = vector.load %arg0[%c0, %c0_0] : memref<3x64xf32, #tpu.memory_space<vmem>>, vector<3x64xf32>
    %cst = arith.constant dense<0.000000e+00> : vector<3xf32>
    %1 = vector.multi_reduction <add>, %0, %cst [1] : vector<3x64xf32> to vector<3xf32>
    %2 = vector.shape_cast %1 : vector<3xf32> to vector<3x1xf32>
    %cst_1 = arith.constant 6.400000e+01 : f32
    %3 = vector.broadcast %cst_1 : f32 to vector<3x1xf32>
    %4 = arith.divf %2, %3 : vector<3x1xf32>
    %5 = vector.broadcast %4 : vector<3x1xf32> to vector<3x64xf32>
    %6 = arith.subf %0, %5 : vector<3x64xf32>
    %c0_2 = arith.constant 0 : index
    %c0_3 = arith.constant 0 : index
    %c0_4 = arith.constant 0 : index
    %7 = vector.load %arg1[%c0_2, %c0_3, %c0_4] : memref<2x64x8xf32, #tpu.memory_space<vmem>>, vector<1x64x8xf32>
    %8 = vector.shape_cast %7 : vector<1x64x8xf32> to vector<64x8xf32>
    %c0_5 = arith.constant 0 : index
    %c0_6 = arith.constant 0 : index
    %c0_7 = arith.constant 0 : index
    %9 = vector.load %arg2[%c0_5, %c0_6, %c0_7] : memref<2x8x64xf32, #tpu.memory_space<vmem>>, vector<1x8x64xf32>
    %10 = vector.shape_cast %9 : vector<1x8x64xf32> to vector<8x64xf32>
    %cst_8 = arith.constant dense<0.000000e+00> : vector<64x64xf32>
    %11 = tpu.matmul %8, %10, %cst_8 {dimension_numbers = #tpu.dot_dimension_numbers<[1], [0], [0], [1], [0, 0, 1, 1], [], []>} : vector<64x8xf32>, vector<8x64xf32>, vector<64x64xf32> -> vector<64x64xf32>
    %cst_9 = arith.constant 0.353553385 : f32
    %12 = vector.broadcast %cst_9 : f32 to vector<64x64xf32>
    %13 = arith.mulf %11, %12 : vector<64x64xf32>
    %cst_10 = arith.constant dense<0xFF800000> : vector<64xf32>
    %14 = vector.multi_reduction <maximumf>, %13, %cst_10 [1] : vector<64x64xf32> to vector<64xf32>
    %15 = vector.shape_cast %14 : vector<64xf32> to vector<64x1xf32>
    %16 = vector.broadcast %15 : vector<64x1xf32> to vector<64x64xf32>
    %17 = arith.subf %13, %16 : vector<64x64xf32>
    %18 = math.exp %17 : vector<64x64xf32>
    %cst_11 = arith.constant dense<0.000000e+00> : vector<64xf32>
    %19 = vector.multi_reduction <add>, %18, %cst_11 [1] : vector<64x64xf32> to vector<64xf32>
    %20 = vector.shape_cast %19 : vector<64xf32> to vector<64x1xf32>
    %21 = vector.broadcast %20 : vector<64x1xf32> to vector<64x64xf32>
    %22 = arith.divf %18, %21 : vector<64x64xf32>
    %c0_12 = arith.constant 0 : index
    %c0_13 = arith.constant 0 : index
    %c0_14 = arith.constant 0 : index
    %23 = vector.load %arg4[%c0_12, %c0_13, %c0_14] : memref<2x64x128xf32, #tpu.memory_space<vmem>>, vector<1x64x128xf32>
    %24 = vector.shape_cast %23 : vector<1x64x128xf32> to vector<64x128xf32>
    %cst_15 = arith.constant dense<0.000000e+00> : vector<64x128xf32>
    %25 = tpu.matmul %22, %24, %cst_15 {dimension_numbers = #tpu.dot_dimension_numbers<[1], [0], [0], [1], [0, 0, 1, 1], [], []>} : vector<64x64xf32>, vector<64x128xf32>, vector<64x128xf32> -> vector<64x128xf32>
    %c0_16 = arith.constant 0 : index
    %c0_17 = arith.constant 0 : index
    %c0_18 = arith.constant 0 : index
    %26 = vector.load %arg3[%c0_16, %c0_17, %c0_18] : memref<2x64x2xf32, #tpu.memory_space<vmem>>, vector<1x64x2xf32>
    %27 = vector.shape_cast %26 : vector<1x64x2xf32> to vector<64x2xf32>
    %28 = vector.extract_strided_slice %27 {offsets = [0, 0], sizes = [64, 1], strides = [1, 1]} : vector<64x2xf32> to vector<64x1xf32>
    %29 = vector.extract_strided_slice %25 {offsets = [0, 3], sizes = [64, 1], strides = [1, 1]} : vector<64x128xf32> to vector<64x1xf32>
    %30 = arith.addf %28, %29 : vector<64x1xf32>
    %cst_19 = arith.constant 5.000000e-01 : f32
    %31 = vector.broadcast %cst_19 : f32 to vector<64x1xf32>
    %32 = arith.mulf %31, %30 : vector<64x1xf32>
    %33 = vector.extract_strided_slice %27 {offsets = [0, 1], sizes = [64, 1], strides = [1, 1]} : vector<64x2xf32> to vector<64x1xf32>
    %34 = vector.extract_strided_slice %25 {offsets = [0, 4], sizes = [64, 1], strides = [1, 1]} : vector<64x128xf32> to vector<64x1xf32>
    %35 = arith.addf %33, %34 : vector<64x1xf32>
    %cst_20 = arith.constant 5.000000e-01 : f32
    %36 = vector.broadcast %cst_20 : f32 to vector<64x1xf32>
    %37 = arith.mulf %36, %35 : vector<64x1xf32>
    %38 = arith.negf %32 : vector<64x1xf32>
    %39 = math.exp %38 : vector<64x1xf32>
    %cst_21 = arith.constant 1.000000e+00 : f32
    %40 = vector.broadcast %cst_21 : f32 to vector<64x1xf32>
    %41 = arith.addf %40, %39 : vector<64x1xf32>
    %42 = arith.divf %40, %41 : vector<64x1xf32>
    %43 = arith.negf %37 : vector<64x1xf32>
    %44 = math.exp %43 : vector<64x1xf32>
    %cst_22 = arith.constant 1.000000e+00 : f32
    %45 = vector.broadcast %cst_22 : f32 to vector<64x1xf32>
    %46 = arith.addf %45, %44 : vector<64x1xf32>
    %47 = arith.divf %45, %46 : vector<64x1xf32>
    %48 = arith.mulf %42, %47 : vector<64x1xf32>
    %cst_23 = arith.constant dense<0x7F800000> : vector<1xf32>
    %49 = vector.multi_reduction <minimumf>, %48, %cst_23 [0] : vector<64x1xf32> to vector<1xf32>
    %50 = vector.shape_cast %49 : vector<1xf32> to vector<1x1xf32>
    %cst_24 = arith.constant dense<0xFF800000> : vector<1xf32>
    %51 = vector.multi_reduction <maximumf>, %48, %cst_24 [0] : vector<64x1xf32> to vector<1xf32>
    %52 = vector.shape_cast %51 : vector<1xf32> to vector<1x1xf32>
    %53 = vector.broadcast %50 : vector<1x1xf32> to vector<64x1xf32>
    %54 = arith.subf %48, %53 : vector<64x1xf32>
    %55 = arith.subf %52, %50 : vector<1x1xf32>
    %cst_25 = arith.constant 9.99999997E-7 : f32
    %56 = vector.broadcast %cst_25 : f32 to vector<1x1xf32>
    %57 = arith.maximumf %55, %56 : vector<1x1xf32>
    %58 = vector.broadcast %57 : vector<1x1xf32> to vector<64x1xf32>
    %59 = arith.divf %54, %58 : vector<64x1xf32>
    %cst_26 = arith.constant dense<0.000000e+00> : vector<128xf32>
    %60 = vector.multi_reduction <add>, %25, %cst_26 [0] : vector<64x128xf32> to vector<128xf32>
    %61 = vector.shape_cast %60 : vector<128xf32> to vector<1x128xf32>
    %cst_27 = arith.constant 6.400000e+01 : f32
    %62 = vector.broadcast %cst_27 : f32 to vector<1x128xf32>
    %63 = arith.divf %61, %62 : vector<1x128xf32>
    %64 = vector.broadcast %63 : vector<1x128xf32> to vector<64x128xf32>
    %65 = arith.subf %25, %64 : vector<64x128xf32>
    %66 = vector.broadcast %59 : vector<64x1xf32> to vector<64x128xf32>
    %67 = arith.mulf %65, %66 : vector<64x128xf32>
    %cst_28 = arith.constant dense<0.000000e+00> : vector<3x128xf32>
    %68 = tpu.matmul %6, %67, %cst_28 {dimension_numbers = #tpu.dot_dimension_numbers<[1], [0], [0], [1], [0, 0, 1, 1], [], []>} : vector<3x64xf32>, vector<64x128xf32>, vector<3x128xf32> -> vector<3x128xf32>
    %c1 = arith.constant 1 : index
    %c0_29 = arith.constant 0 : index
    %c0_30 = arith.constant 0 : index
    %69 = vector.load %arg1[%c1, %c0_29, %c0_30] : memref<2x64x8xf32, #tpu.memory_space<vmem>>, vector<1x64x8xf32>
    %70 = vector.shape_cast %69 : vector<1x64x8xf32> to vector<64x8xf32>
    %c1_31 = arith.constant 1 : index
    %c0_32 = arith.constant 0 : index
    %c0_33 = arith.constant 0 : index
    %71 = vector.load %arg2[%c1_31, %c0_32, %c0_33] : memref<2x8x64xf32, #tpu.memory_space<vmem>>, vector<1x8x64xf32>
    %72 = vector.shape_cast %71 : vector<1x8x64xf32> to vector<8x64xf32>
    %cst_34 = arith.constant dense<0.000000e+00> : vector<64x64xf32>
    %73 = tpu.matmul %70, %72, %cst_34 {dimension_numbers = #tpu.dot_dimension_numbers<[1], [0], [0], [1], [0, 0, 1, 1], [], []>} : vector<64x8xf32>, vector<8x64xf32>, vector<64x64xf32> -> vector<64x64xf32>
    %cst_35 = arith.constant 0.353553385 : f32
    %74 = vector.broadcast %cst_35 : f32 to vector<64x64xf32>
    %75 = arith.mulf %73, %74 : vector<64x64xf32>
    %cst_36 = arith.constant dense<0xFF800000> : vector<64xf32>
    %76 = vector.multi_reduction <maximumf>, %75, %cst_36 [1] : vector<64x64xf32> to vector<64xf32>
    %77 = vector.shape_cast %76 : vector<64xf32> to vector<64x1xf32>
    %78 = vector.broadcast %77 : vector<64x1xf32> to vector<64x64xf32>
    %79 = arith.subf %75, %78 : vector<64x64xf32>
    %80 = math.exp %79 : vector<64x64xf32>
    %cst_37 = arith.constant dense<0.000000e+00> : vector<64xf32>
    %81 = vector.multi_reduction <add>, %80, %cst_37 [1] : vector<64x64xf32> to vector<64xf32>
    %82 = vector.shape_cast %81 : vector<64xf32> to vector<64x1xf32>
    %83 = vector.broadcast %82 : vector<64x1xf32> to vector<64x64xf32>
    %84 = arith.divf %80, %83 : vector<64x64xf32>
    %c1_38 = arith.constant 1 : index
    %c0_39 = arith.constant 0 : index
    %c0_40 = arith.constant 0 : index
    %85 = vector.load %arg4[%c1_38, %c0_39, %c0_40] : memref<2x64x128xf32, #tpu.memory_space<vmem>>, vector<1x64x128xf32>
    %86 = vector.shape_cast %85 : vector<1x64x128xf32> to vector<64x128xf32>
    %cst_41 = arith.constant dense<0.000000e+00> : vector<64x128xf32>
    %87 = tpu.matmul %84, %86, %cst_41 {dimension_numbers = #tpu.dot_dimension_numbers<[1], [0], [0], [1], [0, 0, 1, 1], [], []>} : vector<64x64xf32>, vector<64x128xf32>, vector<64x128xf32> -> vector<64x128xf32>
    %c1_42 = arith.constant 1 : index
    %c0_43 = arith.constant 0 : index
    %c0_44 = arith.constant 0 : index
    %88 = vector.load %arg3[%c1_42, %c0_43, %c0_44] : memref<2x64x2xf32, #tpu.memory_space<vmem>>, vector<1x64x2xf32>
    %89 = vector.shape_cast %88 : vector<1x64x2xf32> to vector<64x2xf32>
    %90 = vector.extract_strided_slice %89 {offsets = [0, 0], sizes = [64, 1], strides = [1, 1]} : vector<64x2xf32> to vector<64x1xf32>
    %91 = vector.extract_strided_slice %87 {offsets = [0, 3], sizes = [64, 1], strides = [1, 1]} : vector<64x128xf32> to vector<64x1xf32>
    %92 = arith.addf %90, %91 : vector<64x1xf32>
    %cst_45 = arith.constant 5.000000e-01 : f32
    %93 = vector.broadcast %cst_45 : f32 to vector<64x1xf32>
    %94 = arith.mulf %93, %92 : vector<64x1xf32>
    %95 = vector.extract_strided_slice %89 {offsets = [0, 1], sizes = [64, 1], strides = [1, 1]} : vector<64x2xf32> to vector<64x1xf32>
    %96 = vector.extract_strided_slice %87 {offsets = [0, 4], sizes = [64, 1], strides = [1, 1]} : vector<64x128xf32> to vector<64x1xf32>
    %97 = arith.addf %95, %96 : vector<64x1xf32>
    %cst_46 = arith.constant 5.000000e-01 : f32
    %98 = vector.broadcast %cst_46 : f32 to vector<64x1xf32>
    %99 = arith.mulf %98, %97 : vector<64x1xf32>
    %100 = arith.negf %94 : vector<64x1xf32>
    %101 = math.exp %100 : vector<64x1xf32>
    %cst_47 = arith.constant 1.000000e+00 : f32
    %102 = vector.broadcast %cst_47 : f32 to vector<64x1xf32>
    %103 = arith.addf %102, %101 : vector<64x1xf32>
    %104 = arith.divf %102, %103 : vector<64x1xf32>
    %105 = arith.negf %99 : vector<64x1xf32>
    %106 = math.exp %105 : vector<64x1xf32>
    %cst_48 = arith.constant 1.000000e+00 : f32
    %107 = vector.broadcast %cst_48 : f32 to vector<64x1xf32>
    %108 = arith.addf %107, %106 : vector<64x1xf32>
    %109 = arith.divf %107, %108 : vector<64x1xf32>
    %110 = arith.mulf %104, %109 : vector<64x1xf32>
    %cst_49 = arith.constant dense<0x7F800000> : vector<1xf32>
    %111 = vector.multi_reduction <minimumf>, %110, %cst_49 [0] : vector<64x1xf32> to vector<1xf32>
    %112 = vector.shape_cast %111 : vector<1xf32> to vector<1x1xf32>
    %cst_50 = arith.constant dense<0xFF800000> : vector<1xf32>
    %113 = vector.multi_reduction <maximumf>, %110, %cst_50 [0] : vector<64x1xf32> to vector<1xf32>
    %114 = vector.shape_cast %113 : vector<1xf32> to vector<1x1xf32>
    %115 = vector.broadcast %112 : vector<1x1xf32> to vector<64x1xf32>
    %116 = arith.subf %110, %115 : vector<64x1xf32>
    %117 = arith.subf %114, %112 : vector<1x1xf32>
    %cst_51 = arith.constant 9.99999997E-7 : f32
    %118 = vector.broadcast %cst_51 : f32 to vector<1x1xf32>
    %119 = arith.maximumf %117, %118 : vector<1x1xf32>
    %120 = vector.broadcast %119 : vector<1x1xf32> to vector<64x1xf32>
    %121 = arith.divf %116, %120 : vector<64x1xf32>
    %cst_52 = arith.constant dense<0.000000e+00> : vector<128xf32>
    %122 = vector.multi_reduction <add>, %87, %cst_52 [0] : vector<64x128xf32> to vector<128xf32>
    %123 = vector.shape_cast %122 : vector<128xf32> to vector<1x128xf32>
    %cst_53 = arith.constant 6.400000e+01 : f32
    %124 = vector.broadcast %cst_53 : f32 to vector<1x128xf32>
    %125 = arith.divf %123, %124 : vector<1x128xf32>
    %126 = vector.broadcast %125 : vector<1x128xf32> to vector<64x128xf32>
    %127 = arith.subf %87, %126 : vector<64x128xf32>
    %128 = vector.broadcast %121 : vector<64x1xf32> to vector<64x128xf32>
    %129 = arith.mulf %127, %128 : vector<64x128xf32>
    %cst_54 = arith.constant dense<0.000000e+00> : vector<3x128xf32>
    %130 = tpu.matmul %6, %129, %cst_54 {dimension_numbers = #tpu.dot_dimension_numbers<[1], [0], [0], [1], [0, 0, 1, 1], [], []>} : vector<3x64xf32>, vector<64x128xf32>, vector<3x128xf32> -> vector<3x128xf32>
    %131 = vector.shape_cast %68 : vector<3x128xf32> to vector<1x3x128xf32>
    %132 = vector.shape_cast %130 : vector<3x128xf32> to vector<1x3x128xf32>
    %133 = tpu.concatenate %131, %132 in 0 : vector<1x3x128xf32>, vector<1x3x128xf32> -> vector<2x3x128xf32>
    %c0_55 = arith.constant 0 : index
    %c0_56 = arith.constant 0 : index
    %c0_57 = arith.constant 0 : index
    %134 = vector.load %arg5[%c0_55, %c0_56, %c0_57] : memref<2x3x128xf32, #tpu.memory_space<vmem>>, vector<2x3x128xf32>
    tpu.vector_store %arg5[%c0_55, %c0_56, %c0_57], %133 {strides = array<i32>} : memref<2x3x128xf32, #tpu.memory_space<vmem>>, vector<2x3x128xf32>,
    return
  }
}

</mosaic_0001>

<bundles_post_ra>
// kernel: dvmnet_forward.2
= control target key start
LH: loop header
LB: loop body
LE: loop exit
PB: predicated region body
PF: predicated region fallthrough
CT: control target
= control target key end

     0   :  { %vm128_vm0 = vcmask 392192   ;;  %vm214_vm1 = vcmask 261120   ;;  %vm1522_vm2 = vmmov 0   ;;  %vm463_vm3 = vcmask 523264   ;;  %s2014_s1 = inlined_call_operand.vmem [shape: bf16[48,128], index: 1, kind: input, shape index: {}]   ;;  %s2015_s0 = inlined_call_operand.vmem [shape: bf16[64,48], index: 0, kind: input, shape index: {}]   ;;  %s2016_s2 = inlined_call_operand.vmem [shape: f32[1,128], index: 2, kind: input, shape index: {}]   ;;  %s2017_s20 = inlined_call_operand.vmem [shape: f32[64,128], index: 20, kind: output, shape index: {0}]   ;;  %s2018_s5 = inlined_call_operand.vmem [shape: bf16[32,128], index: 5, kind: input, shape index: {}]   ;;  %s2019_s3 = inlined_call_operand.vmem [shape: f32[1,32], index: 3, kind: input, shape index: {}]   ;;  %s2020_s4 = inlined_call_operand.vmem [shape: f32[1,32], index: 4, kind: input, shape index: {}]   ;;  %s2021_s7 = inlined_call_operand.vmem [shape: f32[4,64], index: 7, kind: input, shape index: {}]   ;;  %s2022_s10 = inlined_call_operand.vmem [shape: bf16[160,128], index: 10, kind: input, shape index: {}]   ;;  %s2023_s8 = inlined_call_operand.vmem [shape: f32[2,48], index: 8, kind: input, shape index: {}]   ;;  %s2024_s12 = inlined_call_operand.vmem [shape: bf16[128,64], index: 12, kind: input, shape index: {}]   ;;  %s2025_s6 = inlined_call_operand.vmem [shape: f32[1,128], index: 6, kind: input, shape index: {}]   ;;  %s2026_s21 = inlined_call_operand.vmem [shape: f32[64,128], index: 21, kind: output, shape index: {1}]   ;;  %s2027_s9 = inlined_call_operand.vmem [shape: f32[2,48], index: 9, kind: input, shape index: {}]   ;;  %s2028_s14 = inlined_call_operand.vmem [shape: bf16[64,64], index: 14, kind: input, shape index: {}]   ;;  %s2029_s11 = inlined_call_operand.vmem [shape: f32[1,128], index: 11, kind: input, shape index: {}]   ;;  %s2030_s16 = inlined_call_operand.vmem [shape: bf16[64,64], index: 16, kind: input, shape index: {}]   ;;  %s2031_s13 = inlined_call_operand.vmem [shape: f32[1,64], index: 13, kind: input, shape index: {}]   ;;  %s2032_s18 = inlined_call_operand.vmem [shape: bf16[64,128], index: 18, kind: input, shape index: {}]   ;;  %s2033_s15 = inlined_call_operand.vmem [shape: f32[1,64], index: 15, kind: input, shape index: {}]   ;;  %s2034_s17 = inlined_call_operand.vmem [shape: f32[1,64], index: 17, kind: input, shape index: {}]   ;;  %s2035_s19 = inlined_call_operand.vmem [shape: f32[1,128], index: 19, kind: input, shape index: {}]   ;;  %s2036_s22 = inlined_call_operand.vmem [shape: f32[2,128], index: 22, kind: output, shape index: {2}]  }
   0x1   :  { %2041 = sst [smem:[#allocation2_spill]] %s2014_s1 }
   0x2   :  { %2042 = sst [smem:[#allocation3_spill]] %s2015_s0  ;;  %s2048_s29 = sld [smem:[#allocation2_spill]] }
   0x3   :  { %2043 = sst [smem:[#allocation4_spill]] %s2016_s2  ;;  %s2049_s0 = sld [smem:[#allocation3_spill]] }
   0x4   :  { %2044 = sst [smem:[#allocation5_spill]] %s2017_s20  ;;  %s2050_s30 = sld [smem:[#allocation4_spill]] }
   0x5   :  { %2045 = sst [smem:[#allocation6_spill]] %s2018_s5  ;;  %s2051_s23 = sld [smem:[#allocation5_spill]] }
   0x6   :  { %2046 = sst [smem:[#allocation7_spill]] %s2019_s3  ;;  %s2052_s3 = sld [smem:[#allocation6_spill]] }
   0x7   :  { %2047 = sst [smem:[#allocation8_spill]] %s2020_s4  ;;  %s2053_s2 = sld [smem:[#allocation7_spill]] }
   0x8   :  { %v1465_v0 = vld [vmem:[%s2048_s29] sm:$0xff]   ;;  %v1466_v1 = vld [vmem:[%s2048_s29 + $0x8] sm:$0xff]   ;;  %v1467_v3 = vld [vmem:[%s2048_s29 + $0x10] sm:$0xff]   ;;  %s2054_s28 = sld [smem:[#allocation8_spill]] }
   0x9   :  { %1313 = vmatprep.subr.bf16.mxu0 %v1465_v0  ;;  %v1468_v2 = vld [vmem:[%s2049_s0] sm:$0xff]   ;;  %v1469_v4 = vld [vmem:[%s2049_s0 + $0x8] sm:$0xff]   ;;  %v1470_v5 = vld [vmem:[%s2049_s0 + $0x10] sm:$0xff]  }
   0xa   :  { %1314 = vmatpush3.bf16.msra.mxu0 %v1465_v0  ;;  %1319 = vmatprep.mubr.msk.bf16.mxu0 %vm128_vm0, %v1468_v2  ;;  %v1471_v6 = vld [vmem:[%s2049_s0 + $0x18] sm:$0xff]   ;;  %v1189_v7 = vld [vmem:[%s2050_s30] ss:$0 sm:$0xff] }
   0xb   :  { %1315 = vmatprep.subr.bf16.mxu0 %v1466_v1 }
   0xe   :  { %1316 = vmatpush3.bf16.msra.mxu0 %v1466_v1 }
   0xf   :  { %1317 = vmatprep.subr.bf16.mxu0 %v1467_v3 }
  0x12   :  { %1318 = vmatpush3.bf16.msra.mxu0 %v1467_v3 }
  0x15   :  { %1320 = vmatmul.mubr.msk.bf16.vlgmr.msra.gmra.mrb[0].mxu0 %vm128_vm0, %v1469_v4 }
  0x16   :  { %1323 = vmatprep.mubr.msk.bf16.mxu0 %vm128_vm0, %v1470_v5 }
  0x1d   :  { %1324 = vmatmul.mubr.msk.bf16.gmra.mrb[4].mxu0 %vm128_vm0, %v1471_v6 }
  0xe8   :  { %v1321_v8 = vpop.f32.mrb[0].mxu0 }
  0xe9   :  { %v1666_v9 = vadd.f32 %v1321_v8, %v1189_v7  ;;  %v175_v10 = vpop.f32.mrb[1].mxu0  ;;  %v1472_v8 = vld [vmem:[%s2052_s3] sm:$0xff]  }
  0xea   :  { %v1668_v11 = vadd.f32 %v1189_v7, %v175_v10  ;;  %v1322_v12 = vpop.f32.mrb[2].mxu0  ;;  %1327 = vmatprep.subr.bf16.mxu1 %v1472_v8  ;;  %v1473_v10 = vld [vmem:[%s2052_s3 + $0x8] sm:$0xff]  }
  0xeb   :  { %208 = vst [vmem:[%s2051_s23 + $0x10] sm:$0xff] %v1666_v9  ;;  %v1674_v13 = vadd.f32 %v1322_v12, %v1189_v7  ;;  %v178_v14 = vpop.f32.mrb[3].mxu0  ;;  %v221_v15 = vsel %vm214_vm1, %v1666_v9, 0.0  ;;  %1328 = vmatpush3.bf16.msra.mxu1 %v1472_v8  ;;  %v1520_v12 = vmov 0.0|0.0  }
  0xec   :  { %206 = vst [vmem:[%s2051_s23] sm:$0xff] %v1668_v11  ;;  %v1682_v16 = vadd.f32 %v1189_v7, %v178_v14  ;;  %222 = vadd.xlane.f32.xlu1 %v221_v15  ;;  %v215_v17 = vsel %vm214_vm1, %v1668_v11, 0.0  ;;  %1329 = vmatprep.subr.bf16.mxu1 %v1473_v10  ;;  %v1521_v14 = vmov 0.0  }
  0xed   :  { %209 = vst [vmem:[%s2051_s23 + $0x18] sm:$0xff] %v1674_v13  ;;  %216 = vadd.xlane.f32.xlu0 %v215_v17  ;;  %v224_v18 = vsel %vm214_vm1, %v1674_v13, 0.0  ;;  %1358 = vmatprep.subr.bf16.mxu0 %v1521_v14 }
  0xee   :  { %207 = vst [vmem:[%s2051_s23 + $0x8] sm:$0xff] %v1682_v16  ;;  %v218_v20 = vsel %vm214_vm1, %v1682_v16, 0.0  ;;  %1364 = vmatprep.mubr.msk.bf16.mxu0 %vm1522_vm2, %v1521_v14 }
  0xef   :  { %1330 = vmatpush3.bf16.msra.mxu1 %v1473_v10 }
  0xf0   :  { %225 = vadd.xlane.f32.xlu1 %v224_v18  ;;  %v1325_v19 = vpop.f32.mrb[4].mxu0  ;;  %1450 = vmatprep.subr.bf16.mxu1 %v1520_v12 }
  0xf1   :  { %v1698_v21 = vadd.f32 %v1325_v19, %v1189_v7  ;;  %v191_v22 = vpop.f32.mrb[5].mxu0  ;;  %219 = vadd.xlane.f32.xlu0 %v218_v20 }
  0xf2   :  { %v1700_v23 = vadd.f32 %v1189_v7, %v191_v22  ;;  %v1326_v24 = vpop.f32.mrb[6].mxu0 }
  0xf3   :  { %212 = vst [vmem:[%s2051_s23 + $0x30] sm:$0xff] %v1698_v21  ;;  %v1706_v25 = vadd.f32 %v1326_v24, %v1189_v7  ;;  %v194_v26 = vpop.f32.mrb[7].mxu0  ;;  %v233_v30 = vsel %vm214_vm1, %v1698_v21, 0.0 }
  0xf4   :  { %210 = vst [vmem:[%s2051_s23 + $0x20] sm:$0xff] %v1700_v23  ;;  %v1712_v27 = vadd.f32 %v1189_v7, %v194_v26  ;;  %v227_v28 = vsel %vm214_vm1, %v1700_v23, 0.0 }
  0xf5   :  { %213 = vst [vmem:[%s2051_s23 + $0x38] sm:$0xff] %v1706_v25  ;;  %228 = vadd.xlane.f32.xlu0 %v227_v28  ;;  %v236_v31 = vsel %vm214_vm1, %v1706_v25, 0.0 }
  0xf6   :  { %211 = vst [vmem:[%s2051_s23 + $0x28] sm:$0xff] %v1712_v27  ;;  %v230_v29 = vsel %vm214_vm1, %v1712_v27, 0.0 }
  0xf7   :  { %231 = vadd.xlane.f32.xlu1 %v230_v29 }
  0xf9   :  { %234 = vadd.xlane.f32.xlu0 %v233_v30 }
  0xfb   :  { %237 = vadd.xlane.f32.xlu1 %v236_v31 }
 0x179   :  { %v223_v32 = vpop.xlane.xlu1 %222 }
 0x17a   :  { %v242_v33 = vmul.f32 0.03125, %v223_v32  ;;  %v217_v34 = vpop.xlane.xlu0 %216 }
 0x17b   :  { %v240_v35 = vmul.f32 0.03125, %v217_v34 }
 0x17c   :  { %v1731_v36 = vsub.f32 %v1666_v9, %v242_v33 }
 0x17d   :  { %v1734_v37 = vsub.f32 %v1668_v11, %v240_v35  ;;  %v226_v38 = vpop.xlane.xlu1 %225 }
 0x17e   :  { %v243_v39 = vmul.f32 0.03125, %v226_v38  ;;  %v220_v40 = vpop.xlane.xlu0 %219  ;;  %v258_v46 = vmul.f32 %v1731_v36, %v1731_v36 }
 0x17f   :  { %v241_v41 = vmul.f32 0.03125, %v220_v40  ;;  %v256_v42 = vmul.f32 %v1734_v37, %v1734_v37 }
 0x180   :  { %v1739_v43 = vsub.f32 %v1674_v13, %v243_v39  ;;  %v270_v54 = vsel %vm214_vm1, %v258_v46, 0.0 }
 0x181   :  { %v1742_v44 = vsub.f32 %v1682_v16, %v241_v41  ;;  %v264_v45 = vsel %vm214_vm1, %v256_v42, 0.0 }
 0x182   :  { %265 = vadd.xlane.f32.xlu0 %v264_v45  ;;  %v229_v47 = vpop.xlane.xlu0 %228  ;;  %v259_v51 = vmul.f32 %v1739_v43, %v1739_v43 }
 0x183   :  { %v244_v48 = vmul.f32 0.03125, %v229_v47  ;;  %v257_v49 = vmul.f32 %v1742_v44, %v1742_v44 }
 0x184   :  { %v232_v50 = vpop.xlane.xlu1 %231  ;;  %v273_v61 = vsel %vm214_vm1, %v259_v51, 0.0 }
 0x185   :  { %v1752_v52 = vsub.f32 %v1700_v23, %v244_v48  ;;  %v245_v53 = vmul.f32 0.03125, %v232_v50  ;;  %v267_v55 = vsel %vm214_vm1, %v257_v49, 0.0  ;;  %v1201_v49 = vld [vmem:[%s2053_s2] ss:$0 sm:$0xff] }
 0x186   :  { %271 = vadd.xlane.f32.xlu0 %v270_v54  ;;  %268 = vadd.xlane.f32.xlu1 %v267_v55  ;;  %v235_v56 = vpop.xlane.xlu0 %234 }
 0x187   :  { %v1757_v57 = vsub.f32 %v1712_v27, %v245_v53  ;;  %v246_v58 = vmul.f32 0.03125, %v235_v56  ;;  %v260_v59 = vmul.f32 %v1752_v52, %v1752_v52 }
 0x188   :  { %v238_v60 = vpop.xlane.xlu1 %237 }
 0x189   :  { %v1763_v62 = vsub.f32 %v1698_v21, %v246_v58  ;;  %v247_v63 = vmul.f32 0.03125, %v238_v60  ;;  %v276_v0 = vsel %vm214_vm1, %v260_v59, 0.0  ;;  %v261_v1 = vmul.f32 %v1757_v57, %v1757_v57 }
 0x18a   :  { %274 = vadd.xlane.f32.xlu1 %v273_v61  ;;  %277 = vadd.xlane.f32.xlu0 %v276_v0 }
 0x18b   :  { %v1769_v2 = vsub.f32 %v1706_v25, %v247_v63  ;;  %v262_v3 = vmul.f32 %v1763_v62, %v1763_v62  ;;  %v279_v4 = vsel %vm214_vm1, %v261_v1, 0.0 }
 0x18d   :  { %v282_v5 = vsel %vm214_vm1, %v262_v3, 0.0  ;;  %v263_v6 = vmul.f32 %v1769_v2, %v1769_v2 }
 0x18e   :  { %280 = vadd.xlane.f32.xlu1 %v279_v4  ;;  %283 = vadd.xlane.f32.xlu0 %v282_v5 }
 0x18f   :  { %v285_v7 = vsel %vm214_vm1, %v263_v6, 0.0 }
 0x192   :  { %286 = vadd.xlane.f32.xlu1 %v285_v7 }
 0x20f   :  { %v266_v15 = vpop.xlane.xlu0 %265 }
 0x210   :  { %v288_v17 = vmul.f32 0.03125, %v266_v15 }
 0x212   :  { %v296_v18 = vadd.f32 1e-05, %v288_v17 }
 0x213   :  { %v269_v19 = vpop.xlane.xlu1 %268  ;;  %v272_v20 = vpop.xlane.xlu0 %271 }
 0x214   :  { %1504 = vrsqrt.f32 %v296_v18  ;;  %v289_v22 = vmul.f32 0.03125, %v269_v19  ;;  %v290_v24 = vmul.f32 0.03125, %v272_v20  ;;  %v1451_v19 = vpack.c.bf16 %v1682_v16, %v1668_v11 }
 0x215   :  { %v1457_v16 = vpack.c.bf16 %v1712_v27, %v1700_v23  ;;  %v1474_v23 = vld [vmem:[%s2022_s10 + $0x10] sm:$0xff]   ;;  %v1477_v27 = vld [vmem:[%s2022_s10] sm:$0xff]  }
 0x216   :  { %v297_v26 = vadd.f32 1e-05, %v289_v22  ;;  %v298_v28 = vadd.f32 1e-05, %v290_v24  ;;  %1359 = vmatpush3.bf16.msra.mxu0 %v1474_v23 }
 0x217   :  { %v275_v29 = vpop.xlane.xlu1 %274  ;;  %v278_v30 = vpop.xlane.xlu0 %277  ;;  %1360 = vmatprep.subr.bf16.mxu0 %v1521_v14 }
 0x218   :  { %1506 = vrsqrt.f32 %v297_v26  ;;  %v291_v31 = vmul.f32 0.03125, %v275_v29  ;;  %v292_v32 = vmul.f32 0.03125, %v278_v30  ;;  %v1478_v30 = vld [vmem:[%s2022_s10 + $0x28] sm:$0xff]  }
 0x219   :  { %1508 = vrsqrt.f32 %v298_v28 }
 0x21a   :  { %v299_v33 = vadd.f32 1e-05, %v291_v31  ;;  %v300_v34 = vadd.f32 1e-05, %v292_v32  ;;  %v1479_v31 = vld [vmem:[%s2022_s10 + $0x8] sm:$0xff]   ;;  %v1480_v32 = vld [vmem:[%s2022_s10 + $0x30] sm:$0xff]  }
 0x21b   :  { %v281_v35 = vpop.xlane.xlu1 %280  ;;  %v284_v38 = vpop.xlane.xlu0 %283 }
 0x21c   :  { %1510 = vrsqrt.f32 %v299_v33  ;;  %v293_v39 = vmul.f32 0.03125, %v281_v35  ;;  %v294_v40 = vmul.f32 0.03125, %v284_v38  ;;  %v1203_v33 = vld [vmem:[%s2025_s6] ss:$0 sm:$0xff] }
 0x21d   :  { %1512 = vrsqrt.f32 %v300_v34 }
 0x21e   :  { %v1505_v41 = vpop.eup %1504  ;;  %v301_v42 = vadd.f32 1e-05, %v293_v39  ;;  %v302_v45 = vadd.f32 1e-05, %v294_v40 }
 0x21f   :  { %v287_v46 = vpop.xlane.xlu1 %286  ;;  %v312_v47 = vmul.f32 %v1505_v41, %v1734_v37  ;;  %v1202_v37 = vld [vmem:[%s2054_s28] ss:$0 sm:$0xff] }
 0x220   :  { %1514 = vrsqrt.f32 %v301_v42  ;;  %v295_v48 = vmul.f32 0.03125, %v287_v46 }
 0x221   :  { %1516 = vrsqrt.f32 %v302_v45  ;;  %v327_v55 = vmul.f32 %v1201_v49, %v312_v47 }
 0x222   :  { %v1507_v50 = vpop.eup %1506  ;;  %v303_v51 = vadd.f32 1e-05, %v295_v48 }
 0x223   :  { %v1509_v53 = vpop.eup %1508  ;;  %v313_v54 = vmul.f32 %v1507_v50, %v1742_v44  ;;  %v342_v63 = vadd.f32 %v1202_v37, %v327_v55 }
 0x224   :  { %v314_v56 = vmul.f32 %v1509_v53, %v1731_v36  ;;  %1518 = vrsqrt.f32 %v303_v51 }
 0x225   :  { %v328_v58 = vmul.f32 %v1201_v49, %v313_v54 }
 0x226   :  { %v1511_v59 = vpop.eup %1510  ;;  %v329_v1 = vmul.f32 %v1201_v49, %v314_v56  ;;  %v1481_v56 = vld [vmem:[%s2022_s10 + $0x38] sm:$0xff]  }
 0x227   :  { %v1513_v60 = vpop.eup %1512  ;;  %v315_v61 = vmul.f32 %v1511_v59, %v1739_v43  ;;  %v343_v0 = vadd.f32 %v1202_v37, %v328_v58  ;;  %v1484_v59 = vld [vmem:[%s2024_s12] sm:$0xff]  }
 0x228   :  { %v316_v3 = vmul.f32 %v1513_v60, %v1752_v52  ;;  %v344_v7 = vadd.f32 %v1202_v37, %v329_v1  ;;  %v540_v1 = vld [vmem:[%s2027_s9] sm:$0x3] }
 0x229   :  { %v350_v4 = vpack.c.bf16 %v343_v0, %v342_v63  ;;  %v330_v44 = vmul.f32 %v1201_v49, %v315_v61  ;;  %v1482_v61 = vld [vmem:[%s2022_s10 + $0x40] sm:$0xff]   ;;  %v1485_v63 = vld [vmem:[%s2024_s12 + $0x8] sm:$0xff]  }
 0x22a   :  { %v1515_v5 = vpop.eup %1514  ;;  %v331_v10 = vmul.f32 %v1201_v49, %v316_v3  ;;  %v1483_v0 = vld [vmem:[%s2022_s10 + $0x48] sm:$0xff]   ;;  %v1486_v3 = vld [vmem:[%s2024_s12 + $0x10] sm:$0xff]  }
 0x22b   :  { %v1517_v6 = vpop.eup %1516  ;;  %v317_v36 = vmul.f32 %v1515_v5, %v1757_v57  ;;  %1331 = vmatprep.mubr.msk.bf16.mxu1 %vm214_vm1, %v350_v4  ;;  %v345_v8 = vadd.f32 %v1202_v37, %v330_v44  ;;  %v541_v4 = vpack.c.bf16 %v540_v1, %v540_v1 }
 0x22c   :  { %v318_v15 = vmul.f32 %v1517_v6, %v1763_v62  ;;  %v346_v20 = vadd.f32 %v1202_v37, %v331_v10  ;;  %v1454_v62 = vpack.c.bf16 %v1674_v13, %v1666_v9  ;;  %v1460_v9 = vpack.c.bf16 %v1706_v25, %v1698_v21  ;;  %v462_v13 = vld [vmem:[%s2021_s7] sm:$0xf]  ;;  %v1475_v21 = vld [vmem:[%s2022_s10 + $0x18] sm:$0xff]   ;;  %v1489_v10 = vld [vmem:[%s2024_s12 + $0x28] sm:$0xff]  }
 0x22d   :  { %v351_v17 = vpack.c.bf16 %v345_v8, %v344_v7  ;;  %v332_v43 = vmul.f32 %v1201_v49, %v317_v36  ;;  %1361 = vmatpush3.bf16.msra.mxu0 %v1475_v21  ;;  %v1476_v25 = vld [vmem:[%s2022_s10 + $0x20] sm:$0xff]   ;;  %v1487_v7 = vld [vmem:[%s2024_s12 + $0x18] sm:$0xff]  }
 0x22e   :  { %v1519_v18 = vpop.eup %1518  ;;  %v333_v57 = vmul.f32 %v1201_v49, %v318_v15  ;;  %1362 = vmatprep.subr.bf16.mxu0 %v1521_v14  ;;  %v1488_v8 = vld [vmem:[%s2024_s12 + $0x20] sm:$0xff]   ;;  %v1490_v15 = vld [vmem:[%s2024_s12 + $0x30] sm:$0xff]  }
 0x22f   :  { %v319_v52 = vmul.f32 %v1519_v18, %v1769_v2  ;;  %1332 = vmatmul.mubr.msk.bf16.vlgmr.msra.gmra.mrb[0].mxu1 %vm214_vm1, %v351_v17  ;;  %v347_v22 = vadd.f32 %v1202_v37, %v332_v43  ;;  %v538_v2 = vld [vmem:[%s2023_s8] sm:$0x3]  ;;  %v1491_v17 = vld [vmem:[%s2024_s12 + $0x38] sm:$0xff]   ;;  %v1493_v18 = vld [vmem:[%s2028_s14 + $0x8] sm:$0xff]  }
 0x230   :  { %1452 = vmatpush3.bf16.msra.mxu1 %v1451_v19  ;;  %v348_v28 = vadd.f32 %v1202_v37, %v333_v57  ;;  %v1492_v43 = vld [vmem:[%s2028_s14] sm:$0xff]  }
 0x231   :  { %1453 = vmatprep.subr.bf16.mxu1 %v1520_v12  ;;  %v352_v24 = vpack.c.bf16 %v347_v22, %v346_v20  ;;  %v334_v26 = vmul.f32 %v1201_v49, %v319_v52  ;;  %1363 = vmatpush3.bf16.msra.mxu0 %v1476_v25 }
 0x232   :  { %1376 = vmatprep.subr.bf16.mxu0 %v1521_v14 }
 0x233   :  { %1335 = vmatprep.mubr.msk.bf16.mxu1 %vm214_vm1, %v352_v24  ;;  %v349_v29 = vadd.f32 %v1202_v37, %v334_v26 }
 0x234   :  { %1455 = vmatpush3.bf16.msra.mxu1 %v1454_v62 }
 0x235   :  { %1456 = vmatprep.subr.bf16.mxu1 %v1520_v12  ;;  %v353_v11 = vpack.c.bf16 %v349_v29, %v348_v28 }
 0x237   :  { %1336 = vmatmul.mubr.msk.bf16.gmra.mrb[4].mxu1 %vm214_vm1, %v353_v11 }
 0x238   :  { %1458 = vmatpush3.bf16.msra.mxu1 %v1457_v16  ;;  %1355 = vmatprep.mubr.msk.f32.mxu1 %vm1522_vm2, %v1521_v14  ;;  %v1225_v16 = vld [vmem:[%s2029_s11] ss:$0 sm:$0xff] }
 0x239   :  { %1459 = vmatprep.subr.bf16.mxu1 %v1520_v12  ;;  %v539_v12 = vpack.c.bf16 %v538_v2, %v538_v2 }
 0x23b   :  { %1365 = vmatmul.mubr.msk.bf16.vlgmr.msra.gmra.mrb[8].mxu0 %vm128_vm0, %v539_v12 }
 0x23c   :  { %1461 = vmatpush3.bf16.msra.mxu1 %v1460_v9  ;;  %1377 = vmatpush3.bf16.msra.mxu0 %v1478_v30  ;;  %v1494_v30 = vld [vmem:[%s2028_s14 + $0x10] sm:$0xff]  }
 0x23d   :  { %1368 = vmatprep.subr.bf16.mxu1 %v1521_v14  ;;  %1380 = vmatprep.mubr.msk.bf16.mxu0 %vm1522_vm2, %v1521_v14 }
 0x23e   :  { %1378 = vmatprep.subr.bf16.mxu0 %v1521_v14 }
 0x23f   :  { %1356 = vmatmul.mubr.msk.f32.vlgmr.msra.gmra.mrb[8].mxu1 %vm463_vm3, %v462_v13 }
 0x240   :  { %1372 = vmatprep.mubr.msk.bf16.mxu1 %vm1522_vm2, %v1521_v14  ;;  %1369 = vmatpush3.bf16.msra.mxu1 %v1477_v27 }
 0x241   :  { %1370 = vmatprep.subr.bf16.mxu1 %v1521_v14  ;;  %1379 = vmatpush3.bf16.msra.mxu0 %v1480_v32  ;;  %v1226_v32 = vld [vmem:[%s2031_s13] ss:$0 sm:$0xff] }
 0x242   :  { %1394 = vmatprep.subr.bf16.mxu0 %v1521_v14 }
 0x244   :  { %1371 = vmatpush3.bf16.msra.mxu1 %v1479_v31  ;;  %v1495_v31 = vld [vmem:[%s2028_s14 + $0x18] sm:$0xff]  }
 0x245   :  { %1384 = vmatprep.subr.bf16.mxu1 %v1521_v14 }
 0x302   :  { %v1333_v34 = vpop.f32.mrb[0].mxu1 }
 0x303   :  { %v432_v35 = vadd.f32 %v1333_v34, %v1203_v33  ;;  %v423_v38 = vpop.f32.mrb[1].mxu1 }
 0x304   :  { %v424_v39 = vadd.f32 %v1203_v33, %v423_v38  ;;  %v1334_v40 = vpop.f32.mrb[2].mxu1 }
 0x305   :  { %456 = vst [vmem:[%s2026_s21 + $0x10] sm:$0xff] %v432_v35  ;;  %v435_v41 = vadd.f32 %v1334_v40, %v1203_v33  ;;  %v426_v42 = vpop.f32.mrb[3].mxu1 }
 0x306   :  { %454 = vst [vmem:[%s2026_s21] sm:$0xff] %v424_v39  ;;  %v427_v45 = vadd.f32 %v1203_v33, %v426_v42  ;;  %v1496_v42 = vld [vmem:[%s2030_s16] sm:$0xff]  }
 0x307   :  { %457 = vst [vmem:[%s2026_s21 + $0x18] sm:$0xff] %v435_v41 }
 0x308   :  { %455 = vst [vmem:[%s2026_s21 + $0x8] sm:$0xff] %v427_v45 }
 0x30a   :  { %v1337_v46 = vpop.f32.mrb[4].mxu1 }
 0x30b   :  { %v448_v47 = vadd.f32 %v1337_v46, %v1203_v33  ;;  %v439_v48 = vpop.f32.mrb[5].mxu1  ;;  %v1497_v46 = vld [vmem:[%s2030_s16 + $0x8] sm:$0xff]  }
 0x30c   :  { %v440_v49 = vadd.f32 %v1203_v33, %v439_v48  ;;  %v1338_v50 = vpop.f32.mrb[6].mxu1  ;;  %v1499_v48 = vld [vmem:[%s2030_s16 + $0x18] sm:$0xff]  }
 0x30d   :  { %460 = vst [vmem:[%s2026_s21 + $0x30] sm:$0xff] %v448_v47  ;;  %v451_v51 = vadd.f32 %v1338_v50, %v1203_v33  ;;  %v442_v53 = vpop.f32.mrb[7].mxu1  ;;  %v1498_v47 = vld [vmem:[%s2030_s16 + $0x10] sm:$0xff]   ;;  %v1235_v50 = vld [vmem:[%s2033_s15] ss:$0 sm:$0xff] }
 0x30e   :  { %458 = vst [vmem:[%s2026_s21 + $0x20] sm:$0xff] %v440_v49  ;;  %v443_v54 = vadd.f32 %v1203_v33, %v442_v53  ;;  %v617_v44 = vpop.f32.mrb[8].mxu0  ;;  %v1500_v49 = vld [vmem:[%s2032_s18] sm:$0xff]  }
 0x30f   :  { %461 = vst [vmem:[%s2026_s21 + $0x38] sm:$0xff] %v451_v51  ;;  %v1366_v5 = vpop.f32.mrb[9].mxu0 }
 0x310   :  { %459 = vst [vmem:[%s2026_s21 + $0x28] sm:$0xff] %v443_v54  ;;  %v620_v6 = vpop.f32.mrb[10].mxu0 }
 0x311   :  { %v1367_v36 = vpop.f32.mrb[11].mxu0 }
 0x312   :  { %v533_v55 = vpop.f32.mrb[8].mxu1 }
 0x313   :  { %v537_v37 = vpack.c.bf16 %v533_v55, %v533_v55  ;;  %v1357_v58 = vpop.f32.mrb[9].mxu1 }
 0x315   :  { %v679_v60 = vrot.slane %v537_v37, 1  ;;  %1373 = vmatmul.mubr.msk.bf16.vlgmr.msra.gmra.mrb[12].mxu1 %vm214_vm1, %v537_v37 }
 0x316   :  { %1385 = vmatpush3.bf16.msra.mxu1 %v1481_v56  ;;  %1390 = vmatprep.mubr.msk.bf16.mxu1 %vm1522_vm2, %v1521_v14 }
 0x317   :  { %1381 = vmatmul.mubr.msk.bf16.vlgmr.msra.gmra.mrb[12].mxu0 %vm214_vm1, %v679_v60  ;;  %1386 = vmatprep.subr.bf16.mxu1 %v1521_v14  ;;  %v1501_v60 = vld [vmem:[%s2032_s18 + $0x8] sm:$0xff]  }
 0x318   :  { %1395 = vmatpush3.bf16.msra.mxu0 %v1484_v59  ;;  %1410 = vmatprep.mubr.msk.bf16.mxu0 %vm1522_vm2, %v1521_v14 }
 0x319   :  { %1396 = vmatprep.subr.bf16.mxu0 %v1521_v14 }
 0x31a   :  { %1387 = vmatpush3.bf16.msra.mxu1 %v1482_v61  ;;  %v1502_v61 = vld [vmem:[%s2032_s18 + $0x10] sm:$0xff]  }
 0x31b   :  { %1388 = vmatprep.subr.bf16.mxu1 %v1521_v14 }
 0x31c   :  { %1397 = vmatpush3.bf16.msra.mxu0 %v1485_v63  ;;  %v1503_v63 = vld [vmem:[%s2032_s18 + $0x18] sm:$0xff]  }
 0x31d   :  { %1398 = vmatprep.subr.bf16.mxu0 %v1521_v14 }
 0x31e   :  { %1389 = vmatpush3.bf16.msra.mxu1 %v1483_v0  ;;  %v1241_v0 = vld [vmem:[%s2034_s17] ss:$0 sm:$0xff] }
 0x31f   :  { %1414 = vmatprep.subr.bf16.mxu1 %v1521_v14 }
 0x320   :  { %1399 = vmatpush3.bf16.msra.mxu0 %v1486_v3 }
 0x321   :  { %1391 = vmatmul.mubr.msk.bf16.vlgmr.msra.gmra.mrb[16].mxu1 %vm128_vm0, %v541_v4  ;;  %1400 = vmatprep.subr.bf16.mxu0 %v1521_v14 }
 0x322   :  { %1422 = vmatprep.mubr.msk.bf16.mxu1 %vm1522_vm2, %v1521_v14  ;;  %1415 = vmatpush3.bf16.msra.mxu1 %v1492_v43 }
 0x323   :  { %1416 = vmatprep.subr.bf16.mxu1 %v1521_v14 }
 0x324   :  { %1401 = vmatpush3.bf16.msra.mxu0 %v1487_v7 }
 0x325   :  { %1402 = vmatprep.subr.bf16.mxu0 %v1521_v14 }
 0x326   :  { %1417 = vmatpush3.bf16.msra.mxu1 %v1493_v18 }
 0x327   :  { %1418 = vmatprep.subr.bf16.mxu1 %v1521_v14 }
 0x328   :  { %1403 = vmatpush3.bf16.msra.mxu0 %v1488_v8 }
 0x329   :  { %1404 = vmatprep.subr.bf16.mxu0 %v1521_v14 }
 0x32a   :  { %1419 = vmatpush3.bf16.msra.mxu1 %v1494_v30 }
 0x32b   :  { %1420 = vmatprep.subr.bf16.mxu1 %v1521_v14 }
 0x32c   :  { %1405 = vmatpush3.bf16.msra.mxu0 %v1489_v10 }
 0x32d   :  { %1406 = vmatprep.subr.bf16.mxu0 %v1521_v14 }
 0x32e   :  { %1421 = vmatpush3.bf16.msra.mxu1 %v1495_v31 }
 0x32f   :  { %1426 = vmatprep.subr.bf16.mxu1 %v1521_v14 }
 0x330   :  { %1407 = vmatpush3.bf16.msra.mxu0 %v1490_v15 }
 0x331   :  { %1408 = vmatprep.subr.bf16.mxu0 %v1521_v14 }
 0x334   :  { %1409 = vmatpush3.bf16.msra.mxu0 %v1491_v17 }
 0x335   :  { %1438 = vmatprep.subr.bf16.mxu0 %v1521_v14 }
 0x3e8   :  { %v672_v19 = vpop.f32.mrb[12].mxu1 }
 0x3e9   :  { %v673_v52 = vadd.f32 %v672_v19, %v617_v44  ;;  %v1374_v20 = vpop.f32.mrb[13].mxu1 }
 0x3ea   :  { %v675_v22 = vpop.f32.mrb[14].mxu1  ;;  %v729_v57 = vpop.f32.mrb[12].mxu0 }
 0x3eb   :  { %v735_v24 = vadd.f32 %v729_v57, %v673_v52  ;;  %v1375_v26 = vpop.f32.mrb[15].mxu1  ;;  %v1382_v62 = vpop.f32.mrb[13].mxu0 }
 0x3ec   :  { %v732_v28 = vpop.f32.mrb[14].mxu0 }
 0x3ed   :  { %v1383_v29 = vpop.f32.mrb[15].mxu0 }
 0x3f4   :  { %v791_v11 = vpop.f32.mrb[16].mxu1 }
 0x3f5   :  { %v797_v9 = vadd.f32 %v791_v11, %v735_v24  ;;  %v1392_v13 = vpop.f32.mrb[17].mxu1 }
 0x3f6   :  { %v794_v23 = vpop.f32.mrb[18].mxu1 }
 0x3f7   :  { %v805_v21 = vadd.f32 %v1225_v16, %v797_v9  ;;  %v1393_v25 = vpop.f32.mrb[19].mxu1 }
 0x3f9   :  { %v806_v27 = vmul.f32 0.01, %v805_v21 }
 0x3fb   :  { %v807_v2 = vmax.f32 %v805_v21, %v806_v27 }
 0x3fd   :  { %v808_v12 = vpack.c.bf16 %v807_v2, %v807_v2 }
 0x3ff   :  { %1411 = vmatmul.mubr.bf16.vlgmr.msra.gmra.mrb[16].mxu0 %v808_v12 }
 0x400   :  { %1446 = vmatprep.mubr.msk.bf16.mxu0 %vm1522_vm2, %v1521_v14  ;;  %1439 = vmatpush3.bf16.msra.mxu0 %v1500_v49 }
 0x401   :  { %1440 = vmatprep.subr.bf16.mxu0 %v1521_v14 }
 0x404   :  { %1441 = vmatpush3.bf16.msra.mxu0 %v1501_v60 }
 0x405   :  { %1442 = vmatprep.subr.bf16.mxu0 %v1521_v14 }
 0x408   :  { %1443 = vmatpush3.bf16.msra.mxu0 %v1502_v61 }
 0x409   :  { %1444 = vmatprep.subr.bf16.mxu0 %v1521_v14 }
 0x40c   :  { %1445 = vmatpush3.bf16.msra.mxu0 %v1503_v63 }
 0x4d2   :  { %v914_v33 = vpop.f32.mrb[16].mxu0 }
 0x4d3   :  { %v915_v34 = vadd.f32 %v1226_v32, %v914_v33  ;;  %v1412_v35 = vpop.f32.mrb[17].mxu0 }
 0x4d4   :  { %v917_v38 = vpop.f32.mrb[18].mxu0 }
 0x4d5   :  { %v920_v39 = vmul.f32 0.01, %v915_v34  ;;  %v1413_v40 = vpop.f32.mrb[19].mxu0 }
 0x4d7   :  { %v921_v41 = vmax.f32 %v915_v34, %v920_v39 }
 0x4d9   :  { %v922_v45 = vpack.c.bf16 %v921_v41, %v921_v41 }
 0x4db   :  { %1423 = vmatmul.mubr.msk.bf16.vlgmr.msra.gmra.mrb[20].mxu1 %vm463_vm3, %v922_v45 }
 0x4dc   :  { %1427 = vmatpush3.bf16.msra.mxu1 %v1496_v42  ;;  %1434 = vmatprep.mubr.msk.bf16.mxu1 %vm1522_vm2, %v1521_v14 }
 0x4dd   :  { %1428 = vmatprep.subr.bf16.mxu1 %v1521_v14 }
 0x4e0   :  { %1429 = vmatpush3.bf16.msra.mxu1 %v1497_v46 }
 0x4e1   :  { %1430 = vmatprep.subr.bf16.mxu1 %v1521_v14 }
 0x4e4   :  { %1431 = vmatpush3.bf16.msra.mxu1 %v1498_v47 }
 0x4e5   :  { %1432 = vmatprep.subr.bf16.mxu1 %v1521_v14  ;;  %v1247_v14 = vld [vmem:[%s2035_s19] ss:$0 sm:$0xff] }
 0x4e8   :  { %1433 = vmatpush3.bf16.msra.mxu1 %v1499_v48 }
 0x5ae   :  { %v999_v51 = vpop.f32.mrb[20].mxu1 }
 0x5af   :  { %v1000_v53 = vadd.f32 %v1235_v50, %v999_v51  ;;  %v1424_v54 = vpop.f32.mrb[21].mxu1 }
 0x5b0   :  { %v1002_v55 = vpop.f32.mrb[22].mxu1 }
 0x5b1   :  { %v1005_v56 = vmul.f32 0.01, %v1000_v53  ;;  %v1425_v37 = vpop.f32.mrb[23].mxu1 }
 0x5b3   :  { %v1006_v58 = vmax.f32 %v1000_v53, %v1005_v56 }
 0x5b5   :  { %v1007_v59 = vpack.c.bf16 %v1006_v58, %v1006_v58 }
 0x5b7   :  { %1435 = vmatmul.mubr.msk.bf16.vlgmr.msra.gmra.mrb[24].mxu1 %vm463_vm3, %v1007_v59 }
 0x68a   :  { %v1084_v1 = vpop.f32.mrb[24].mxu1 }
 0x68b   :  { %v1085_v3 = vadd.f32 %v1241_v0, %v1084_v1  ;;  %v1436_v4 = vpop.f32.mrb[25].mxu1 }
 0x68c   :  { %v1087_v44 = vpop.f32.mrb[26].mxu1 }
 0x68d   :  { %v1090_v5 = vadd.f32 %v1085_v3, %v915_v34  ;;  %v1437_v6 = vpop.f32.mrb[27].mxu1 }
 0x68f   :  { %v1091_v36 = vmul.f32 0.01, %v1090_v5 }
 0x691   :  { %v1092_v7 = vmax.f32 %v1090_v5, %v1091_v36 }
 0x693   :  { %v1093_v8 = vpack.c.bf16 %v1092_v7, %v1092_v7 }
 0x695   :  { %1447 = vmatmul.mubr.msk.bf16.vlgmr.msra.gmra.mrb[20].mxu0 %vm463_vm3, %v1093_v8 }
 0x768   :  { %v1170_v10 = vpop.f32.mrb[20].mxu0 }
 0x769   :  { %v1171_v15 = vadd.f32 %v1247_v14, %v1170_v10  ;;  %v1448_v17 = vpop.f32.mrb[21].mxu0 }
 0x76a   :  { %v1173_v43 = vpop.f32.mrb[22].mxu0 }
 0x76b   :  { %1176 = vst [vmem:[%s2036_s22] sm:$0x3] %v1171_v15  ;;  %v1449_v18 = vpop.f32.mrb[23].mxu0 }

// kernel: custom-call.57
= control target key start
LH: loop header
LB: loop body
LE: loop exit
PB: predicated region body
PF: predicated region fallthrough
CT: control target
= control target key end

     0   :  { %s645_s9 = smov 0   ;;  %s647_s10 = smov 0   ;;  %s795_s0 = inlined_call_operand.vmem [shape: f32[2,6,3], index: 0, kind: input, shape index: {}]   ;;  %s796_s1 = inlined_call_operand.vmem [shape: f32[2,6,3], index: 1, kind: output, shape index: {0}]   ;;  %s797_s2 = inlined_call_operand.vmem [shape: f32[2,3], index: 2, kind: output, shape index: {1}]  }
   0x1   :  { %s649_s11 = smov 0   ;;  %s651_s12 = smov 0  }
   0x2   :  { %s653_s13 = smov 0  }
   0x3 LB: > { %s28_s14 = sadd.s32 1, %s618_s12  ;;  %s500_s15 = sadd.s32 4294967295, %s622_s13   ;;  %s622_s13 = sphi %s653_s13, %s9_s13   ;;  %s618_s12 = sphi %s651_s12, %s804_s12   ;;  %s614_s11 = sphi %s649_s11, %s803_s11   ;;  %s610_s10 = sphi %s647_s10, %s802_s10   ;;  %s606_s9 = sphi %s645_s9, %s801_s9  }
   0x4   : > { %p30_p0 = scmp.ge.s32.totalorder %s28_s14, 2  ;;  %s33_s16 = ssub.s32 0, %s618_s12 }
   0x5   : > { %s502_s17 = smin.u32 %s618_s12, %s33_s16  ;;  %p57_p1 = scmp.ne.s32.totalorder %s610_s10, %s606_s9 }
   0x6   : > { %s806_s14 = smov (%p30_p0, %s28_s14), 0  ;;  %s35_s18 = sshrl.u32 %s502_s17, 3 }
   0x7   : > { %s39_s19 = ssub.s32 0, %s806_s14  ;;  %p58_p2 = scmp.eq.s32.totalorder %s500_s15, 1 }
   0x8   : > { %s503_s20 = smin.u32 %s39_s19, %s806_s14  ;;  %s47_s24 = sadd.s32 1, %s610_s10 }
   0x9   : > { %s41_s21 = sshrl.u32 %s503_s20, 3  ;;  %p680_p3 = por %p58_p2, %p57_p1 }
   0xa   : > { %s44_s23 = ssub.s32 %s35_s18, %s41_s21  ;;  %p505_p5 = scmp.ge.s32.totalorder %s622_s13, 2 }
   0xb   : > { %p45_p4 = scmp.eq.s32.totalorder %s44_s23, 0  ;;  %s82_s26 = sand.u32 (!%p505_p5), 1, %s622_s13  }
   0xc   : > { %80 = sbr.rel (%p505_p5) target bundleno = 19 (0x13), region = 16  ;;  %s507_s27 = sshll.u32 (!%p505_p5), %s618_s12, 3 }
   0xd   : > { %s686_s25 = scalar_select %p45_p4, %s610_s10, %s47_s24  }
   0xe   : > { %s506_s28 = sshll.u32 (!%p505_p5), %s82_s26, 3  ;;  %s88_s3 = scalar_lea.vmem (!%p505_p5), %s795_s0, %s507_s27 }
   0xf   : > { %v116_v0 = vld [vmem:[%s88_s3] sm:$0xff] (!%p505_p5)  ;;  %s84_s4 = scalar_lea.vmem (!%p505_p5), [#allocation0], %s506_s28 }
  0x10   : > { %117 = vst [vmem:[%s84_s4] sm:$0xff] (!%p505_p5), %v116_v0 }
  0x13 PF: > { %p508_p6 = scmp.ge.s32.totalorder %s622_s13, 1  ;;  %p122_p7 = scmp.lt.s32.totalorder %s622_s13, 3 }
  0x15   : > { %p123_p8 = pnand %p508_p6, %p122_p7 }
  0x17   : > { %126 = sbr.rel (%p123_p8) target bundleno = 330 (0x14a), region = 54 }
  0x1e   : > { %s129_s5 = sand.u32 1, %s500_s15   ;;  %s143_s6 = sand.u32 1, %s606_s9   ;;  %v628_v2 = vmov 0.0  }
  0x1f   : > { %s509_s7 = sshll.u32 %s129_s5, 3  ;;  %s697_s8 = sshll.u32 %s143_s6, 1 }
  0x20   : > { %s152_s16 = sand.u32 7, %s614_s11   ;;  %s131_s17 = scalar_lea.vmem [#allocation0], %s509_s7 }
  0x21   : > { %v154_v1 = vld [vmem:[%s131_s17] sm:$0xff]  ;;  %s700_s18 = scalar_lea.vmem [#allocation1], %s509_s7  ;;  %s703_s19 = scalar_lea.vmem [#allocation2], %s152_s16 }
  0x22   : > { %155 = vst [vmem:[%s700_s18] sm:$0xff] %v154_v1  ;;  %156 = vst [vmem:[%s703_s19] sm:$0x1] %v628_v2  ;;  %s145_s15 = scalar_lea.vmem [#allocation3], %s697_s8  ;;  %s707_s20 = smov 0  }
  0x23 LB: >> { %v164_v3 = vlaneseq  ;;  %v716_v5 = vstv %s626_s20  ;;  %s191_s9 = scalar_lea.vmem %s700_s18, %s626_s20 [#allocation1]  ;;  %s249_s21 = scalar_lea.vmem [#allocation4], %s626_s20  ;;  %v629_v59 = vmov 1.0   ;;  %s626_s20 = sphi %s707_s20, %s162_s20  }
  0x24   : >> { %s266_s23 = smov [#allocation4] }
  0x25   : >> { %v713_v4 = vshrl.u32 %v164_v3, 7  ;;  %v243_v48 = vand.u32 127, %v164_v3 }
  0x27   : >> { %vm168_vm0 = vcmp.gt.s32.totalorder %v713_v4, %v716_v5  ;;  %vm169_vm1 = vcmp.lt.s32.totalorder %v713_v4, 6  ;;  %v230_v4 = vmov %v713_v4  ;;  %vm734_vm12 = vcmp.eq.s32.totalorder %v243_v48, %v716_v5 }
  0x28   : >> { %vm170_vm2 = vmand %vm168_vm0, %vm169_vm1  ;;  %vm234_vm9 = vcmp.gt.s32.totalorder %v230_v4, %v716_v5  ;;  %vm235_vm10 = vcmp.lt.s32.totalorder %v230_v4, 6  ;;  %v269_v4 = vmov %v713_v4  ;;  %vm295_vm15 = vcmp.gt.s32.totalorder %v243_v48, %v716_v5 }
  0x29   : >> { %v163_v6 = vld [vmem:[%s700_s18] sm:$0xff]  ;;  %v192_v15 = vld [vmem:[%s191_s9] ss:$0 sm:$0xff]  ;;  %s227_s18 = smov %s700_s18  ;;  %vm236_vm11 = vmand %vm234_vm9, %vm235_vm10  ;;  %vm274_vm13 = vcmp.lt.s32.totalorder %v269_v4, 6  ;;  %v286_v4 = vmov %v713_v4 }
  0x2a   : >> { %v171_v7 = vsel %vm170_vm2, %v163_v6, 0.0  ;;  %v193_v16 = vand.u32 2147483647, %v192_v15  ;;  %vm218_vm8 = vcmp.lt.f32.partialorder %v192_v15, 0.0  ;;  %v231_v45 = vld [vmem:[%s227_s18] sm:$0xff]  ;;  %s265_s18 = smov %s700_s18  ;;  %vm303_vm14 = vcmp.ge.s32.totalorder %v286_v4, %v716_v5 }
  0x2b   : >> { %v172_v8 = vmul.f32 %v171_v7, %v171_v7  ;;  %v237_v49 = vsel %vm236_vm11, %v231_v45, 0.0  ;;  %v262_v60 = vld [vmem:[%s703_s19] ss:$0 sm:$0xff]  ;;  %vm304_vm0 = vmand %vm734_vm12, %vm303_vm14 }
  0x2c   : >> { %v194_v21 = vmax.f32 %v193_v16, 0.0  ;;  %v272_v63 = vld [vmem:[%s265_s18] sm:$0xff]  ;;  %s282_s18 = smov %s265_s18 }
  0x2d   : >> { %v173_v9 = vrot.slane %v172_v8, 4  ;;  %s307_s24 = scalar_lea.vmem %s282_s18, %s626_s20  ;;  %s162_s20 = sadd.s32 1, %s626_s20  }
  0x2e   : >> { %p159_p9 = scmp.ge.s32.totalorder %s162_s20, 3  }
  0x2f   : >> { %v174_v10 = vadd.f32 %v173_v9, %v172_v8  ;;  %s515_s26 = sshll.u32 (%p159_p9), %s614_s11, 3 }
  0x30   : > { %s332_s29 = scalar_lea.vmem (%p159_p9), %s796_s1, %s515_s26 }
  0x31   : >> { %v175_v11 = vrot.slane %v174_v10, 2 }
  0x33   : >> { %v176_v12 = vadd.f32 %v175_v11, %v174_v10 }
  0x35   : >> { %v177_v13 = vrot.slane %v176_v12, 1 }
  0x37   : >> { %v178_v14 = vadd.f32 %v177_v13, %v176_v12  ;;  %v293_v13 = vld [vmem:[%s282_s18] sm:$0xff] }
  0x39   : >> { %570 = vrsqrt.f32 %v178_v14  ;;  %vm181_vm3 = vcmp.eq.f32.partialorder %v178_v14, inf  ;;  %v184_v18 = vand.u32 2147483648, %v178_v14  ;;  %vm183_vm4 = vcmp.eq.f32.partialorder %v178_v14, 0.0 }
  0x43   : >> { %v571_v17 = vpop.eup %570 }
  0x44   : >> { %v180_v19 = vmul.f32 %v571_v17, %v178_v14 }
  0x46   : >> { %v182_v20 = vsel %vm181_vm3, %v178_v14, %v180_v19 }
  0x47   : >> { %v185_v22 = vsel %vm183_vm4, %v184_v18, %v182_v20 }
  0x48   : >> { %v195_v23 = vand.u32 2147483647, %v185_v22 }
  0x4a   : >> { %v196_v24 = vmax.f32 %v194_v21, %v195_v23 }
  0x4c   : >> { %572 = vrcp.f32 %v196_v24  ;;  %vm208_vm7 = vcmp.eq.f32.partialorder %v196_v24, 0.0 }
  0x56   : >> { %v573_v25 = vpop.eup %572 }
  0x57   : >> { %v198_v26 = vmul.f32 %v573_v25, %v193_v16  ;;  %v201_v27 = vmul.f32 0.0, %v573_v25  ;;  %v205_v28 = vmul.f32 %v573_v25, %v195_v23 }
  0x59   : >> { %v199_v29 = vmul.f32 %v198_v26, %v198_v26  ;;  %v202_v30 = vmul.f32 %v201_v27, %v201_v27  ;;  %v206_v31 = vmul.f32 %v205_v28, %v205_v28 }
  0x5b   : >> { %v203_v32 = vadd.f32 %v202_v30, %v199_v29 }
  0x5d   : >> { %v207_v33 = vadd.f32 %v206_v31, %v203_v32 }
  0x5f   : >> { %574 = vrsqrt.f32 %v207_v33  ;;  %vm211_vm5 = vcmp.eq.f32.partialorder %v207_v33, inf  ;;  %v214_v35 = vand.u32 2147483648, %v207_v33  ;;  %vm213_vm6 = vcmp.eq.f32.partialorder %v207_v33, 0.0 }
  0x69   : >> { %v575_v34 = vpop.eup %574 }
  0x6a   : >> { %v210_v36 = vmul.f32 %v575_v34, %v207_v33 }
  0x6c   : >> { %v212_v37 = vsel %vm211_vm5, %v207_v33, %v210_v36 }
  0x6d   : >> { %v215_v38 = vsel %vm213_vm6, %v214_v35, %v212_v37 }
  0x6e   : >> { %v216_v39 = vmul.f32 %v215_v38, %v196_v24 }
  0x70   : >> { %v217_v40 = vsel %vm208_vm7, 0.0, %v216_v39 }
  0x71   : >> { %v219_v41 = vxor.u32 2147483648, %v217_v40 }
  0x73   : >> { %v220_v42 = vsel %vm218_vm8, %v217_v40, %v219_v41 }
  0x74   : >> { %v726_v43 = vsel %vm183_vm4, %v192_v15, %v220_v42  ;;  %576 = vrcp.f32 %v220_v42  ;;  %v221_v46 = vsub.f32 %v220_v42, %v192_v15 }
  0x75   : >> { %v226_v44 = vsub.f32 %v192_v15, %v726_v43 }
  0x77   : >> { %578 = vrcp.f32 %v226_v44 }
  0x7e   : >> { %v577_v47 = vpop.eup %576 }
  0x7f   : >> { %v223_v50 = vmul.f32 %v577_v47, %v221_v46 }
  0x81   : >> { %v579_v51 = vpop.eup %578  ;;  %v225_v55 = vsel %vm183_vm4, 0.0, %v223_v50 }
  0x82   : >> { %v239_v52 = vmul.f32 %v579_v51, %v237_v49  ;;  %v255_v57 = vsel %vm734_vm12, %v225_v55, 0.0 }
  0x84   : >> { %v240_v54 = vsel %vm183_vm4, 0.0, %v239_v52 }
  0x85   : >> { %v245_v56 = vsel %vm734_vm12, %v240_v54, 0.0 }
  0x86   : >> { %246 = vadd.xlane.f32.xlu0 %v245_v56 }
  0x8a   : >> { %256 = vadd.xlane.f32.xlu0 %v255_v57 }
 0x113   : >> { %v247_v58 = vpop.xlane.xlu0 %246 }
 0x114   : >> { %248 = vst [vmem:[#allocation4] sm:$0xff] %v247_v58 }
 0x115   : >> { %250 = vst [vmem:[%s249_s21] sm:$0x1] %v629_v59 }
 0x117   : >> { %v257_v61 = vpop.xlane.xlu0 %256 }
 0x118   : >> { %v263_v62 = vsel %vm734_vm12, %v257_v61, %v262_v60 }
 0x119   : >> { %264 = vst [vmem:[%s703_s19] sm:$0x1] %v263_v62 }
 0x11c   : >> { %v271_v0 = vld [vmem:[%s266_s23] sm:$0xff]  ;;  %s283_s23 = smov %s266_s23 }
 0x11d   : >> { %v273_v1 = vmul.f32 %v272_v63, %v271_v0  ;;  %v291_v12 = vld [vmem:[%s283_s23] sm:$0xff] }
 0x11f   : >> { %v275_v2 = vsel %vm274_vm13, %v273_v1, 0.0 }
 0x120   : >> { %v276_v3 = vrot.slane %v275_v2, 4  ;;  %v318_v4 = vld [vmem:[#allocation2] sm:$0x3] (%p159_p9) }
 0x121   : > { %320 = vst [vmem:[%s145_s15] sm:$0x3] (%p159_p9), %v318_v4 }
 0x122   : >> { %v277_v6 = vadd.f32 %v276_v3, %v275_v2 }
 0x124   : >> { %v278_v7 = vrot.slane %v277_v6, 2 }
 0x126   : >> { %v279_v8 = vadd.f32 %v278_v7, %v277_v6 }
 0x128   : >> { %v280_v9 = vrot.slane %v279_v8, 1 }
 0x12a   : >> { %v281_v10 = vadd.f32 %v280_v9, %v279_v8 }
 0x12c   : >> { %v287_v11 = vmul.f32 %v281_v10, %v257_v61 }
 0x12e   : >> { %v292_v14 = vmul.f32 %v291_v12, %v287_v11 }
 0x130   : >> { %v296_v15 = vsub.f32 %v293_v13, %v292_v14 }
 0x132   : >> { %v297_v16 = vsel %vm295_vm15, %v296_v15, %v293_v13 }
 0x133   : >> { %v305_v17 = vsel %vm304_vm0, %v291_v12, %v297_v16 }
 0x134   : >> { %306 = vst [vmem:[%s282_s18] sm:$0xff] %v305_v17 }
 0x137   : > { %161 = sbr.rel (!%p159_p9) target bundleno = 35 (0x23), region = 175 }
 0x13b   : >> { %v308_v18 = vld [vmem:[%s307_s24] ss:$0 sm:$0xff] }
 0x13c   : >> { %v313_v19 = vsel %vm734_vm12, %v726_v43, %v308_v18 }
 0x13d   : >> { %314 = vst [vmem:[%s307_s24] sm:$0x1] %v313_v19 }
 0x13e   : > { %p368_p10 = scmp.lt.s32.totalorder (%p680_p3), %s614_s11, 0  ;;  %s369_s30 = ssub.s32 (%p680_p3), 0, %s614_s11  ;;  %v391_v20 = vld [vmem:[%s145_s15] sm:$0x3] (%p680_p3) }
 0x13f   : > { %367 = sbr.rel (!%p680_p3) target bundleno = 330 (0x14a), region = 99  ;;  %s516_s3 = smin.u32 (%p680_p3), %s614_s11, %s369_s30 }
 0x140   : > { %s371_s4 = sshrl.u32 (%p680_p3), %s516_s3, 3 }
 0x141   : > { %s372_s5 = ssub.s32 (%p680_p3), 0, %s371_s4 }
 0x144   : > { %v360_v5 = vld [vmem:[%s700_s18] sm:$0xff] }
 0x145   : > { %361 = vst [vmem:[%s332_s29] sm:$0xff] %v360_v5 }
 0x146   : > { %s808_s5 = smov (!%p368_p10, %s372_s5), %s371_s4 }
 0x147   : > { %s517_s6 = sshll.u32 %s808_s5, 1 }
 0x148   : > { %s375_s17 = scalar_lea.vmem %s797_s2, %s517_s6 }
 0x149   : > { %392 = vst [vmem:[%s375_s17] sm:$0x3] %v391_v20 }
 0x14a PF: > { %s9_s13 = sadd.s32 1, %s622_s13   ;;  %s801_s9 = smov %s610_s10 }
 0x14b   : > { %p6_p11 = scmp.ge.s32.totalorder %s9_s13, 4   ;;  %s802_s10 = smov %s686_s25 }
 0x14c   : > { %s803_s11 = smov %s618_s12  ;;  %s804_s12 = smov %s806_s14 }
 0x14d   :  { %8 = sbr.rel (!%p6_p11) target bundleno = 3 (0x3), region = 186 }

// kernel: custom-call.58
= control target key start
LH: loop header
LB: loop body
LE: loop exit
PB: predicated region body
PF: predicated region fallthrough
CT: control target
= control target key end

     0   :  { %s236_s6 = smov 0   ;;  %s263_s0 = inlined_call_operand.vmem [shape: f32[2,3,3], index: 0, kind: input, shape index: {}]   ;;  %s264_s1 = inlined_call_operand.vmem [shape: f32[2,3,3], index: 1, kind: output, shape index: {}]  }
   0x1 LB: > { %s198_s7 = sadd.s32 4294967295, %s224_s6   ;;  %p200_p0 = scmp.ge.s32.totalorder %s224_s6, 2  ;;  %s224_s6 = sphi %s236_s6, %s7_s6  }
   0x2   : > { %s23_s8 = sand.u32 (!%p200_p0), 1, %s224_s6   ;;  %s202_s9 = sshll.u32 (!%p200_p0), %s224_s6, 2 }
   0x3   : > { %21 = sbr.rel (%p200_p0) target bundleno = 10 (0xa), region = 16  ;;  %s201_s10 = sshll.u32 (!%p200_p0), %s23_s8, 2 }
   0x4   : > { %s27_s13 = scalar_lea.vmem (!%p200_p0), %s263_s0, %s202_s9  ;;  %s25_s14 = scalar_lea.vmem (!%p200_p0), [#allocation1], %s201_s10 }
   0x5   : > { %v43_v0 = vld [vmem:[%s27_s13] sm:$0xf] (!%p200_p0) }
   0x6   : > { %44 = vst [vmem:[%s25_s14] sm:$0xf] (!%p200_p0), %v43_v0 }
   0xa PF: > { %p203_p1 = scmp.ge.s32.totalorder %s224_s6, 1  ;;  %p60_p2 = scmp.lt.s32.totalorder %s224_s6, 3 }
   0xc   : > { %p61_p3 = pnand %p203_p1, %p60_p2 }
   0xd   : > { %s252_s15 = sand.u32 (!%p61_p3), 1, %s198_s7   ;;  %v82_v1 = vlaneseq (!%p61_p3)  ;;  %vm96_vm1 = vcmask (!%p61_p3), 23552   ;;  %s207_s19 = sshll.u32 (!%p61_p3), %s198_s7, 2 }
   0xe   : > { %64 = sbr.rel (%p61_p3) target bundleno = 334 (0x14e), region = 50  ;;  %s204_s16 = sshll.u32 (!%p61_p3), %s252_s15, 2 }
   0xf   : > { %s73_s17 = scalar_lea.vmem (!%p61_p3), [#allocation1], %s204_s16  ;;  %v83_v3 = vand.u32 (!%p61_p3), 127, %v82_v1  ;;  %v85_v4 = vshrl.u32 (!%p61_p3), %v82_v1, 7  ;;  %s77_s18 = scalar_lea.vmem (!%p61_p3), [#allocation3], %s204_s16 }
  0x10   : > { %v80_v2 = vld [vmem:[%s73_s17] sm:$0xf] (!%p61_p3)  ;;  %s128_s22 = scalar_lea.vmem (!%p61_p3), %s264_s1, %s207_s19 }
  0x11   : > { %81 = vst [vmem:[#allocation0] sm:$0xf] (!%p61_p3), %v80_v2  ;;  %vm91_vm0 = vcmp.eq.s32.totalorder (!%p61_p3), %v83_v3, 0  ;;  %vm87_vm2 = vcmp.eq.s32.totalorder (!%p61_p3), %v83_v3, %v85_v4  ;;  %vm100_vm3 = vcmp.eq.s32.totalorder (!%p61_p3), %v83_v3, 1  ;;  %vm111_vm4 = vcmp.eq.s32.totalorder (!%p61_p3), %v83_v3, 2 }
  0x18   : > { %v88_v5 = vld [vmem:[#allocation0] sm:$0xff] }
  0x19   : > { %v95_v6 = vld [vmem:[#allocation0 + $0x1] ss:$0 sm:$0xff]  ;;  %v92_v7 = vsel %vm91_vm0, %v88_v5, 1.0  ;;  %v106_v11 = vld [vmem:[#allocation0 + $0x2] ss:$0 sm:$0xff] }
  0x1a   : > { %v97_v8 = vsel %vm96_vm1, %v95_v6, 0.0  ;;  %v93_v9 = vsel %vm87_vm2, %v92_v7, 0.0  ;;  %v108_v12 = vsel %vm96_vm1, %v106_v11, 0.0 }
  0x1b   : > { %v101_v10 = vmul.f32 %v97_v8, %v93_v9 }
  0x1d   : > { %102 = vadd.xlane.f32.xlu0 %v101_v10 }
  0xaa   : > { %v103_v13 = vpop.xlane.xlu0 %102 }
  0xab   : > { %v104_v14 = vsel %vm100_vm3, %v103_v13, %v93_v9 }
  0xac   : > { %v112_v15 = vmul.f32 %v108_v12, %v104_v14 }
  0xae   : > { %113 = vadd.xlane.f32.xlu0 %v112_v15 }
 0x13b   : > { %v114_v16 = vpop.xlane.xlu0 %113 }
 0x13c   : > { %v115_v17 = vsel %vm111_vm4, %v114_v16, %v104_v14 }
 0x13d   : > { %116 = vst [vmem:[#allocation2] sm:$0xff] %v115_v17 }
 0x144   : > { %v120_v18 = vld [vmem:[#allocation2] sm:$0xf] }
 0x145   : > { %122 = vst [vmem:[%s77_s18] sm:$0xf] %v120_v18 }
 0x14c   : > { %v144_v19 = vld [vmem:[%s77_s18] sm:$0xf] }
 0x14d   : > { %145 = vst [vmem:[%s128_s22] sm:$0xf] %v144_v19 }
 0x14e PF: > { %s7_s6 = sadd.s32 1, %s224_s6  }
 0x14f   : > { %p4_p4 = scmp.ge.s32.totalorder %s7_s6, 4  }
 0x151   :  { %6 = sbr.rel (!%p4_p4) target bundleno = 1 (0x1), region = 112 }

// kernel: custom-call.50
= control target key start
LH: loop header
LB: loop body
LE: loop exit
PB: predicated region body
PF: predicated region fallthrough
CT: control target
= control target key end

     0   :  { %s6_s0 = inlined_call_operand.hbm [shape: pred[2], index: 0, kind: output, shape index: {}]  }

// kernel: custom-call.55
= control target key start
LH: loop header
LB: loop body
LE: loop exit
PB: predicated region body
PF: predicated region fallthrough
CT: control target
= control target key end

     0   :  { %s343_s6 = smov 0   ;;  %s345_s7 = smov 0   ;;  %s390_s0 = inlined_call_operand.vmem [shape: f32[2,3,3], index: 0, kind: input, shape index: {}]   ;;  %s391_s1 = inlined_call_operand.vmem [shape: f32[2,3,3], index: 1, kind: output, shape index: {}]  }
   0x1   :  { %s347_s8 = smov 0  }
   0x2 LB: > { %s265_s9 = sadd.s32 4294967295, %s330_s8   ;;  %s26_s10 = sadd.s32 1, %s326_s7  ;;  %s330_s8 = sphi %s347_s8, %s7_s8   ;;  %s326_s7 = sphi %s345_s7, %s393_s7   ;;  %s322_s6 = sphi %s343_s6, %s392_s6  }
   0x3   : > { %p28_p0 = scmp.ge.s32.totalorder %s26_s10, 2  ;;  %p267_p1 = scmp.ge.s32.totalorder %s330_s8, 2 }
   0x4   : > { %s42_s11 = sand.u32 (!%p267_p1), 1, %s330_s8   ;;  %s269_s12 = sshll.u32 (!%p267_p1), %s326_s7, 2 }
   0x5   : > { %s395_s10 = smov (%p28_p0, %s26_s10), 0  ;;  %40 = sbr.rel (%p267_p1) target bundleno = 12 (0xc), region = 16 }
   0x6   : > { %s268_s13 = sshll.u32 (!%p267_p1), %s42_s11, 2  ;;  %s48_s16 = scalar_lea.vmem (!%p267_p1), %s390_s0, %s269_s12 }
   0x7   : > { %v64_v0 = vld [vmem:[%s48_s16] sm:$0xf] (!%p267_p1)  ;;  %s44_s17 = scalar_lea.vmem (!%p267_p1), [#allocation1], %s268_s13 }
   0x8   : > { %65 = vst [vmem:[%s44_s17] sm:$0xf] (!%p267_p1), %v64_v0 }
   0xc PF: > { %p270_p2 = scmp.ge.s32.totalorder %s330_s8, 1  ;;  %p81_p3 = scmp.lt.s32.totalorder %s330_s8, 3 }
   0xe   : > { %p82_p4 = pnand %p270_p2, %p81_p3 }
   0xf   : > { %v332_v1 = vmov (!%p82_p4), 0.0   ;;  %s370_s18 = sand.u32 (!%p82_p4), 1, %s265_s9   ;;  %vm104_vm0 = vcmask (!%p82_p4), 7168   ;;  %vm122_vm1 = vcmask (!%p82_p4), 15368   ;;  %vm139_vm2 = vcmask (!%p82_p4), 1047553   ;;  %s274_s22 = sshll.u32 (!%p82_p4), %s322_s6, 2 }
  0x10   : > { %85 = sbr.rel (%p82_p4) target bundleno = 541 (0x21d), region = 50  ;;  %103 = vst [vmem:[#allocation2] sm:$0xff] (!%p82_p4), %v332_v1  ;;  %s271_s19 = sshll.u32 (!%p82_p4), %s370_s18, 2  ;;  %vm140_vm3 = vmand (!%p82_p4), %vm122_vm1, %vm139_vm2  ;;  %vm144_vm4 = vcmask (!%p82_p4), 23568   ;;  %vm161_vm5 = vcmask (!%p82_p4), 1047554  }
  0x11   : > { %s94_s20 = scalar_lea.vmem (!%p82_p4), [#allocation1], %s271_s19  ;;  %vm162_vm6 = vmand (!%p82_p4), %vm144_vm4, %vm161_vm5  ;;  %s98_s21 = scalar_lea.vmem (!%p82_p4), [#allocation3], %s271_s19 }
  0x12   : > { %v101_v5 = vld [vmem:[%s94_s20] sm:$0xf] (!%p82_p4)  ;;  %s179_s25 = scalar_lea.vmem (!%p82_p4), %s391_s1, %s274_s22 }
  0x13   : > { %102 = vst [vmem:[#allocation0] sm:$0xf] (!%p82_p4), %v101_v5 }
  0x17   : > { %v105_v2 = vld [vmem:[#allocation2] ss:$0 sm:$0xff] }
  0x18   : > { %v107_v3 = vmul.f32 %v105_v2, %v105_v2  ;;  %v114_v4 = vmul.f32 0.0, %v105_v2 }
  0x1a   : > { %108 = vadd.xlane.f32.xlu0 %v107_v3  ;;  %v106_v6 = vld [vmem:[#allocation0] ss:$0 sm:$0xff]  ;;  %v126_v18 = vld [vmem:[#allocation0 + $0x1] ss:$0 sm:$0xff]  ;;  %v148_v30 = vld [vmem:[#allocation0 + $0x2] ss:$0 sm:$0xff] }
  0x1b   : > { %v112_v10 = vld [vmem:[#allocation0] sm:$0xff] }
  0x1e   : > { %115 = vadd.xlane.f32.xlu0 %v114_v4 }
  0xa7   : > { %v109_v7 = vpop.xlane.xlu0 %108 }
  0xa8   : > { %v110_v8 = vsub.f32 %v106_v6, %v109_v7 }
  0xaa   : > { %302 = vrsqrt.f32 %v110_v8 }
  0xab   : > { %v116_v9 = vpop.xlane.xlu0 %115 }
  0xac   : > { %v117_v11 = vsub.f32 %v112_v10, %v116_v9 }
  0xb4   : > { %v303_v12 = vpop.eup %302 }
  0xb5   : > { %v118_v13 = vmul.f32 %v303_v12, %v117_v11 }
  0xb7   : > { %v119_v14 = vsel %vm104_vm0, %v118_v13, 0.0 }
  0xb8   : > { %121 = vst [vmem:[#allocation2] sm:$0xff] %v119_v14 }
  0xbf   : > { %v124_v15 = vld [vmem:[#allocation2 + $0x1] ss:$0 sm:$0xff] }
  0xc0   : > { %v127_v16 = vmul.f32 %v124_v15, %v124_v15  ;;  %v134_v17 = vmul.f32 %v124_v15, %v119_v14 }
  0xc2   : > { %128 = vadd.xlane.f32.xlu1 %v127_v16 }
  0xc6   : > { %135 = vadd.xlane.f32.xlu1 %v134_v17 }
 0x14f   : > { %v129_v19 = vpop.xlane.xlu1 %128 }
 0x150   : > { %v130_v20 = vsub.f32 %v126_v18, %v129_v19 }
 0x152   : > { %304 = vrsqrt.f32 %v130_v20 }
 0x153   : > { %v136_v21 = vpop.xlane.xlu1 %135 }
 0x154   : > { %v137_v22 = vsub.f32 %v112_v10, %v136_v21 }
 0x15c   : > { %v305_v23 = vpop.eup %304 }
 0x15d   : > { %v138_v24 = vmul.f32 %v305_v23, %v137_v22 }
 0x15f   : > { %v141_v25 = vsel %vm140_vm3, %v138_v24, 0.0 }
 0x160   : > { %v142_v26 = vadd.f32 %v141_v25, %v119_v14 }
 0x162   : > { %143 = vst [vmem:[#allocation2] sm:$0xff] %v142_v26 }
 0x169   : > { %v146_v27 = vld [vmem:[#allocation2 + $0x2] ss:$0 sm:$0xff] }
 0x16a   : > { %v156_v28 = vmul.f32 %v146_v27, %v142_v26  ;;  %v149_v29 = vmul.f32 %v146_v27, %v146_v27 }
 0x16c   : > { %157 = vadd.xlane.f32.xlu1 %v156_v28  ;;  %150 = vadd.xlane.f32.xlu0 %v149_v29 }
 0x1f9   : > { %v151_v31 = vpop.xlane.xlu0 %150  ;;  %v158_v33 = vpop.xlane.xlu1 %157 }
 0x1fa   : > { %v152_v32 = vsub.f32 %v148_v30, %v151_v31  ;;  %v159_v34 = vsub.f32 %v112_v10, %v158_v33 }
 0x1fc   : > { %306 = vrsqrt.f32 %v152_v32 }
 0x206   : > { %v307_v35 = vpop.eup %306 }
 0x207   : > { %v160_v36 = vmul.f32 %v307_v35, %v159_v34 }
 0x209   : > { %v163_v37 = vsel %vm162_vm6, %v160_v36, 0.0 }
 0x20a   : > { %v164_v38 = vadd.f32 %v163_v37, %v142_v26 }
 0x20c   : > { %165 = vst [vmem:[#allocation2] sm:$0xff] %v164_v38 }
 0x213   : > { %v169_v39 = vld [vmem:[#allocation2] sm:$0xf] }
 0x214   : > { %171 = vst [vmem:[%s98_s21] sm:$0xf] %v169_v39 }
 0x21b   : > { %v195_v40 = vld [vmem:[%s98_s21] sm:$0xf] }
 0x21c   : > { %196 = vst [vmem:[%s179_s25] sm:$0xf] %v195_v40 }
 0x21d PF: > { %s7_s8 = sadd.s32 1, %s330_s8   ;;  %s392_s6 = smov %s326_s7 }
 0x21e   : > { %p4_p5 = scmp.ge.s32.totalorder %s7_s8, 4   ;;  %s393_s7 = smov %s395_s10 }
 0x220   :  { %6 = sbr.rel (!%p4_p5) target bundleno = 2 (0x2), region = 114 }

// kernel: custom-call.56
= control target key start
LH: loop header
LB: loop body
LE: loop exit
PB: predicated region body
PF: predicated region fallthrough
CT: control target
= control target key end

     0   :  { %s343_s6 = smov 0   ;;  %s345_s7 = smov 0   ;;  %s390_s0 = inlined_call_operand.vmem [shape: f32[2,1,3,3], index: 0, kind: input, shape index: {}]   ;;  %s391_s1 = inlined_call_operand.vmem [shape: f32[2,1,3,3], index: 1, kind: output, shape index: {}]  }
   0x1   :  { %s347_s8 = smov 0  }
   0x2 LB: > { %s269_s9 = sadd.s32 4294967295, %s330_s8   ;;  %s33_s10 = sadd.s32 1, %s326_s7  ;;  %s330_s8 = sphi %s347_s8, %s7_s8   ;;  %s326_s7 = sphi %s345_s7, %s393_s7   ;;  %s322_s6 = sphi %s343_s6, %s392_s6  }
   0x3   : > { %p35_p0 = scmp.ge.s32.totalorder %s33_s10, 2  ;;  %p271_p1 = scmp.ge.s32.totalorder %s330_s8, 2 }
   0x4   : > { %s49_s11 = sand.u32 (!%p271_p1), 1, %s330_s8   ;;  %s273_s12 = sshll.u32 (!%p271_p1), %s326_s7, 2 }
   0x5   : > { %s395_s10 = smov (%p35_p0, %s33_s10), 0  ;;  %47 = sbr.rel (%p271_p1) target bundleno = 12 (0xc), region = 16 }
   0x6   : > { %s272_s13 = sshll.u32 (!%p271_p1), %s49_s11, 2  ;;  %s56_s16 = scalar_lea.vmem (!%p271_p1), %s390_s0, %s273_s12 }
   0x7   : > { %v72_v0 = vld [vmem:[%s56_s16] sm:$0xf] (!%p271_p1)  ;;  %s51_s17 = scalar_lea.vmem (!%p271_p1), [#allocation1], %s272_s13 }
   0x8   : > { %73 = vst [vmem:[%s51_s17] sm:$0xf] (!%p271_p1), %v72_v0 }
   0xc PF: > { %p274_p2 = scmp.ge.s32.totalorder %s330_s8, 1  ;;  %p89_p3 = scmp.lt.s32.totalorder %s330_s8, 3 }
   0xe   : > { %p90_p4 = pnand %p274_p2, %p89_p3 }
  0x10   : > { %93 = sbr.rel (%p90_p4) target bundleno = 511 (0x1ff), region = 50 }
  0x17   : > { %s370_s18 = sand.u32 1, %s269_s9   ;;  %v111_v1 = vlaneseq  ;;  %v332_v11 = vmov -1.0   ;;  %s278_s22 = sshll.u32 %s322_s6, 2 }
  0x18   : > { %s275_s19 = sshll.u32 %s370_s18, 2  ;;  %s178_s25 = scalar_lea.vmem %s391_s1, %s278_s22 }
  0x19   : > { %s102_s20 = scalar_lea.vmem [#allocation1], %s275_s19  ;;  %v112_v3 = vand.u32 127, %v111_v1  ;;  %v115_v4 = vshrl.u32 %v111_v1, 7  ;;  %s106_s21 = scalar_lea.vmem [#allocation3], %s275_s19 }
  0x1a   : > { %v109_v2 = vld [vmem:[%s102_s20] sm:$0xf] }
  0x1b   : > { %110 = vst [vmem:[#allocation0] sm:$0xf] %v109_v2  ;;  %vm113_vm0 = vcmp.lt.s32.totalorder %v112_v3, 3  ;;  %vm122_vm1 = vcmp.ge.s32.totalorder %v115_v4, %v112_v3  ;;  %vm117_vm2 = vcmp.eq.s32.totalorder %v115_v4, %v112_v3  ;;  %vm136_vm4 = vcmp.eq.s32.totalorder %v112_v3, 0 }
  0x1c   : > { %vm123_vm3 = vmand %vm122_vm1, %vm113_vm0  ;;  %vm133_vm5 = vcmp.eq.s32.totalorder %v112_v3, %v115_v4  ;;  %v137_v12 = vsel %vm136_vm4, 1.0, %v332_v11  ;;  %vm144_vm6 = vcmp.eq.s32.totalorder %v112_v3, 1  ;;  %vm154_vm7 = vcmp.eq.s32.totalorder %v112_v3, 2 }
  0x1d   : > { %v138_v13 = vsel %vm133_vm5, %v137_v12, 0.0 }
  0x22   : > { %v118_v5 = vld [vmem:[#allocation0] sm:$0xff] }
  0x23   : > { %v119_v6 = vsel %vm117_vm2, %v118_v5, 0.0  ;;  %v124_v7 = vsel %vm123_vm3, %v118_v5, 0.0 }
  0x24   : > { %120 = vadd.xlane.f32.xlu0 %v119_v6 }
  0xb1   : > { %v121_v8 = vpop.xlane.xlu0 %120 }
  0xb2   : > { %306 = vrcp.f32 %v121_v8  ;;  %vm161_vm8 = vweird.f32 %v121_v8 }
  0xbc   : > { %v307_v9 = vpop.eup %306 }
  0xbd   : > { %v126_v10 = vmul.f32 %v307_v9, %v124_v7 }
  0xbf   : > { %127 = vst [vmem:[#allocation4] sm:$0xff] %v126_v10 }
  0xc6   : > { %v140_v14 = vld [vmem:[#allocation4 + $0x1] ss:$0 sm:$0xff]  ;;  %v150_v17 = vld [vmem:[#allocation4 + $0x2] ss:$0 sm:$0xff] }
  0xc7   : > { %v141_v15 = vxor.u32 2147483648, %v140_v14  ;;  %v151_v19 = vxor.u32 2147483648, %v150_v17 }
  0xc9   : > { %v145_v16 = vmul.f32 %v141_v15, %v138_v13 }
  0xcb   : > { %146 = vadd.xlane.f32.xlu0 %v145_v16 }
 0x158   : > { %v147_v18 = vpop.xlane.xlu0 %146 }
 0x159   : > { %v148_v20 = vsel %vm144_vm6, %v147_v18, %v138_v13 }
 0x15a   : > { %v155_v21 = vmul.f32 %v151_v19, %v148_v20 }
 0x15c   : > { %156 = vadd.xlane.f32.xlu1 %v155_v21 }
 0x1e9   : > { %v157_v22 = vpop.xlane.xlu1 %156 }
 0x1ea   : > { %v158_v23 = vsel %vm154_vm7, %v157_v22, %v148_v20 }
 0x1eb   : > { %v160_v24 = vmul.f32 %v307_v9, %v158_v23 }
 0x1ed   : > { %v162_v25 = vsel %vm161_vm8, %v158_v23, %v160_v24 }
 0x1ee   : > { %163 = vst [vmem:[#allocation2] sm:$0xff] %v162_v25 }
 0x1f5   : > { %v167_v26 = vld [vmem:[#allocation2] sm:$0xf] }
 0x1f6   : > { %169 = vst [vmem:[%s106_s21] sm:$0xf] %v167_v26 }
 0x1fd   : > { %v194_v27 = vld [vmem:[%s106_s21] sm:$0xf] }
 0x1fe   : > { %195 = vst [vmem:[%s178_s25] sm:$0xf] %v194_v27 }
 0x1ff PF: > { %s7_s8 = sadd.s32 1, %s330_s8   ;;  %s392_s6 = smov %s326_s7 }
 0x200   : > { %p4_p5 = scmp.ge.s32.totalorder %s7_s8, 4   ;;  %s393_s7 = smov %s395_s10 }
 0x202   :  { %6 = sbr.rel (!%p4_p5) target bundleno = 2 (0x2), region = 112 }

// kernel: dvmnet_forward.3
= control target key start
LH: loop header
LB: loop body
LE: loop exit
PB: predicated region body
PF: predicated region fallthrough
CT: control target
= control target key end

     0   :  { %vm37_vm0 = vcmask 64512   ;;  %vm175_vm1 = vcmask 523264   ;;  %s1937_s27 = smov 125   ;;  %s1938_s19 = smov 127   ;;  %vm545_vm2 = vcmask 7168   ;;  %vm21_vm3 = vcmask 518144   ;;  %s2487_s2 = inlined_call_operand.vmem [shape: f32[2,8,64], index: 2, kind: input, shape index: {}]   ;;  %s2488_s1 = inlined_call_operand.vmem [shape: f32[2,64,8], index: 1, kind: input, shape index: {}]   ;;  %s2489_s4 = inlined_call_operand.vmem [shape: f32[2,64,128], index: 4, kind: input, shape index: {}]   ;;  %s2490_s3 = inlined_call_operand.vmem [shape: f32[2,64,2], index: 3, kind: input, shape index: {}]   ;;  %s2491_s0 = inlined_call_operand.vmem [shape: f32[3,64], index: 0, kind: input, shape index: {}]   ;;  %s2492_s5 = inlined_call_operand.vmem [shape: f32[2,3,128], index: 5, kind: output, shape index: {}]  }
   0x1   :  { %v36_v0 = vld [vmem:[%s2487_s2] sm:$0xff]  ;;  %v29_v2 = vld [vmem:[%s2488_s1 + $0x8] sm:$0xff]  ;;  %v30_v3 = vld [vmem:[%s2488_s1 + $0x10] sm:$0xff]  ;;  %vm1941_vm4 = vmmov 0  }
   0x2   :  { %v28_v1 = vld [vmem:[%s2488_s1] sm:$0xff]  ;;  %1619 = vmatprep.subr.mxu0 %v36_v0  ;;  %v31_v4 = vld [vmem:[%s2488_s1 + $0x18] sm:$0xff]  ;;  %v33_v6 = vld [vmem:[%s2488_s1 + $0x28] sm:$0xff] }
   0x3   :  { %1621 = vmatprep.mubr.msk.f32.mxu0 %vm37_vm0, %v28_v1  ;;  %1620 = vmatpush3.msra.mxu0 %v36_v0  ;;  %v32_v5 = vld [vmem:[%s2488_s1 + $0x20] sm:$0xff]  ;;  %v34_v7 = vld [vmem:[%s2488_s1 + $0x30] sm:$0xff]  ;;  %v35_v8 = vld [vmem:[%s2488_s1 + $0x38] sm:$0xff] }
   0x4   :  { %1622 = vmatmul.mubr.msk.f32.vlgmr.msra.gmra.mrb[0].mxu0 %vm37_vm0, %v29_v2 }
   0x5   :  { %1624 = vmatprep.mubr.msk.f32.mxu0 %vm37_vm0, %v30_v3 }
   0x8   :  { %1625 = vmatmul.mubr.msk.f32.gmra.mrb[2].mxu0 %vm37_vm0, %v31_v4 }
   0x9   :  { %1627 = vmatprep.mubr.msk.f32.mxu0 %vm37_vm0, %v32_v5 }
   0xc   :  { %1628 = vmatmul.mubr.msk.f32.gmra.mrb[4].mxu0 %vm37_vm0, %v33_v6 }
   0xd   :  { %1630 = vmatprep.mubr.msk.f32.mxu0 %vm37_vm0, %v34_v7  ;;  %v264_v7 = vld [vmem:[%s2489_s4] sm:$0xff] }
  0x10   :  { %1631 = vmatmul.mubr.msk.f32.gmra.mrb[6].mxu0 %vm37_vm0, %v35_v8  ;;  %v265_v8 = vld [vmem:[%s2489_s4 + $0x8] sm:$0xff] }
  0xd7   :  { %v1623_v9 = vpop.f32.mrb[0].mxu0 }
  0xd8   :  { %v128_v10 = vpop.f32.mrb[1].mxu0  ;;  %v168_v12 = vmul.f32 0.35355338, %v1623_v9 }
  0xd9   :  { %v167_v11 = vmul.f32 0.35355338, %v128_v10  ;;  %v1741_v10 = vpack.c.bf16 %v265_v8, %v264_v7 }
  0xda   :  { %v179_v19 = vsel %vm175_vm1, %v168_v12, -inf }
  0xdb   :  { %v1626_v13 = vpop.f32.mrb[2].mxu0  ;;  %v176_v14 = vsel %vm175_vm1, %v167_v11, -inf  ;;  %1742 = vmatprep.subr.bf16.mxu1 %v1741_v10 }
  0xdc   :  { %177 = vmax.xlane.f32.xlu0 %v176_v14  ;;  %v138_v15 = vpop.f32.mrb[3].mxu0  ;;  %v170_v17 = vmul.f32 0.35355338, %v1626_v13  ;;  %1744 = vmatpush3.bf16.msra.mxu1 %v1741_v10  ;;  %v267_v13 = vld [vmem:[%s2489_s4 + $0x18] sm:$0xff] }
  0xdd   :  { %v169_v16 = vmul.f32 0.35355338, %v138_v15  ;;  %v268_v15 = vld [vmem:[%s2489_s4 + $0x20] sm:$0xff] }
  0xde   :  { %v185_v25 = vsel %vm175_vm1, %v170_v17, -inf }
  0xdf   :  { %v1629_v18 = vpop.f32.mrb[4].mxu0  ;;  %v182_v20 = vsel %vm175_vm1, %v169_v16, -inf }
  0xe0   :  { %180 = vmax.xlane.f32.xlu0 %v179_v19  ;;  %183 = vmax.xlane.f32.xlu1 %v182_v20  ;;  %v148_v21 = vpop.f32.mrb[5].mxu0  ;;  %v172_v22 = vmul.f32 0.35355338, %v1629_v18  ;;  %v270_v18 = vld [vmem:[%s2489_s4 + $0x30] sm:$0xff]  ;;  %v271_v19 = vld [vmem:[%s2489_s4 + $0x38] sm:$0xff] }
  0xe1   :  { %v171_v23 = vmul.f32 0.35355338, %v148_v21  ;;  %v1753_v20 = vpack.c.bf16 %v271_v19, %v270_v18 }
  0xe2   :  { %v191_v30 = vsel %vm175_vm1, %v172_v22, -inf }
  0xe3   :  { %v1632_v24 = vpop.f32.mrb[6].mxu0  ;;  %v188_v26 = vsel %vm175_vm1, %v171_v23, -inf }
  0xe4   :  { %186 = vmax.xlane.f32.xlu1 %v185_v25  ;;  %189 = vmax.xlane.f32.xlu0 %v188_v26  ;;  %v158_v27 = vpop.f32.mrb[7].mxu0  ;;  %v174_v28 = vmul.f32 0.35355338, %v1632_v24 }
  0xe5   :  { %v173_v29 = vmul.f32 0.35355338, %v158_v27 }
  0xe6   :  { %v197_v32 = vsel %vm175_vm1, %v174_v28, -inf }
  0xe7   :  { %v194_v31 = vsel %vm175_vm1, %v173_v29, -inf }
  0xe8   :  { %192 = vmax.xlane.f32.xlu1 %v191_v30  ;;  %195 = vmax.xlane.f32.xlu0 %v194_v31 }
  0xec   :  { %198 = vmax.xlane.f32.xlu1 %v197_v32 }
 0x169   :  { %v178_v33 = vpop.xlane.xlu0 %177 }
 0x16a   :  { %v200_v34 = vsub.f32 %v167_v11, %v178_v33 }
 0x16c   :  { %v208_v35 = vmul.f32 1.442695, %v200_v34 }
 0x16d   :  { %v181_v36 = vpop.xlane.xlu0 %180  ;;  %v184_v37 = vpop.xlane.xlu1 %183 }
 0x16e   :  { %1805 = vpow2.f32 %v208_v35  ;;  %v201_v38 = vsub.f32 %v168_v12, %v181_v36  ;;  %v202_v39 = vsub.f32 %v169_v16, %v184_v37  ;;  %v266_v12 = vld [vmem:[%s2489_s4 + $0x10] sm:$0xff]  ;;  %v269_v16 = vld [vmem:[%s2489_s4 + $0x28] sm:$0xff] }
 0x16f   :  { %v1745_v14 = vpack.c.bf16 %v267_v13, %v266_v12  ;;  %v401_v12 = vld [vmem:[%s2490_s3] sm:$0xff] }
 0x170   :  { %v210_v40 = vmul.f32 1.442695, %v201_v38  ;;  %v212_v41 = vmul.f32 1.442695, %v202_v39 }
 0x171   :  { %v187_v42 = vpop.xlane.xlu1 %186  ;;  %v190_v43 = vpop.xlane.xlu0 %189  ;;  %1746 = vmatprep.subr.bf16.mxu1 %v1745_v14 }
 0x172   :  { %1807 = vpow2.f32 %v210_v40  ;;  %v203_v44 = vsub.f32 %v170_v17, %v187_v42  ;;  %v204_v45 = vsub.f32 %v171_v23, %v190_v43  ;;  %1748 = vmatpush3.bf16.msra.mxu1 %v1745_v14  ;;  %v1749_v17 = vpack.c.bf16 %v269_v16, %v268_v15 }
 0x173   :  { %1809 = vpow2.f32 %v212_v41 }
 0x174   :  { %v214_v46 = vmul.f32 1.442695, %v203_v44  ;;  %v216_v47 = vmul.f32 1.442695, %v204_v45  ;;  %1750 = vmatprep.subr.bf16.mxu1 %v1749_v17 }
 0x175   :  { %v193_v48 = vpop.xlane.xlu1 %192  ;;  %v196_v49 = vpop.xlane.xlu0 %195 }
 0x176   :  { %1811 = vpow2.f32 %v214_v46  ;;  %v205_v50 = vsub.f32 %v172_v22, %v193_v48  ;;  %v206_v51 = vsub.f32 %v173_v29, %v196_v49  ;;  %1752 = vmatpush3.bf16.msra.mxu1 %v1749_v17  ;;  %v404_v17 = vld [vmem:[%s2490_s3 + $0x18] sm:$0xff] }
 0x177   :  { %1813 = vpow2.f32 %v216_v47  ;;  %1754 = vmatprep.subr.bf16.mxu1 %v1753_v20 }
 0x178   :  { %v2016_v52 = vpop.eup %1805  ;;  %v218_v53 = vmul.f32 1.442695, %v205_v50  ;;  %v220_v54 = vmul.f32 1.442695, %v206_v51 }
 0x179   :  { %v199_v55 = vpop.xlane.xlu1 %198  ;;  %v224_v56 = vsel %vm175_vm1, %v2016_v52, 0.0 }
 0x17a   :  { %1815 = vpow2.f32 %v218_v53  ;;  %v207_v57 = vsub.f32 %v174_v28, %v199_v55  ;;  %225 = vadd.xlane.f32.xlu0 %v224_v56  ;;  %1756 = vmatpush3.bf16.msra.mxu1 %v1753_v20 }
 0x17b   :  { %1817 = vpow2.f32 %v220_v54 }
 0x17c   :  { %v2020_v58 = vpop.eup %1807  ;;  %v222_v59 = vmul.f32 1.442695, %v207_v57 }
 0x17d   :  { %v2022_v60 = vpop.eup %1809  ;;  %v227_v61 = vsel %vm175_vm1, %v2020_v58, 0.0 }
 0x17e   :  { %1819 = vpow2.f32 %v222_v59  ;;  %228 = vadd.xlane.f32.xlu1 %v227_v61  ;;  %v230_v62 = vsel %vm175_vm1, %v2022_v60, 0.0 }
 0x17f   :  { %231 = vadd.xlane.f32.xlu0 %v230_v62 }
 0x180   :  { %v2028_v63 = vpop.eup %1811 }
 0x181   :  { %v2030_v0 = vpop.eup %1813  ;;  %v233_v1 = vsel %vm175_vm1, %v2028_v63, 0.0 }
 0x182   :  { %234 = vadd.xlane.f32.xlu1 %v233_v1  ;;  %v236_v2 = vsel %vm175_vm1, %v2030_v0, 0.0 }
 0x183   :  { %237 = vadd.xlane.f32.xlu0 %v236_v2 }
 0x184   :  { %v2036_v3 = vpop.eup %1815 }
 0x185   :  { %v2038_v4 = vpop.eup %1817  ;;  %v239_v5 = vsel %vm175_vm1, %v2036_v3, 0.0 }
 0x186   :  { %240 = vadd.xlane.f32.xlu1 %v239_v5  ;;  %v242_v6 = vsel %vm175_vm1, %v2038_v4, 0.0 }
 0x187   :  { %243 = vadd.xlane.f32.xlu0 %v242_v6 }
 0x188   :  { %v1820_v9 = vpop.eup %1819 }
 0x189   :  { %v245_v11 = vsel %vm175_vm1, %v1820_v9, 0.0 }
 0x18a   :  { %246 = vadd.xlane.f32.xlu1 %v245_v11  ;;  %v402_v11 = vld [vmem:[%s2490_s3 + $0x8] sm:$0xff] }
 0x207   :  { %v226_v21 = vpop.xlane.xlu0 %225 }
 0x208   :  { %1821 = vrcp.f32 %v226_v21 }
 0x20b   :  { %v229_v22 = vpop.xlane.xlu1 %228 }
 0x20c   :  { %1823 = vrcp.f32 %v229_v22  ;;  %v232_v23 = vpop.xlane.xlu0 %231 }
 0x20d   :  { %1825 = vrcp.f32 %v232_v23 }
 0x20f   :  { %v235_v24 = vpop.xlane.xlu1 %234 }
 0x210   :  { %1827 = vrcp.f32 %v235_v24  ;;  %v238_v25 = vpop.xlane.xlu0 %237  ;;  %v403_v24 = vld [vmem:[%s2490_s3 + $0x10] sm:$0xff] }
 0x211   :  { %1829 = vrcp.f32 %v238_v25 }
 0x212   :  { %v1822_v26 = vpop.eup %1821 }
 0x213   :  { %v241_v27 = vpop.xlane.xlu1 %240  ;;  %v249_v28 = vmul.f32 %v1822_v26, %v2016_v52  ;;  %v405_v26 = vld [vmem:[%s2490_s3 + $0x20] sm:$0xff] }
 0x214   :  { %1831 = vrcp.f32 %v241_v27  ;;  %v244_v29 = vpop.xlane.xlu0 %243 }
 0x215   :  { %1833 = vrcp.f32 %v244_v29  ;;  %1649 = vmatprep.mubr.msk.f32.mxu1 %vm175_vm1, %v249_v28 }
 0x216   :  { %v1824_v30 = vpop.eup %1823 }
 0x217   :  { %v1826_v31 = vpop.eup %1825  ;;  %v247_v32 = vpop.xlane.xlu1 %246  ;;  %v251_v33 = vmul.f32 %v1824_v30, %v2020_v58 }
 0x218   :  { %1835 = vrcp.f32 %v247_v32  ;;  %v253_v34 = vmul.f32 %v1826_v31, %v2022_v60  ;;  %v406_v32 = vld [vmem:[%s2490_s3 + $0x28] sm:$0xff] }
 0x219   :  { %1650 = vmatmul.mubr.msk.f32.vlgmr.msra.gmra.mrb[0].mxu1 %vm175_vm1, %v251_v33 }
 0x21a   :  { %v1828_v35 = vpop.eup %1827  ;;  %1652 = vmatprep.mubr.msk.f32.mxu1 %vm175_vm1, %v253_v34  ;;  %v407_v34 = vld [vmem:[%s2490_s3 + $0x30] sm:$0xff] }
 0x21b   :  { %v1830_v36 = vpop.eup %1829  ;;  %v255_v37 = vmul.f32 %v1828_v35, %v2028_v63 }
 0x21c   :  { %v257_v38 = vmul.f32 %v1830_v36, %v2030_v0 }
 0x21d   :  { %1653 = vmatmul.mubr.msk.f32.gmra.mrb[2].mxu1 %vm175_vm1, %v255_v37 }
 0x21e   :  { %v1832_v39 = vpop.eup %1831  ;;  %1655 = vmatprep.mubr.msk.f32.mxu1 %vm175_vm1, %v257_v38 }
 0x21f   :  { %v1834_v40 = vpop.eup %1833  ;;  %v259_v41 = vmul.f32 %v1832_v39, %v2036_v3 }
 0x220   :  { %v261_v42 = vmul.f32 %v1834_v40, %v2038_v4 }
 0x221   :  { %1656 = vmatmul.mubr.msk.f32.gmra.mrb[4].mxu1 %vm175_vm1, %v259_v41 }
 0x222   :  { %v1836_v43 = vpop.eup %1835  ;;  %1658 = vmatprep.mubr.msk.f32.mxu1 %vm175_vm1, %v261_v42  ;;  %v408_v42 = vld [vmem:[%s2490_s3 + $0x38] sm:$0xff] }
 0x223   :  { %v263_v44 = vmul.f32 %v1836_v43, %v1820_v9 }
 0x225   :  { %1659 = vmatmul.mubr.msk.f32.gmra.mrb[6].mxu1 %vm175_vm1, %v263_v44 }
 0x2ec   :  { %v2084_v45 = vpop.f32.mrb[0].mxu1 }
 0x2ed   :  { %419 = vrot.lane.b32.xlu1 %v2084_v45, %s1937_s27  ;;  %v2088_v46 = vpop.f32.mrb[1].mxu1 }
 0x2ee   :  { %v607_v47 = vadd.f32 %v2084_v45, %v2088_v46  ;;  %417 = vrot.lane.b32.xlu0 %v2088_v46, %s1937_s27 }
 0x2f0   :  { %v2094_v48 = vpop.f32.mrb[2].mxu1 }
 0x2f1   :  { %423 = vrot.lane.b32.xlu1 %v2094_v48, %s1937_s27  ;;  %v2098_v49 = vpop.f32.mrb[3].mxu1 }
 0x2f2   :  { %v608_v50 = vadd.f32 %v607_v47, %v2098_v49 }
 0x2f4   :  { %v2101_v51 = vpop.f32.mrb[4].mxu1  ;;  %v609_v52 = vadd.f32 %v2094_v48, %v608_v50 }
 0x2f5   :  { %421 = vrot.lane.b32.xlu1 %v2098_v49, %s1937_s27  ;;  %v2106_v53 = vpop.f32.mrb[5].mxu1 }
 0x2f6   :  { %v610_v54 = vadd.f32 %v609_v52, %v2106_v53  ;;  %425 = vrot.lane.b32.xlu0 %v2106_v53, %s1937_s27 }
 0x2f8   :  { %v2111_v55 = vpop.f32.mrb[6].mxu1  ;;  %v611_v56 = vadd.f32 %v2101_v51, %v610_v54 }
 0x2f9   :  { %427 = vrot.lane.b32.xlu1 %v2101_v51, %s1937_s27  ;;  %v2116_v57 = vpop.f32.mrb[7].mxu1 }
 0x2fa   :  { %v612_v58 = vadd.f32 %v611_v56, %v2116_v57  ;;  %429 = vrot.lane.b32.xlu0 %v2116_v57, %s1937_s27 }
 0x2fc   :  { %v613_v59 = vadd.f32 %v2111_v55, %v612_v58 }
 0x2fd   :  { %431 = vrot.lane.b32.xlu1 %v2111_v55, %s1937_s27 }
 0x2fe   :  { %v614_v60 = vrot.slane %v613_v59, 4 }
 0x300   :  { %v615_v61 = vadd.f32 %v614_v60, %v613_v59 }
 0x302   :  { %v616_v62 = vrot.slane %v615_v61, 2 }
 0x304   :  { %v617_v63 = vadd.f32 %v616_v62, %v615_v61 }
 0x306   :  { %v618_v0 = vrot.slane %v617_v63, 1 }
 0x308   :  { %v619_v1 = vadd.f32 %v618_v0, %v617_v63 }
 0x30a   :  { %v2124_v2 = vmul.f32 0.015625, %v619_v1 }
 0x30c   :  { %v622_v3 = vsub.f32 %v2084_v45, %v2124_v2  ;;  %v621_v4 = vsub.f32 %v2088_v46, %v2124_v2  ;;  %v623_v5 = vsub.f32 %v2098_v49, %v2124_v2  ;;  %v624_v6 = vsub.f32 %v2094_v48, %v2124_v2 }
 0x30d   :  { %v625_v7 = vsub.f32 %v2106_v53, %v2124_v2  ;;  %v626_v8 = vsub.f32 %v2101_v51, %v2124_v2  ;;  %v627_v9 = vsub.f32 %v2116_v57, %v2124_v2  ;;  %v628_v10 = vsub.f32 %v2111_v55, %v2124_v2  ;;  %v1509_v51 = vld [vmem:[%s2487_s2 + $0x8] sm:$0xff]  ;;  %v1501_v57 = vld [vmem:[%s2488_s1 + $0x40] sm:$0xff]  ;;  %v1503_v2 = vld [vmem:[%s2488_s1 + $0x50] sm:$0xff] }
 0x30e   :  { %v1502_v55 = vld [vmem:[%s2488_s1 + $0x48] sm:$0xff] }
 0x35f   :  { %v420_v13 = vpop.permute.xlu1 %419 }
 0x360   :  { %v442_v14 = vadd.f32 %v420_v13, %v402_v11  ;;  %v418_v15 = vpop.permute.xlu0 %417 }
 0x361   :  { %v441_v16 = vadd.f32 %v418_v15, %v401_v12 }
 0x362   :  { %v1493_v18 = vmul.f32 -0.5, %v442_v14 }
 0x363   :  { %v1492_v19 = vmul.f32 -0.5, %v441_v16  ;;  %v424_v20 = vpop.permute.xlu1 %423 }
 0x364   :  { %v467_v21 = vmul.f32 1.442695, %v1493_v18  ;;  %v444_v22 = vadd.f32 %v424_v20, %v404_v17 }
 0x365   :  { %v465_v23 = vmul.f32 1.442695, %v1492_v19 }
 0x366   :  { %1837 = vpow2.f32 %v467_v21  ;;  %v1495_v25 = vmul.f32 -0.5, %v444_v22 }
 0x367   :  { %1839 = vpow2.f32 %v465_v23  ;;  %v422_v27 = vpop.permute.xlu1 %421 }
 0x368   :  { %v471_v28 = vmul.f32 1.442695, %v1495_v25  ;;  %v443_v29 = vadd.f32 %v422_v27, %v403_v24  ;;  %v426_v30 = vpop.permute.xlu0 %425 }
 0x369   :  { %v445_v31 = vadd.f32 %v426_v30, %v405_v26 }
 0x36a   :  { %1841 = vpow2.f32 %v471_v28  ;;  %v1494_v33 = vmul.f32 -0.5, %v443_v29  ;;  %v1939_v28 = vmov 0  }
 0x36b   :  { %v1496_v35 = vmul.f32 -0.5, %v445_v31  ;;  %v428_v36 = vpop.permute.xlu1 %427  ;;  %1804 = vset.pattern.permute.xlu1 %v1939_v28  ;;  %1803 = vset.pattern.permute.xlu0 %v1939_v28 }
 0x36c   :  { %v469_v37 = vmul.f32 1.442695, %v1494_v33  ;;  %v446_v38 = vadd.f32 %v428_v36, %v406_v32  ;;  %v430_v39 = vpop.permute.xlu0 %429 }
 0x36d   :  { %v473_v40 = vmul.f32 1.442695, %v1496_v35  ;;  %v447_v41 = vadd.f32 %v430_v39, %v407_v34 }
 0x36e   :  { %1843 = vpow2.f32 %v469_v37  ;;  %v1497_v43 = vmul.f32 -0.5, %v446_v38 }
 0x36f   :  { %1845 = vpow2.f32 %v473_v40  ;;  %v1498_v44 = vmul.f32 -0.5, %v447_v41  ;;  %v432_v47 = vpop.permute.xlu1 %431 }
 0x370   :  { %v1838_v50 = vpop.eup %1837  ;;  %v475_v52 = vmul.f32 1.442695, %v1497_v43  ;;  %v448_v54 = vadd.f32 %v432_v47, %v408_v42 }
 0x371   :  { %v1840_v56 = vpop.eup %1839  ;;  %v482_v58 = vadd.f32 1.0, %v1838_v50  ;;  %v477_v59 = vmul.f32 1.442695, %v1498_v44 }
 0x372   :  { %v481_v60 = vadd.f32 1.0, %v1840_v56  ;;  %1847 = vpow2.f32 %v475_v52  ;;  %v1499_v61 = vmul.f32 -0.5, %v448_v54 }
 0x373   :  { %1849 = vrcp.f32 %v482_v58 }
 0x374   :  { %v1842_v62 = vpop.eup %1841  ;;  %1851 = vrcp.f32 %v481_v60  ;;  %v479_v63 = vmul.f32 1.442695, %v1499_v61 }
 0x375   :  { %v484_v0 = vadd.f32 1.0, %v1842_v62  ;;  %1853 = vpow2.f32 %v477_v59 }
 0x376   :  { %1855 = vpow2.f32 %v479_v63 }
 0x377   :  { %1857 = vrcp.f32 %v484_v0 }
 0x378   :  { %v1844_v1 = vpop.eup %1843 }
 0x379   :  { %v1846_v11 = vpop.eup %1845  ;;  %v483_v12 = vadd.f32 1.0, %v1844_v1 }
 0x37a   :  { %v485_v13 = vadd.f32 1.0, %v1846_v11 }
 0x37b   :  { %1859 = vrcp.f32 %v483_v12 }
 0x37c   :  { %v1848_v14 = vpop.eup %1847  ;;  %1861 = vrcp.f32 %v485_v13 }
 0x37d   :  { %v1850_v15 = vpop.eup %1849  ;;  %v486_v16 = vadd.f32 1.0, %v1848_v14 }
 0x37e   :  { %v1852_v17 = vpop.eup %1851  ;;  %515 = vrot.lane.b32.xlu1 %v1850_v15, %s1938_s19 }
 0x37f   :  { %v1854_v18 = vpop.eup %1853  ;;  %1863 = vrcp.f32 %v486_v16  ;;  %513 = vrot.lane.b32.xlu0 %v1852_v17, %s1938_s19 }
 0x380   :  { %v1856_v19 = vpop.eup %1855  ;;  %v487_v20 = vadd.f32 1.0, %v1854_v18 }
 0x381   :  { %v1858_v21 = vpop.eup %1857  ;;  %v488_v22 = vadd.f32 1.0, %v1856_v19 }
 0x382   :  { %1865 = vrcp.f32 %v487_v20  ;;  %519 = vrot.lane.b32.xlu1 %v1858_v21, %s1938_s19 }
 0x383   :  { %1867 = vrcp.f32 %v488_v22 }
 0x385   :  { %v1860_v23 = vpop.eup %1859 }
 0x386   :  { %517 = vrot.lane.b32.xlu0 %v1860_v23, %s1938_s19  ;;  %v1862_v24 = vpop.eup %1861 }
 0x389   :  { %v1864_v25 = vpop.eup %1863 }
 0x38a   :  { %523 = vrot.lane.b32.xlu1 %v1864_v25, %s1938_s19  ;;  %521 = vrot.lane.b32.xlu0 %v1862_v24, %s1938_s19 }
 0x38c   :  { %v1866_v26 = vpop.eup %1865 }
 0x38d   :  { %v1868_v27 = vpop.eup %1867 }
 0x38e   :  { %527 = vrot.lane.b32.xlu1 %v1868_v27, %s1938_s19  ;;  %525 = vrot.lane.b32.xlu0 %v1866_v26, %s1938_s19 }
 0x3f0   :  { %v516_v29 = vpop.permute.xlu1 %515 }
 0x3f1   :  { %v514_v30 = vpop.permute.xlu0 %513  ;;  %v538_v33 = vmul.f32 %v1850_v15, %v516_v29 }
 0x3f2   :  { %v537_v34 = vmul.f32 %v1852_v17, %v514_v30 }
 0x3f3   :  { %v547_v41 = vsel %vm545_vm2, %v538_v33, inf  ;;  %v568_v42 = vsel %vm545_vm2, %v538_v33, -inf }
 0x3f4   :  { %v520_v31 = vpop.permute.xlu1 %519  ;;  %v546_v52 = vsel %vm545_vm2, %v537_v34, inf  ;;  %v567_v54 = vsel %vm545_vm2, %v537_v34, -inf }
 0x3f5   :  { %v2174_v35 = vmul.f32 %v1858_v21, %v520_v31 }
 0x3f7   :  { %v549_v56 = vsel %vm545_vm2, %v2174_v35, inf  ;;  %v570_v58 = vsel %vm545_vm2, %v2174_v35, -inf }
 0x3f8   :  { %v518_v32 = vpop.permute.xlu0 %517 }
 0x3f9   :  { %v539_v38 = vmul.f32 %v1860_v23, %v518_v32 }
 0x3fb   :  { %v548_v61 = vsel %vm545_vm2, %v539_v38, inf  ;;  %v569_v62 = vsel %vm545_vm2, %v539_v38, -inf }
 0x3fc   :  { %v524_v36 = vpop.permute.xlu1 %523  ;;  %v522_v37 = vpop.permute.xlu0 %521 }
 0x3fd   :  { %v2176_v39 = vmul.f32 %v1864_v25, %v524_v36  ;;  %v2178_v40 = vmul.f32 %v1862_v24, %v522_v37 }
 0x3ff   :  { %v552_v43 = vsel %vm545_vm2, %v2176_v39, inf  ;;  %v573_v44 = vsel %vm545_vm2, %v2176_v39, -inf  ;;  %v550_v47 = vsel %vm545_vm2, %v2178_v40, inf  ;;  %v571_v50 = vsel %vm545_vm2, %v2178_v40, -inf }
 0x400   :  { %v528_v59 = vpop.permute.xlu1 %527  ;;  %v526_v60 = vpop.permute.xlu0 %525  ;;  %v553_v1 = vmin.f32 %v547_v41, %v552_v43  ;;  %v574_v11 = vmax.f32 %v568_v42, %v573_v44  ;;  %v551_v12 = vmin.f32 %v546_v52, %v550_v47  ;;  %v572_v13 = vmax.f32 %v567_v54, %v571_v50 }
 0x401   :  { %v544_v63 = vmul.f32 %v1868_v27, %v528_v59  ;;  %v543_v0 = vmul.f32 %v1866_v26, %v526_v60 }
 0x402   :  { %v558_v22 = vmin.f32 %v551_v12, %v553_v1  ;;  %v579_v23 = vmax.f32 %v572_v13, %v574_v11  ;;  %v1940_v12 = vmov 0.0|0.0  }
 0x403   :  { %v556_v14 = vsel %vm545_vm2, %v544_v63, inf  ;;  %v577_v15 = vsel %vm545_vm2, %v544_v63, -inf  ;;  %v554_v16 = vsel %vm545_vm2, %v543_v0, inf  ;;  %v575_v17 = vsel %vm545_vm2, %v543_v0, -inf  ;;  %1757 = vmatprep.subr.bf16.mxu0 %v1940_v12 }
 0x404   :  { %v557_v18 = vmin.f32 %v549_v56, %v556_v14  ;;  %v578_v19 = vmax.f32 %v570_v58, %v577_v15  ;;  %v555_v20 = vmin.f32 %v548_v61, %v554_v16  ;;  %v576_v21 = vmax.f32 %v569_v62, %v575_v17  ;;  %v20_v17 = vld [vmem:[%s2491_s0] sm:$0x7] }
 0x406   :  { %v559_v24 = vmin.f32 %v555_v20, %v557_v18  ;;  %v580_v25 = vmax.f32 %v576_v21, %v578_v19  ;;  %v22_v18 = vsel %vm21_vm3, %v20_v17, 0.0 }
 0x408   :  { %v560_v26 = vmin.f32 %v558_v22, %v559_v24  ;;  %v581_v27 = vmax.f32 %v579_v23, %v580_v25 }
 0x40a   :  { %v561_v28 = vrot.slane %v560_v26, 4  ;;  %v582_v29 = vrot.slane %v581_v27, 4 }
 0x40c   :  { %v562_v30 = vmin.f32 %v560_v26, %v561_v28  ;;  %v583_v31 = vmax.f32 %v581_v27, %v582_v29  ;;  %v1506_v28 = vld [vmem:[%s2488_s1 + $0x68] sm:$0xff]  ;;  %v1507_v29 = vld [vmem:[%s2488_s1 + $0x70] sm:$0xff] }
 0x40e   :  { %v563_v32 = vrot.slane %v562_v30, 2  ;;  %v584_v36 = vrot.slane %v583_v31, 2 }
 0x410   :  { %v564_v37 = vmin.f32 %v562_v30, %v563_v32  ;;  %v585_v41 = vmax.f32 %v583_v31, %v584_v36  ;;  %v1508_v30 = vld [vmem:[%s2488_s1 + $0x78] sm:$0xff] }
 0x412   :  { %v565_v42 = vrot.slane %v564_v37, 1  ;;  %v586_v43 = vrot.slane %v585_v41, 1 }
 0x414   :  { %v566_v44 = vmin.f32 %v564_v37, %v565_v42  ;;  %v587_v47 = vmax.f32 %v585_v41, %v586_v43 }
 0x416   :  { %v596_v50 = vsub.f32 %v587_v47, %v566_v44  ;;  %v589_v54 = vsub.f32 %v538_v33, %v566_v44  ;;  %v588_v56 = vsub.f32 %v537_v34, %v566_v44  ;;  %v590_v61 = vsub.f32 %v539_v38, %v566_v44 }
 0x417   :  { %v591_v62 = vsub.f32 %v2174_v35, %v566_v44  ;;  %v592_v13 = vsub.f32 %v2178_v40, %v566_v44  ;;  %v593_v33 = vsub.f32 %v2176_v39, %v566_v44  ;;  %v594_v15 = vsub.f32 %v543_v0, %v566_v44 }
 0x418   :  { %v597_v52 = vmax.f32 %v596_v50, 1e-06  ;;  %v595_v38 = vsub.f32 %v544_v63, %v566_v44  ;;  %v1942_v40 = vmov 0.0  }
 0x419   :  { %1677 = vmatprep.mubr.msk.f32.mxu0 %vm1941_vm4, %v1942_v40 }
 0x41a   :  { %1869 = vrcp.f32 %v597_v52 }
 0x424   :  { %v1870_v58 = vpop.eup %1869 }
 0x425   :  { %v600_v59 = vmul.f32 %v1870_v58, %v589_v54  ;;  %v599_v60 = vmul.f32 %v1870_v58, %v588_v56  ;;  %v601_v1 = vmul.f32 %v1870_v58, %v590_v61  ;;  %v602_v11 = vmul.f32 %v1870_v58, %v591_v62 }
 0x426   :  { %v603_v14 = vmul.f32 %v1870_v58, %v592_v13  ;;  %v604_v34 = vmul.f32 %v1870_v58, %v593_v33  ;;  %v605_v16 = vmul.f32 %v1870_v58, %v594_v15  ;;  %v606_v35 = vmul.f32 %v1870_v58, %v595_v38  ;;  %v1518_v38 = vld [vmem:[%s2489_s4 + $0x40] sm:$0xff] }
 0x427   :  { %636 = vperm.xlu1 %1804, %v600_v59   ;;  %631 = vperm.xlu0 %1803, %v599_v60  }
 0x42b   :  { %641 = vperm.xlu1 %1804, %v601_v1   ;;  %646 = vperm.xlu0 %1803, %v602_v11  }
 0x42f   :  { %651 = vperm.xlu0 %1803, %v603_v14  }
 0x433   :  { %656 = vperm.xlu0 %1803, %v604_v34  }
 0x437   :  { %661 = vperm.xlu0 %1803, %v605_v16  }
 0x43b   :  { %666 = vperm.xlu0 %1803, %v606_v35   ;;  %v1519_v35 = vld [vmem:[%s2489_s4 + $0x48] sm:$0xff] }
 0x44f   :  { %23 = vadd.xlane.f32.xlu1 %v22_v18 }
 0x4a6   :  { %v637_v39 = vpop.permute.xlu1 %636  ;;  %v632_v19 = vpop.permute.xlu0 %631 }
 0x4a7   :  { %v670_v0 = vmul.f32 %v637_v39, %v622_v3  ;;  %v669_v63 = vmul.f32 %v632_v19, %v621_v4 }
 0x4a9   :  { %v1758_v20 = vpack.c.bf16 %v670_v0, %v669_v63 }
 0x4aa   :  { %v642_v21 = vpop.permute.xlu1 %641  ;;  %v647_v22 = vpop.permute.xlu0 %646 }
 0x4ab   :  { %v671_v23 = vmul.f32 %v642_v21, %v623_v5  ;;  %v672_v24 = vmul.f32 %v647_v22, %v624_v6  ;;  %1759 = vmatpush3.bf16.msra.mxu0 %v1758_v20 }
 0x4ac   :  { %1760 = vmatprep.subr.bf16.mxu0 %v1940_v12 }
 0x4ad   :  { %v1761_v45 = vpack.c.bf16 %v672_v24, %v671_v23 }
 0x4ae   :  { %v652_v3 = vpop.permute.xlu0 %651 }
 0x4af   :  { %1762 = vmatpush3.bf16.msra.mxu0 %v1761_v45  ;;  %v673_v4 = vmul.f32 %v652_v3, %v625_v7 }
 0x4b0   :  { %1763 = vmatprep.subr.bf16.mxu0 %v1940_v12 }
 0x4b2   :  { %v657_v46 = vpop.permute.xlu0 %656 }
 0x4b3   :  { %v674_v49 = vmul.f32 %v657_v46, %v626_v8 }
 0x4b5   :  { %v1764_v5 = vpack.c.bf16 %v674_v49, %v673_v4 }
 0x4b6   :  { %v662_v48 = vpop.permute.xlu0 %661 }
 0x4b7   :  { %1765 = vmatpush3.bf16.msra.mxu0 %v1764_v5  ;;  %v675_v25 = vmul.f32 %v662_v48, %v627_v9  ;;  %v1504_v9 = vld [vmem:[%s2488_s1 + $0x58] sm:$0xff] }
 0x4b8   :  { %1766 = vmatprep.subr.bf16.mxu0 %v1940_v12 }
 0x4ba   :  { %v667_v6 = vpop.permute.xlu0 %666 }
 0x4bb   :  { %v676_v26 = vmul.f32 %v667_v6, %v628_v10  ;;  %v1505_v10 = vld [vmem:[%s2488_s1 + $0x60] sm:$0xff] }
 0x4bd   :  { %v1767_v53 = vpack.c.bf16 %v676_v26, %v675_v25 }
 0x4bf   :  { %1768 = vmatpush3.bf16.msra.mxu0 %v1767_v53 }
 0x4c0   :  { %1680 = vmatprep.subr.mxu0 %v1509_v51 }
 0x4dc   :  { %v24_v7 = vpop.xlane.xlu1 %23 }
 0x4dd   :  { %v26_v8 = vmul.f32 0.015625, %v24_v7 }
 0x4df   :  { %v2240_v27 = vsub.f32 %v20_v17, %v26_v8  ;;  %v1769_v17 = vpack.c.bf16 %v1519_v35, %v1518_v38 }
 0x4e1   :  { %1678 = vmatmul.mubr.msk.f32.vlgmr.msra.gmra.mrb[8].mxu0 %vm175_vm1, %v2240_v27  ;;  %1770 = vmatprep.subr.bf16.mxu1 %v1769_v17 }
 0x4e2   :  { %1681 = vmatpush3.msra.mxu0 %v1509_v51  ;;  %1682 = vmatprep.mubr.msk.f32.mxu0 %vm37_vm0, %v1501_v57 }
 0x4e3   :  { %1785 = vmatprep.subr.bf16.mxu0 %v1940_v12  ;;  %1772 = vmatpush3.bf16.msra.mxu1 %v1769_v17 }
 0x4e5   :  { %1683 = vmatmul.mubr.msk.f32.vlgmr.msra.gmra.mrb[10].mxu0 %vm37_vm0, %v1502_v55 }
 0x4e6   :  { %1685 = vmatprep.mubr.msk.f32.mxu0 %vm37_vm0, %v1503_v2 }
 0x4e9   :  { %1686 = vmatmul.mubr.msk.f32.gmra.mrb[12].mxu0 %vm37_vm0, %v1504_v9 }
 0x4ea   :  { %1688 = vmatprep.mubr.msk.f32.mxu0 %vm37_vm0, %v1505_v10 }
 0x4ed   :  { %1689 = vmatmul.mubr.msk.f32.gmra.mrb[14].mxu0 %vm37_vm0, %v1506_v28 }
 0x4ee   :  { %1691 = vmatprep.mubr.msk.f32.mxu0 %vm37_vm0, %v1507_v29 }
 0x4f1   :  { %1692 = vmatmul.mubr.msk.f32.gmra.mrb[16].mxu0 %vm37_vm0, %v1508_v30 }
 0x4f2   :  { %1738 = vmatprep.mubr.msk.f32.mxu0 %vm1941_vm4, %v1942_v40 }
 0x5b4   :  { %v746_v31 = vpop.f32.mrb[8].mxu0 }
 0x5b5   :  { %1470 = vst [vmem:[%s2492_s5] sm:$0x7] %v746_v31  ;;  %v1679_v32 = vpop.f32.mrb[9].mxu0 }
 0x5b8   :  { %v1684_v36 = vpop.f32.mrb[10].mxu0 }
 0x5b9   :  { %v891_v37 = vmul.f32 0.35355338, %v1684_v36  ;;  %v851_v41 = vpop.f32.mrb[11].mxu0 }
 0x5ba   :  { %v890_v42 = vmul.f32 0.35355338, %v851_v41 }
 0x5bb   :  { %v901_v43 = vsel %vm175_vm1, %v891_v37, -inf }
 0x5bc   :  { %902 = vmax.xlane.f32.xlu1 %v901_v43  ;;  %v1687_v44 = vpop.f32.mrb[12].mxu0  ;;  %v898_v47 = vsel %vm175_vm1, %v890_v42, -inf }
 0x5bd   :  { %899 = vmax.xlane.f32.xlu0 %v898_v47  ;;  %v861_v50 = vpop.f32.mrb[13].mxu0  ;;  %v893_v54 = vmul.f32 0.35355338, %v1687_v44  ;;  %v1520_v44 = vld [vmem:[%s2489_s4 + $0x50] sm:$0xff]  ;;  %v1521_v47 = vld [vmem:[%s2489_s4 + $0x58] sm:$0xff] }
 0x5be   :  { %v892_v52 = vmul.f32 0.35355338, %v861_v50  ;;  %v1773_v50 = vpack.c.bf16 %v1521_v47, %v1520_v44  ;;  %v1535_v47 = vld [vmem:[%s2490_s3 + $0x48] sm:$0xff] }
 0x5bf   :  { %v907_v1 = vsel %vm175_vm1, %v893_v54, -inf }
 0x5c0   :  { %v1690_v56 = vpop.f32.mrb[14].mxu0  ;;  %v904_v58 = vsel %vm175_vm1, %v892_v52, -inf  ;;  %1774 = vmatprep.subr.bf16.mxu1 %v1773_v50 }
 0x5c1   :  { %905 = vmax.xlane.f32.xlu1 %v904_v58  ;;  %v871_v59 = vpop.f32.mrb[15].mxu0  ;;  %v895_v60 = vmul.f32 0.35355338, %v1690_v56  ;;  %1776 = vmatpush3.bf16.msra.mxu1 %v1773_v50  ;;  %v1524_v58 = vld [vmem:[%s2489_s4 + $0x70] sm:$0xff]  ;;  %v1534_v50 = vld [vmem:[%s2490_s3 + $0x40] sm:$0xff] }
 0x5c2   :  { %v894_v61 = vmul.f32 0.35355338, %v871_v59  ;;  %v1525_v59 = vld [vmem:[%s2489_s4 + $0x78] sm:$0xff] }
 0x5c3   :  { %v913_v34 = vsel %vm175_vm1, %v895_v60, -inf }
 0x5c4   :  { %v1693_v62 = vpop.f32.mrb[16].mxu0  ;;  %v910_v11 = vsel %vm175_vm1, %v894_v61, -inf }
 0x5c5   :  { %908 = vmax.xlane.f32.xlu1 %v907_v1  ;;  %911 = vmax.xlane.f32.xlu0 %v910_v11  ;;  %v881_v13 = vpop.f32.mrb[17].mxu0  ;;  %v897_v14 = vmul.f32 0.35355338, %v1693_v62 }
 0x5c6   :  { %v896_v33 = vmul.f32 0.35355338, %v881_v13 }
 0x5c7   :  { %v919_v16 = vsel %vm175_vm1, %v897_v14, -inf }
 0x5c8   :  { %v916_v15 = vsel %vm175_vm1, %v896_v33, -inf }
 0x5c9   :  { %914 = vmax.xlane.f32.xlu1 %v913_v34  ;;  %917 = vmax.xlane.f32.xlu0 %v916_v15 }
 0x5cd   :  { %920 = vmax.xlane.f32.xlu1 %v919_v16 }
 0x649   :  { %v903_v18 = vpop.xlane.xlu1 %902 }
 0x64a   :  { %v923_v40 = vsub.f32 %v891_v37, %v903_v18  ;;  %v900_v39 = vpop.xlane.xlu0 %899 }
 0x64b   :  { %v922_v19 = vsub.f32 %v890_v42, %v900_v39 }
 0x64c   :  { %v932_v0 = vmul.f32 1.442695, %v923_v40 }
 0x64d   :  { %v930_v63 = vmul.f32 1.442695, %v922_v19 }
 0x64e   :  { %1871 = vpow2.f32 %v932_v0  ;;  %v906_v20 = vpop.xlane.xlu1 %905 }
 0x64f   :  { %1873 = vpow2.f32 %v930_v63  ;;  %v924_v21 = vsub.f32 %v892_v52, %v906_v20  ;;  %v1522_v52 = vld [vmem:[%s2489_s4 + $0x60] sm:$0xff] }
 0x651   :  { %v934_v22 = vmul.f32 1.442695, %v924_v21 }
 0x652   :  { %v909_v23 = vpop.xlane.xlu1 %908  ;;  %v912_v24 = vpop.xlane.xlu0 %911 }
 0x653   :  { %1875 = vpow2.f32 %v934_v22  ;;  %v925_v45 = vsub.f32 %v893_v54, %v909_v23  ;;  %v926_v3 = vsub.f32 %v894_v61, %v912_v24  ;;  %v1523_v54 = vld [vmem:[%s2489_s4 + $0x68] sm:$0xff] }
 0x654   :  { %v1777_v56 = vpack.c.bf16 %v1523_v54, %v1522_v52 }
 0x655   :  { %v936_v46 = vmul.f32 1.442695, %v925_v45  ;;  %v938_v4 = vmul.f32 1.442695, %v926_v3 }
 0x656   :  { %v915_v49 = vpop.xlane.xlu1 %914  ;;  %v918_v5 = vpop.xlane.xlu0 %917  ;;  %1778 = vmatprep.subr.bf16.mxu1 %v1777_v56 }
 0x657   :  { %1877 = vpow2.f32 %v936_v46  ;;  %v927_v48 = vsub.f32 %v895_v60, %v915_v49  ;;  %v928_v6 = vsub.f32 %v896_v33, %v918_v5  ;;  %1780 = vmatpush3.bf16.msra.mxu1 %v1777_v56  ;;  %v1781_v60 = vpack.c.bf16 %v1525_v59, %v1524_v58 }
 0x658   :  { %v1872_v25 = vpop.eup %1871  ;;  %1879 = vpow2.f32 %v938_v4 }
 0x659   :  { %v1874_v26 = vpop.eup %1873  ;;  %v940_v53 = vmul.f32 1.442695, %v927_v48  ;;  %v942_v51 = vmul.f32 1.442695, %v928_v6  ;;  %v949_v7 = vsel %vm175_vm1, %v1872_v25, 0.0  ;;  %1782 = vmatprep.subr.bf16.mxu1 %v1781_v60 }
 0x65a   :  { %950 = vadd.xlane.f32.xlu1 %v949_v7  ;;  %v921_v8 = vpop.xlane.xlu1 %920  ;;  %v946_v57 = vsel %vm175_vm1, %v1874_v26, 0.0 }
 0x65b   :  { %1881 = vpow2.f32 %v940_v53  ;;  %v929_v55 = vsub.f32 %v897_v14, %v921_v8  ;;  %947 = vadd.xlane.f32.xlu0 %v946_v57  ;;  %1784 = vmatpush3.bf16.msra.mxu1 %v1781_v60 }
 0x65c   :  { %1883 = vpow2.f32 %v942_v51 }
 0x65d   :  { %v1876_v2 = vpop.eup %1875  ;;  %v944_v9 = vmul.f32 1.442695, %v929_v55 }
 0x65e   :  { %v952_v10 = vsel %vm175_vm1, %v1876_v2, 0.0 }
 0x65f   :  { %1885 = vpow2.f32 %v944_v9  ;;  %953 = vadd.xlane.f32.xlu0 %v952_v10 }
 0x661   :  { %v1878_v28 = vpop.eup %1877 }
 0x662   :  { %v1880_v29 = vpop.eup %1879  ;;  %v955_v30 = vsel %vm175_vm1, %v1878_v28, 0.0 }
 0x663   :  { %956 = vadd.xlane.f32.xlu1 %v955_v30  ;;  %v958_v31 = vsel %vm175_vm1, %v1880_v29, 0.0 }
 0x664   :  { %959 = vadd.xlane.f32.xlu0 %v958_v31 }
 0x665   :  { %v1882_v32 = vpop.eup %1881 }
 0x666   :  { %v1884_v36 = vpop.eup %1883  ;;  %v961_v37 = vsel %vm175_vm1, %v1882_v32, 0.0 }
 0x667   :  { %962 = vadd.xlane.f32.xlu1 %v961_v37  ;;  %v964_v41 = vsel %vm175_vm1, %v1884_v36, 0.0 }
 0x668   :  { %965 = vadd.xlane.f32.xlu0 %v964_v41 }
 0x669   :  { %v1886_v42 = vpop.eup %1885 }
 0x66a   :  { %v967_v43 = vsel %vm175_vm1, %v1886_v42, 0.0 }
 0x66b   :  { %968 = vadd.xlane.f32.xlu1 %v967_v43 }
 0x6e7   :  { %v951_v61 = vpop.xlane.xlu1 %950 }
 0x6e8   :  { %1887 = vrcp.f32 %v951_v61  ;;  %v948_v62 = vpop.xlane.xlu0 %947 }
 0x6e9   :  { %1889 = vrcp.f32 %v948_v62  ;;  %v1537_v62 = vld [vmem:[%s2490_s3 + $0x58] sm:$0xff] }
 0x6ec   :  { %v954_v1 = vpop.xlane.xlu0 %953 }
 0x6ed   :  { %1891 = vrcp.f32 %v954_v1 }
 0x6f0   :  { %v957_v11 = vpop.xlane.xlu1 %956 }
 0x6f1   :  { %1893 = vrcp.f32 %v957_v11  ;;  %v960_v13 = vpop.xlane.xlu0 %959 }
 0x6f2   :  { %v1888_v14 = vpop.eup %1887  ;;  %1895 = vrcp.f32 %v960_v13 }
 0x6f3   :  { %v1890_v33 = vpop.eup %1889  ;;  %v973_v16 = vmul.f32 %v1888_v14, %v1872_v25  ;;  %v1536_v14 = vld [vmem:[%s2490_s3 + $0x50] sm:$0xff] }
 0x6f4   :  { %v963_v34 = vpop.xlane.xlu1 %962  ;;  %v971_v15 = vmul.f32 %v1890_v33, %v1874_v26 }
 0x6f5   :  { %1897 = vrcp.f32 %v963_v34  ;;  %v966_v38 = vpop.xlane.xlu0 %965  ;;  %v1538_v34 = vld [vmem:[%s2490_s3 + $0x60] sm:$0xff] }
 0x6f6   :  { %1899 = vrcp.f32 %v966_v38  ;;  %1710 = vmatprep.mubr.msk.f32.mxu1 %vm175_vm1, %v971_v15 }
 0x6f7   :  { %v1892_v35 = vpop.eup %1891  ;;  %1711 = vmatmul.mubr.msk.f32.vlgmr.msra.gmra.mrb[8].mxu1 %vm175_vm1, %v973_v16 }
 0x6f8   :  { %v969_v17 = vpop.xlane.xlu1 %968  ;;  %v975_v18 = vmul.f32 %v1892_v35, %v1876_v2 }
 0x6f9   :  { %1901 = vrcp.f32 %v969_v17 }
 0x6fa   :  { %1713 = vmatprep.mubr.msk.f32.mxu1 %vm175_vm1, %v975_v18  ;;  %v1539_v18 = vld [vmem:[%s2490_s3 + $0x68] sm:$0xff] }
 0x6fb   :  { %v1894_v40 = vpop.eup %1893 }
 0x6fc   :  { %v1896_v39 = vpop.eup %1895  ;;  %v977_v19 = vmul.f32 %v1894_v40, %v1878_v28 }
 0x6fd   :  { %v979_v0 = vmul.f32 %v1896_v39, %v1880_v29  ;;  %v1540_v39 = vld [vmem:[%s2490_s3 + $0x70] sm:$0xff] }
 0x6fe   :  { %1714 = vmatmul.mubr.msk.f32.gmra.mrb[10].mxu1 %vm175_vm1, %v977_v19 }
 0x6ff   :  { %v1898_v63 = vpop.eup %1897  ;;  %1716 = vmatprep.mubr.msk.f32.mxu1 %vm175_vm1, %v979_v0 }
 0x700   :  { %v1900_v20 = vpop.eup %1899  ;;  %v981_v21 = vmul.f32 %v1898_v63, %v1882_v32 }
 0x701   :  { %v983_v22 = vmul.f32 %v1900_v20, %v1884_v36 }
 0x702   :  { %1717 = vmatmul.mubr.msk.f32.gmra.mrb[12].mxu1 %vm175_vm1, %v981_v21 }
 0x703   :  { %v1902_v23 = vpop.eup %1901  ;;  %1719 = vmatprep.mubr.msk.f32.mxu1 %vm175_vm1, %v983_v22 }
 0x704   :  { %v985_v24 = vmul.f32 %v1902_v23, %v1886_v42 }
 0x706   :  { %1720 = vmatmul.mubr.msk.f32.gmra.mrb[14].mxu1 %vm175_vm1, %v985_v24 }
 0x7ca   :  { %v2329_v45 = vpop.f32.mrb[8].mxu1 }
 0x7cb   :  { %1143 = vrot.lane.b32.xlu1 %v2329_v45, %s1937_s27  ;;  %v2333_v3 = vpop.f32.mrb[9].mxu1 }
 0x7cc   :  { %v1330_v46 = vadd.f32 %v2329_v45, %v2333_v3  ;;  %1141 = vrot.lane.b32.xlu0 %v2333_v3, %s1937_s27 }
 0x7d1   :  { %v2339_v4 = vpop.f32.mrb[10].mxu1 }
 0x7d2   :  { %1147 = vrot.lane.b32.xlu1 %v2339_v4, %s1937_s27  ;;  %v2343_v49 = vpop.f32.mrb[11].mxu1 }
 0x7d3   :  { %v1331_v5 = vadd.f32 %v1330_v46, %v2343_v49  ;;  %v1541_v46 = vld [vmem:[%s2490_s3 + $0x78] sm:$0xff] }
 0x7d5   :  { %v2346_v48 = vpop.f32.mrb[12].mxu1  ;;  %v1332_v6 = vadd.f32 %v2339_v4, %v1331_v5 }
 0x7d6   :  { %1145 = vrot.lane.b32.xlu1 %v2343_v49, %s1937_s27  ;;  %v2351_v25 = vpop.f32.mrb[13].mxu1 }
 0x7d7   :  { %v1333_v26 = vadd.f32 %v1332_v6, %v2351_v25  ;;  %1149 = vrot.lane.b32.xlu0 %v2351_v25, %s1937_s27 }
 0x7d9   :  { %v2356_v53 = vpop.f32.mrb[14].mxu1  ;;  %v1334_v51 = vadd.f32 %v2346_v48, %v1333_v26 }
 0x7da   :  { %1151 = vrot.lane.b32.xlu1 %v2346_v48, %s1937_s27  ;;  %v2361_v7 = vpop.f32.mrb[15].mxu1 }
 0x7db   :  { %v1335_v8 = vadd.f32 %v1334_v51, %v2361_v7  ;;  %1153 = vrot.lane.b32.xlu0 %v2361_v7, %s1937_s27 }
 0x7dd   :  { %v1336_v57 = vadd.f32 %v2356_v53, %v1335_v8 }
 0x7de   :  { %1155 = vrot.lane.b32.xlu1 %v2356_v53, %s1937_s27 }
 0x7df   :  { %v1337_v55 = vrot.slane %v1336_v57, 4 }
 0x7e1   :  { %v1338_v2 = vadd.f32 %v1337_v55, %v1336_v57 }
 0x7e3   :  { %v1339_v9 = vrot.slane %v1338_v2, 2 }
 0x7e5   :  { %v1340_v10 = vadd.f32 %v1339_v9, %v1338_v2 }
 0x7e7   :  { %v1341_v28 = vrot.slane %v1340_v10, 1 }
 0x7e9   :  { %v1342_v29 = vadd.f32 %v1341_v28, %v1340_v10 }
 0x7eb   :  { %v2369_v30 = vmul.f32 0.015625, %v1342_v29 }
 0x7ed   :  { %v1350_v31 = vsub.f32 %v2361_v7, %v2369_v30  ;;  %v1345_v32 = vsub.f32 %v2329_v45, %v2369_v30  ;;  %v1344_v36 = vsub.f32 %v2333_v3, %v2369_v30  ;;  %v1347_v37 = vsub.f32 %v2339_v4, %v2369_v30 }
 0x7ee   :  { %v1346_v41 = vsub.f32 %v2343_v49, %v2369_v30  ;;  %v1349_v42 = vsub.f32 %v2346_v48, %v2369_v30  ;;  %v1348_v43 = vsub.f32 %v2351_v25, %v2369_v30  ;;  %v1351_v44 = vsub.f32 %v2356_v53, %v2369_v30 }
 0x83d   :  { %v1144_v52 = vpop.permute.xlu1 %1143 }
 0x83e   :  { %v1166_v54 = vadd.f32 %v1535_v47, %v1144_v52  ;;  %v1142_v56 = vpop.permute.xlu0 %1141 }
 0x83f   :  { %v1165_v58 = vadd.f32 %v1534_v50, %v1142_v56 }
 0x840   :  { %v1543_v59 = vmul.f32 -0.5, %v1166_v54 }
 0x841   :  { %v1542_v60 = vmul.f32 -0.5, %v1165_v58 }
 0x842   :  { %v1191_v61 = vmul.f32 1.442695, %v1543_v59 }
 0x843   :  { %v1189_v1 = vmul.f32 1.442695, %v1542_v60 }
 0x844   :  { %1903 = vpow2.f32 %v1191_v61  ;;  %v1148_v11 = vpop.permute.xlu1 %1147 }
 0x845   :  { %1905 = vpow2.f32 %v1189_v1  ;;  %v1168_v13 = vadd.f32 %v1537_v62, %v1148_v11 }
 0x847   :  { %v1545_v33 = vmul.f32 -0.5, %v1168_v13 }
 0x848   :  { %v1146_v15 = vpop.permute.xlu1 %1145 }
 0x849   :  { %v1195_v16 = vmul.f32 1.442695, %v1545_v33  ;;  %v1167_v38 = vadd.f32 %v1536_v14, %v1146_v15  ;;  %v1150_v35 = vpop.permute.xlu0 %1149 }
 0x84a   :  { %v1169_v17 = vadd.f32 %v1538_v34, %v1150_v35 }
 0x84b   :  { %1907 = vpow2.f32 %v1195_v16  ;;  %v1544_v40 = vmul.f32 -0.5, %v1167_v38 }
 0x84c   :  { %v1546_v19 = vmul.f32 -0.5, %v1169_v17  ;;  %v1152_v0 = vpop.permute.xlu1 %1151 }
 0x84d   :  { %v1193_v63 = vmul.f32 1.442695, %v1544_v40  ;;  %v1170_v20 = vadd.f32 %v1539_v18, %v1152_v0  ;;  %v1154_v21 = vpop.permute.xlu0 %1153 }
 0x84e   :  { %v1904_v22 = vpop.eup %1903  ;;  %v1197_v23 = vmul.f32 1.442695, %v1546_v19  ;;  %v1171_v24 = vadd.f32 %v1540_v39, %v1154_v21 }
 0x84f   :  { %v1906_v5 = vpop.eup %1905  ;;  %v1206_v6 = vadd.f32 1.0, %v1904_v22  ;;  %1909 = vpow2.f32 %v1193_v63  ;;  %v1547_v26 = vmul.f32 -0.5, %v1170_v20 }
 0x850   :  { %v1205_v51 = vadd.f32 1.0, %v1906_v5  ;;  %1911 = vpow2.f32 %v1197_v23  ;;  %v1548_v8 = vmul.f32 -0.5, %v1171_v24  ;;  %v1156_v57 = vpop.permute.xlu1 %1155 }
 0x851   :  { %1913 = vrcp.f32 %v1206_v6  ;;  %v1199_v55 = vmul.f32 1.442695, %v1547_v26  ;;  %v1172_v2 = vadd.f32 %v1541_v46, %v1156_v57 }
 0x852   :  { %1915 = vrcp.f32 %v1205_v51  ;;  %v1201_v9 = vmul.f32 1.442695, %v1548_v8 }
 0x853   :  { %1917 = vpow2.f32 %v1199_v55  ;;  %v1549_v10 = vmul.f32 -0.5, %v1172_v2 }
 0x854   :  { %1919 = vpow2.f32 %v1201_v9 }
 0x855   :  { %v1908_v28 = vpop.eup %1907  ;;  %v1203_v29 = vmul.f32 1.442695, %v1549_v10 }
 0x856   :  { %v1208_v47 = vadd.f32 1.0, %v1908_v28 }
 0x857   :  { %1921 = vpow2.f32 %v1203_v29 }
 0x858   :  { %1923 = vrcp.f32 %v1208_v47 }
 0x859   :  { %v1910_v50 = vpop.eup %1909 }
 0x85a   :  { %v1912_v52 = vpop.eup %1911  ;;  %v1207_v54 = vadd.f32 1.0, %v1910_v50 }
 0x85b   :  { %v1914_v56 = vpop.eup %1913  ;;  %v1209_v58 = vadd.f32 1.0, %v1912_v52 }
 0x85c   :  { %v1916_v59 = vpop.eup %1915  ;;  %1925 = vrcp.f32 %v1207_v54  ;;  %1239 = vrot.lane.b32.xlu1 %v1914_v56, %s1938_s19 }
 0x85d   :  { %v1918_v60 = vpop.eup %1917  ;;  %1237 = vrot.lane.b32.xlu0 %v1916_v59, %s1938_s19  ;;  %1927 = vrcp.f32 %v1209_v58 }
 0x85e   :  { %v1920_v61 = vpop.eup %1919  ;;  %v1210_v62 = vadd.f32 1.0, %v1918_v60 }
 0x85f   :  { %v1211_v1 = vadd.f32 1.0, %v1920_v61 }
 0x860   :  { %1929 = vrcp.f32 %v1210_v62 }
 0x861   :  { %v1922_v11 = vpop.eup %1921  ;;  %1931 = vrcp.f32 %v1211_v1 }
 0x862   :  { %v1924_v13 = vpop.eup %1923  ;;  %v1212_v14 = vadd.f32 1.0, %v1922_v11 }
 0x863   :  { %1243 = vrot.lane.b32.xlu1 %v1924_v13, %s1938_s19 }
 0x864   :  { %1933 = vrcp.f32 %v1212_v14 }
 0x866   :  { %v1926_v33 = vpop.eup %1925 }
 0x867   :  { %1241 = vrot.lane.b32.xlu0 %v1926_v33, %s1938_s19  ;;  %v1928_v34 = vpop.eup %1927 }
 0x86a   :  { %v1930_v15 = vpop.eup %1929 }
 0x86b   :  { %1247 = vrot.lane.b32.xlu1 %v1930_v15, %s1938_s19  ;;  %1245 = vrot.lane.b32.xlu0 %v1928_v34, %s1938_s19  ;;  %v1932_v16 = vpop.eup %1931 }
 0x86e   :  { %v1934_v38 = vpop.eup %1933 }
 0x86f   :  { %1251 = vrot.lane.b32.xlu1 %v1934_v38, %s1938_s19  ;;  %1249 = vrot.lane.b32.xlu0 %v1932_v16, %s1938_s19 }
 0x8ce   :  { %v1240_v35 = vpop.permute.xlu1 %1239 }
 0x8cf   :  { %v1238_v17 = vpop.permute.xlu0 %1237  ;;  %v1262_v39 = vmul.f32 %v1914_v56, %v1240_v35 }
 0x8d0   :  { %v1261_v19 = vmul.f32 %v1916_v59, %v1238_v17 }
 0x8d1   :  { %v1270_v24 = vsel %vm545_vm2, %v1262_v39, inf  ;;  %v1291_v46 = vsel %vm545_vm2, %v1262_v39, -inf }
 0x8d2   :  { %v1269_v8 = vsel %vm545_vm2, %v1261_v19, inf  ;;  %v1290_v57 = vsel %vm545_vm2, %v1261_v19, -inf }
 0x8d5   :  { %v1244_v18 = vpop.permute.xlu1 %1243 }
 0x8d6   :  { %v2419_v0 = vmul.f32 %v1924_v13, %v1244_v18 }
 0x8d8   :  { %v1272_v55 = vsel %vm545_vm2, %v2419_v0, inf  ;;  %v1293_v2 = vsel %vm545_vm2, %v2419_v0, -inf }
 0x8d9   :  { %v1242_v40 = vpop.permute.xlu0 %1241 }
 0x8da   :  { %v2421_v21 = vmul.f32 %v1926_v33, %v1242_v40 }
 0x8dc   :  { %v1271_v28 = vsel %vm545_vm2, %v2421_v21, inf  ;;  %v1292_v29 = vsel %vm545_vm2, %v2421_v21, -inf }
 0x8dd   :  { %v1248_v63 = vpop.permute.xlu1 %1247  ;;  %v1246_v20 = vpop.permute.xlu0 %1245 }
 0x8de   :  { %v2423_v22 = vmul.f32 %v1930_v15, %v1248_v63  ;;  %v2425_v23 = vmul.f32 %v1928_v34, %v1246_v20 }
 0x8e0   :  { %v1275_v5 = vsel %vm545_vm2, %v2423_v22, inf  ;;  %v1296_v6 = vsel %vm545_vm2, %v2423_v22, -inf  ;;  %v1273_v26 = vsel %vm545_vm2, %v2425_v23, inf  ;;  %v1294_v51 = vsel %vm545_vm2, %v2425_v23, -inf }
 0x8e1   :  { %v1252_v9 = vpop.permute.xlu1 %1251  ;;  %v1250_v10 = vpop.permute.xlu0 %1249  ;;  %v1276_v52 = vmin.f32 %v1270_v24, %v1275_v5  ;;  %v1297_v54 = vmax.f32 %v1291_v46, %v1296_v6  ;;  %v1274_v56 = vmin.f32 %v1269_v8, %v1273_v26  ;;  %v1295_v58 = vmax.f32 %v1290_v57, %v1294_v51 }
 0x8e2   :  { %v1268_v47 = vmul.f32 %v1934_v38, %v1252_v9  ;;  %v1267_v50 = vmul.f32 %v1932_v16, %v1250_v10 }
 0x8e3   :  { %v1281_v33 = vmin.f32 %v1274_v56, %v1276_v52  ;;  %v1302_v34 = vmax.f32 %v1295_v58, %v1297_v54 }
 0x8e4   :  { %v1279_v59 = vsel %vm545_vm2, %v1268_v47, inf  ;;  %v1300_v60 = vsel %vm545_vm2, %v1268_v47, -inf  ;;  %v1277_v61 = vsel %vm545_vm2, %v1267_v50, inf  ;;  %v1298_v62 = vsel %vm545_vm2, %v1267_v50, -inf }
 0x8e5   :  { %v1280_v1 = vmin.f32 %v1272_v55, %v1279_v59  ;;  %v1301_v11 = vmax.f32 %v1293_v2, %v1300_v60  ;;  %v1278_v13 = vmin.f32 %v1271_v28, %v1277_v61  ;;  %v1299_v14 = vmax.f32 %v1292_v29, %v1298_v62 }
 0x8e7   :  { %v1282_v15 = vmin.f32 %v1278_v13, %v1280_v1  ;;  %v1303_v16 = vmax.f32 %v1299_v14, %v1301_v11 }
 0x8e9   :  { %v1283_v38 = vmin.f32 %v1281_v33, %v1282_v15  ;;  %v1304_v35 = vmax.f32 %v1302_v34, %v1303_v16 }
 0x8eb   :  { %v1284_v17 = vrot.slane %v1283_v38, 4  ;;  %v1305_v18 = vrot.slane %v1304_v35, 4 }
 0x8ed   :  { %v1285_v40 = vmin.f32 %v1283_v38, %v1284_v17  ;;  %v1306_v63 = vmax.f32 %v1304_v35, %v1305_v18 }
 0x8ef   :  { %v1286_v20 = vrot.slane %v1285_v40, 2  ;;  %v1307_v24 = vrot.slane %v1306_v63, 2 }
 0x8f1   :  { %v1287_v46 = vmin.f32 %v1285_v40, %v1286_v20  ;;  %v1308_v5 = vmax.f32 %v1306_v63, %v1307_v24 }
 0x8f3   :  { %v1288_v6 = vrot.slane %v1287_v46, 1  ;;  %v1309_v26 = vrot.slane %v1308_v5, 1 }
 0x8f5   :  { %v1289_v51 = vmin.f32 %v1287_v46, %v1288_v6  ;;  %v1310_v8 = vmax.f32 %v1308_v5, %v1309_v26 }
 0x8f7   :  { %v1319_v57 = vsub.f32 %v1310_v8, %v1289_v51  ;;  %v1312_v2 = vsub.f32 %v1262_v39, %v1289_v51  ;;  %v1311_v9 = vsub.f32 %v1261_v19, %v1289_v51  ;;  %v1314_v52 = vsub.f32 %v2419_v0, %v1289_v51 }
 0x8f8   :  { %v1313_v54 = vsub.f32 %v2421_v21, %v1289_v51  ;;  %v1316_v59 = vsub.f32 %v2423_v22, %v1289_v51  ;;  %v1315_v60 = vsub.f32 %v2425_v23, %v1289_v51  ;;  %v1317_v19 = vsub.f32 %v1267_v50, %v1289_v51 }
 0x8f9   :  { %v1320_v55 = vmax.f32 %v1319_v57, 1e-06  ;;  %v1318_v62 = vsub.f32 %v1268_v47, %v1289_v51 }
 0x8fb   :  { %1935 = vrcp.f32 %v1320_v55 }
 0x905   :  { %v1936_v10 = vpop.eup %1935 }
 0x906   :  { %v1323_v28 = vmul.f32 %v1936_v10, %v1312_v2  ;;  %v1322_v29 = vmul.f32 %v1936_v10, %v1311_v9  ;;  %v1325_v56 = vmul.f32 %v1936_v10, %v1314_v52  ;;  %v1324_v58 = vmul.f32 %v1936_v10, %v1313_v54 }
 0x907   :  { %v1327_v61 = vmul.f32 %v1936_v10, %v1316_v59  ;;  %v1326_v39 = vmul.f32 %v1936_v10, %v1315_v60  ;;  %v1329_v1 = vmul.f32 %v1936_v10, %v1318_v62  ;;  %v1328_v11 = vmul.f32 %v1936_v10, %v1317_v19 }
 0x908   :  { %1359 = vperm.xlu1 %1804, %v1323_v28   ;;  %1354 = vperm.xlu0 %1803, %v1322_v29  }
 0x90c   :  { %1369 = vperm.xlu1 %1804, %v1325_v56   ;;  %1364 = vperm.xlu0 %1803, %v1324_v58  }
 0x910   :  { %1379 = vperm.xlu1 %1804, %v1327_v61   ;;  %1374 = vperm.xlu0 %1803, %v1326_v39  }
 0x914   :  { %1389 = vperm.xlu1 %1804, %v1329_v1   ;;  %1384 = vperm.xlu0 %1803, %v1328_v11  }
 0x987   :  { %v1360_v0 = vpop.permute.xlu1 %1359  ;;  %v1355_v21 = vpop.permute.xlu0 %1354 }
 0x988   :  { %v1393_v13 = vmul.f32 %v1360_v0, %v1345_v32  ;;  %v1392_v22 = vmul.f32 %v1355_v21, %v1344_v36 }
 0x98a   :  { %v1786_v23 = vpack.c.bf16 %v1393_v13, %v1392_v22 }
 0x98b   :  { %v1370_v14 = vpop.permute.xlu1 %1369  ;;  %v1365_v50 = vpop.permute.xlu0 %1364 }
 0x98c   :  { %v1395_v47 = vmul.f32 %v1370_v14, %v1347_v37  ;;  %v1394_v33 = vmul.f32 %v1365_v50, %v1346_v41  ;;  %1787 = vmatpush3.bf16.msra.mxu0 %v1786_v23 }
 0x98d   :  { %1788 = vmatprep.subr.bf16.mxu0 %v1940_v12 }
 0x98e   :  { %v1789_v45 = vpack.c.bf16 %v1395_v47, %v1394_v33 }
 0x98f   :  { %v1380_v32 = vpop.permute.xlu1 %1379  ;;  %v1375_v34 = vpop.permute.xlu0 %1374 }
 0x990   :  { %v1397_v3 = vmul.f32 %v1380_v32, %v1349_v42  ;;  %v1396_v36 = vmul.f32 %v1375_v34, %v1348_v43  ;;  %1790 = vmatpush3.bf16.msra.mxu0 %v1789_v45 }
 0x991   :  { %1791 = vmatprep.subr.bf16.mxu0 %v1940_v12 }
 0x992   :  { %v1792_v4 = vpack.c.bf16 %v1397_v3, %v1396_v36 }
 0x993   :  { %v1390_v49 = vpop.permute.xlu1 %1389  ;;  %v1385_v37 = vpop.permute.xlu0 %1384 }
 0x994   :  { %v1399_v41 = vmul.f32 %v1390_v49, %v1351_v44  ;;  %v1398_v15 = vmul.f32 %v1385_v37, %v1350_v31  ;;  %1793 = vmatpush3.bf16.msra.mxu0 %v1792_v4 }
 0x995   :  { %1794 = vmatprep.subr.bf16.mxu0 %v1940_v12 }
 0x996   :  { %v1795_v48 = vpack.c.bf16 %v1399_v41, %v1398_v15 }
 0x998   :  { %1796 = vmatpush3.bf16.msra.mxu0 %v1795_v48 }
 0x99b   :  { %1739 = vmatmul.mubr.msk.f32.vlgmr.msra.gmra.mrb[18].mxu0 %vm175_vm1, %v2240_v27 }
 0xa6e   :  { %v1466_v25 = vpop.f32.mrb[18].mxu0 }
 0xa6f   :  { %1471 = vst [vmem:[%s2492_s5 + $0x4] sm:$0x7] %v1466_v25  ;;  %v1740_v42 = vpop.f32.mrb[19].mxu0 }

// kernel: custom-call.22
= control target key start
LH: loop header
LB: loop body
LE: loop exit
PB: predicated region body
PF: predicated region fallthrough
CT: control target
= control target key end

     0   :  { %s1704_s30 = smov 0   ;;  %s1706_s10 = smov 0   ;;  %s2030_s0 = inlined_call_operand.vmem [shape: f32[2,2,2], index: 0, kind: input, shape index: {}]   ;;  %s2031_s1 = inlined_call_operand.vmem [shape: f32[2,2,2], index: 1, kind: input, shape index: {}]   ;;  %s2032_s2 = inlined_call_operand.vmem [shape: f32[2,2,2], index: 2, kind: input, shape index: {}]   ;;  %s2033_s3 = inlined_call_operand.vmem [shape: f32[2,2,2], index: 3, kind: input, shape index: {}]   ;;  %s2034_s4 = inlined_call_operand.vmem [shape: f32[2,2], index: 4, kind: output, shape index: {0}]   ;;  %s2035_s5 = inlined_call_operand.vmem [shape: f32[2,2], index: 5, kind: output, shape index: {1}]   ;;  %s2036_s6 = inlined_call_operand.vmem [shape: f32[2,2,2], index: 6, kind: output, shape index: {2}]   ;;  %s2037_s7 = inlined_call_operand.vmem [shape: f32[2,2,2], index: 7, kind: output, shape index: {3}]   ;;  %s2038_s8 = inlined_call_operand.vmem [shape: f32[2,2,2], index: 8, kind: output, shape index: {4}]   ;;  %s2039_s9 = inlined_call_operand.vmem [shape: f32[2,2,2], index: 9, kind: output, shape index: {5}]  }
   0x1   :  { %s1708_s11 = smov 0  }
   0x2 LB: > { %s1720_s12 = sadd.s32 4294967295, %s1641_s11   ;;  %s1723_s13 = sadd.s32 1, %s1641_s11   ;;  %s1641_s11 = sphi %s1708_s11, %s2058_s11   ;;  %s1637_s10 = sphi %s1706_s10, %s2057_s10   ;;  %s1633_s30 = sphi %s1704_s30, %s2056_s30  }
   0x3   : > { %s20_s14 = sshrl.u32 %s1641_s11, 3  ;;  %s21_s15 = sshrl.u32 %s1723_s13, 3 }
   0x4   : > { %s22_s16 = ssub.s32 %s20_s14, %s21_s15  ;;  %s25_s17 = sadd.s32 1, %s1637_s10 }
   0x5   : > { %p23_p0 = scmp.eq.s32.totalorder %s22_s16, 0  ;;  %p35_p1 = scmp.ne.s32.totalorder %s1637_s10, %s1633_s30 }
   0x6   : > { %p36_p2 = scmp.eq.s32.totalorder %s1720_s12, 1  ;;  %p1502_p4 = scmp.ge.s32.totalorder %s1641_s11, 2 }
   0x7   : > { %s1732_s18 = scalar_select %p23_p0, %s1637_s10, %s25_s17  }
   0x8   : > { %p1734_p3 = por %p36_p2, %p35_p1  ;;  %86 = sbr.rel (%p1502_p4) target bundleno = 17 (0x11), region = 16 }
   0x9   : > { %2040 = sst [smem:[#allocation33_spill]] %s1732_s18  ;;  %s88_s20 = sand.u32 (!%p1502_p4), 1, %s1641_s11  }
   0xa   : > { %s1504_s21 = sshll.u32 (!%p1502_p4), %s1641_s11, 1  ;;  %s1503_s22 = sshll.u32 (!%p1502_p4), %s88_s20, 1 }
   0xb   : > { %s92_s25 = scalar_lea.vmem (!%p1502_p4), %s2030_s0, %s1504_s21  ;;  %s90_s26 = scalar_lea.vmem (!%p1502_p4), [#allocation1], %s1503_s22 }
   0xc   : > { %v108_v0 = vld [vmem:[%s92_s25] sm:$0x3] (!%p1502_p4)  ;;  %s129_s29 = scalar_lea.vmem (!%p1502_p4), %s2031_s1, %s1504_s21  ;;  %s166_s16 = scalar_lea.vmem (!%p1502_p4), %s2032_s2, %s1504_s21 }
   0xd   : > { %109 = vst [vmem:[%s90_s26] sm:$0x3] (!%p1502_p4), %v108_v0  ;;  %v145_v1 = vld [vmem:[%s129_s29] sm:$0x3] (!%p1502_p4)  ;;  %s127_s17 = scalar_lea.vmem (!%p1502_p4), [#allocation3], %s1503_s22  ;;  %s203_s23 = scalar_lea.vmem (!%p1502_p4), %s2033_s3, %s1504_s21 }
   0xe   : > { %146 = vst [vmem:[%s127_s17] sm:$0x3] (!%p1502_p4), %v145_v1  ;;  %v182_v2 = vld [vmem:[%s166_s16] sm:$0x3] (!%p1502_p4)  ;;  %s164_s24 = scalar_lea.vmem (!%p1502_p4), [#allocation5], %s1503_s22  ;;  %s201_s25 = scalar_lea.vmem (!%p1502_p4), [#allocation7], %s1503_s22 }
   0xf   : > { %183 = vst [vmem:[%s164_s24] sm:$0x3] %v182_v2  ;;  %v219_v3 = vld [vmem:[%s203_s23] sm:$0x3] }
  0x10   : > { %220 = vst [vmem:[%s201_s25] sm:$0x3] %v219_v3 }
  0x11 PF: > { %p1511_p5 = scmp.ge.s32.totalorder %s1641_s11, 1  ;;  %p236_p6 = scmp.lt.s32.totalorder %s1641_s11, 3 }
  0x13   : > { %p237_p7 = pnand %p1511_p5, %p236_p6 }
  0x15   : > { %240 = sbr.rel (%p237_p7) target bundleno = 999 (0x3e7), region = 140 }
  0x1c   : > { %s259_s26 = sand.u32 1, %s1720_s12   ;;  %s277_s27 = sand.u32 1, %s1633_s30   ;;  %v337_v4 = vlaneseq  ;;  %v1651_v5 = vmov 0.0  }
  0x1d   : > { %s1757_s28 = sshll.u32 %s259_s26, 1  ;;  %s1759_s18 = sshll.u32 %s277_s27, 1  ;;  %332 = vst [vmem:[#allocation12] sm:$0xff] %v1651_v5  ;;  %333 = vst [vmem:[#allocation14] sm:$0xff] %v1651_v5 }
  0x1e   : > { %334 = vst [vmem:[#allocation16] sm:$0xff] %v1651_v5  ;;  %335 = vst [vmem:[#allocation18] sm:$0xff] %v1651_v5  ;;  %v1761_v6 = vand.u32 127, %v337_v4  ;;  %v1763_v7 = vshrl.u32 %v337_v4, 7  ;;  %s261_s11 = scalar_lea.vmem [#allocation1], %s1757_s28  ;;  %s265_s30 = scalar_lea.vmem [#allocation3], %s1757_s28 }
  0x1f   : > { %v304_v8 = vld [vmem:[%s261_s11] sm:$0x3]  ;;  %v308_v9 = vld [vmem:[%s265_s30] sm:$0x3]  ;;  %s269_s21 = scalar_lea.vmem [#allocation5], %s1757_s28  ;;  %s273_s22 = scalar_lea.vmem [#allocation7], %s1757_s28 }
  0x20   : > { %305 = vst [vmem:[#allocation0] sm:$0x3] %v304_v8  ;;  %309 = vst [vmem:[#allocation2] sm:$0x3] %v308_v9  ;;  %v312_v10 = vld [vmem:[%s269_s21] sm:$0x3]  ;;  %v339_v6 = vmov %v1761_v6  ;;  %v342_v7 = vmov %v1763_v7 }
  0x21   : > { %v316_v11 = vld [vmem:[%s273_s22] sm:$0x3]  ;;  %313 = vst [vmem:[#allocation4] sm:$0x3] %v312_v10  ;;  %v352_v6 = vmov %v1761_v6  ;;  %v355_v7 = vmov %v1763_v7  ;;  %s320_s29 = smov [#allocation20]  ;;  %s323_s14 = smov [#allocation21]  ;;  %vm346_vm0 = vcmp.eq.s32.totalorder %v342_v7, %v339_v6 }
  0x22   : > { %317 = vst [vmem:[#allocation6] sm:$0x3] %v316_v11  ;;  %vm359_vm1 = vcmp.eq.s32.totalorder %v355_v7, %v352_v6  ;;  %s336_s15 = smov [#allocation12]  ;;  %s349_s16 = smov [#allocation18]  ;;  %vm1391_vm2 = vcmp.lt.s32.totalorder %v1761_v6, 2  ;;  %v1383_v6 = vmov %v1761_v6  ;;  %v1386_v7 = vmov %v1763_v7 }
  0x23   : > { %s326_s17 = smov [#allocation22]  ;;  %s329_s20 = smov [#allocation23]  ;;  %vm1396_vm3 = vcmp.eq.s32.totalorder %v1386_v7, %v1383_v6  ;;  %v1434_v6 = vmov %v1761_v6  ;;  %v1403_v7 = vmov %v1763_v7 }
  0x24   : > { %v343_v12 = vld [vmem:[%s336_s15] sm:$0x3]  ;;  %s1387_s30 = smov [#allocation20]  ;;  %s1404_s21 = smov [#allocation21]  ;;  %v1400_v6 = vmov %v1761_v6  ;;  %v1437_v7 = vmov %v1763_v7 }
  0x25   : > { %v356_v13 = vld [vmem:[%s349_s16] sm:$0x3]  ;;  %v347_v16 = vsel %vm346_vm0, 1.0, %v343_v12  ;;  %s1421_s22 = smov [#allocation22]  ;;  %v1417_v6 = vmov %v1761_v6  ;;  %v1420_v7 = vmov %v1763_v7  ;;  %vm1447_vm4 = vcmp.eq.s32.totalorder %v1437_v7, %v1434_v6 }
  0x26   : > { %v360_v17 = vsel %vm359_vm1, 1.0, %v356_v13  ;;  %348 = vst [vmem:[%s336_s15] sm:$0x3] %v347_v16 }
  0x27   : > { %v321_v14 = vld [vmem:[#allocation0] sm:$0xff]  ;;  %v324_v15 = vld [vmem:[#allocation2] sm:$0xff]  ;;  %361 = vst [vmem:[%s349_s16] sm:$0x3] %v360_v17 }
  0x28   : > { %322 = vst [vmem:[%s320_s29] sm:$0xff] %v321_v14  ;;  %325 = vst [vmem:[%s323_s14] sm:$0xff] %v324_v15  ;;  %v327_v18 = vld [vmem:[#allocation4] sm:$0xff]  ;;  %s1438_s29 = smov [#allocation23] }
  0x29   : > { %v330_v19 = vld [vmem:[#allocation6] sm:$0xff]  ;;  %328 = vst [vmem:[%s326_s17] sm:$0xff] %v327_v18 }
  0x2a   : > { %331 = vst [vmem:[%s329_s20] sm:$0xff] %v330_v19 }
  0x2f   : > { %v1393_v20 = vld [vmem:[%s1387_s30] sm:$0x3] }
  0x30   : > { %v1410_v21 = vld [vmem:[%s1404_s21] sm:$0x3]  ;;  %v1394_v22 = vsel %vm1391_vm2, %v1393_v20, 0.0 }
  0x31   : > { %v1411_v23 = vsel %vm1391_vm2, %v1410_v21, 0.0  ;;  %v1427_v24 = vld [vmem:[%s1421_s22] sm:$0x3]  ;;  %v1395_v26 = vmul.f32 %v1394_v22, %v1394_v22 }
  0x32   : > { %v1444_v25 = vld [vmem:[%s1438_s29] sm:$0x3]  ;;  %v1412_v27 = vmul.f32 %v1411_v23, %v1411_v23  ;;  %v1428_v28 = vsel %vm1391_vm2, %v1427_v24, 0.0 }
  0x33   : > { %v1445_v29 = vsel %vm1391_vm2, %v1444_v25, 0.0  ;;  %v1429_v30 = vmul.f32 %v1428_v28, %v1428_v28  ;;  %v1397_v33 = vsel %vm1396_vm3, 0.0, %v1395_v26 }
  0x34   : > { %v1414_v31 = vadd.f32 %v1412_v27, %v1395_v26  ;;  %v1446_v32 = vmul.f32 %v1445_v29, %v1445_v29  ;;  %v1413_v34 = vadd.f32 %v1412_v27, %v1397_v33 }
  0x36   : > { %v1431_v35 = vadd.f32 %v1429_v30, %v1414_v31  ;;  %v1430_v36 = vadd.f32 %v1429_v30, %v1413_v34  ;;  %v1448_v37 = vsel %vm1447_vm4, 0.0, %v1446_v32 }
  0x38   : > { %v1450_v38 = vadd.f32 %v1446_v32, %v1431_v35  ;;  %v1449_v39 = vadd.f32 %v1448_v37, %v1430_v36 }
  0x3a   : > { %1451 = vadd.xlane.f32.xlu0 %v1450_v38 }
  0x3e   : > { %1459 = vadd.xlane.f32.xlu0 %v1449_v39 }
  0xc7   : > { %v1452_v40 = vpop.xlane.xlu0 %1451 }
  0xc8   : > { %v1453_v41 = vrot.slane %v1452_v40, 4 }
  0xca   : > { %v1454_v42 = vadd.f32 %v1453_v41, %v1452_v40 }
  0xcb   : > { %v1460_v43 = vpop.xlane.xlu0 %1459 }
  0xcc   : > { %v1455_v44 = vrot.slane %v1454_v42, 2  ;;  %v1461_v45 = vrot.slane %v1460_v43, 4 }
  0xce   : > { %v1462_v46 = vadd.f32 %v1461_v45, %v1460_v43  ;;  %v1456_v47 = vadd.f32 %v1455_v44, %v1454_v42 }
  0xd0   : > { %v1463_v48 = vrot.slane %v1462_v46, 2  ;;  %v1457_v50 = vrot.slane %v1456_v47, 1 }
  0xd2   : > { %v1464_v49 = vadd.f32 %v1463_v48, %v1462_v46  ;;  %v1458_v53 = vadd.f32 %v1457_v50, %v1456_v47 }
  0xd4   : > { %v1465_v51 = vrot.slane %v1464_v49, 1 }
  0xd6   : > { %v1466_v52 = vadd.f32 %v1465_v51, %v1464_v49 }
  0xd8   : > { %1552 = vpush %v1466_v52 }
  0xd9   : > { %1554 = vpush %v1458_v53 }
 0x109   : > { %s1553_s14 = spop %1552 }
 0x10a   : > { %s1555_s15 = spop %1554 }
 0x10b   : > { %s1469_s16 = smul.f32 1e-10, %s1555_s15 }
 0x10d   : > { %p1470_p8 = scmp.le.f32.partialorder %s1553_s14, %s1469_s16 }
 0x10e   : > { %s1797_s17 = smov (!%p1470_p8), 0  }
 0x10f   : > { %1473 = sbr.rel (%p1470_p8) target bundleno = 953 (0x3b9), region = 467 }
 0x116 LB: >> { %s1802_s20 = smov 0   ;;  %s1645_s17 = sphi %s1797_s17, %s2042_s17  }
 0x117 LB: >>> { %s466_s30 = smov [#allocation20]  ;;  %v470_v6 = vmov %v1761_v6  ;;  %v473_v7 = vmov %v1763_v7  ;;  %s486_s21 = smov [#allocation21]  ;;  %vm789_vm14 = vcmp.eq.s32.totalorder %v1763_v7, 0  ;;  %vm801_vm15 = vcmp.eq.s32.totalorder %v1763_v7, 1  ;;  %s1649_s20 = sphi %s1802_s20, %s465_s20  }
 0x118   : >>> { %v490_v6 = vmov %v1761_v6  ;;  %v493_v7 = vmov %v1763_v7  ;;  %v474_v54 = vld [vmem:[%s466_s30] sm:$0x3]  ;;  %vm477_vm5 = vcmp.eq.s32.totalorder %v473_v7, %v470_v6  ;;  %s506_s22 = smov [#allocation23]  ;;  %s467_s29 = smov [#allocation24] }
 0x119   : >>> { %vm497_vm6 = vcmp.eq.s32.totalorder %v493_v7, %v490_v6  ;;  %v510_v6 = vmov %v1761_v6  ;;  %v513_v7 = vmov %v1763_v7  ;;  %v478_v55 = vsel %vm477_vm5, %v474_v54, 0.0  ;;  %v494_v56 = vld [vmem:[%s486_s21] sm:$0x3]  ;;  %s487_s14 = smov [#allocation25]  ;;  %s507_s15 = smov [#allocation26] }
 0x11a   : >>> { %vm517_vm7 = vcmp.eq.s32.totalorder %v513_v7, %v510_v6  ;;  %v479_v57 = vrot.slane %v478_v55, 4  ;;  %v498_v58 = vsel %vm497_vm6, %v494_v56, 0.0  ;;  %v514_v59 = vld [vmem:[%s506_s22] sm:$0x3]  ;;  %s530_s16 = smov [#allocation25]  ;;  %s528_s30 = smov [#allocation24]  ;;  %v579_v6 = vmov %v1761_v6 }
 0x11b   : >>> { %v499_v60 = vrot.slane %v498_v58, 4  ;;  %v518_v61 = vsel %vm517_vm7, %v514_v59, 0.0  ;;  %s532_s21 = smov [#allocation26]  ;;  %s567_s22 = smov [#allocation27]  ;;  %v582_v7 = vmov %v1763_v7  ;;  %v594_v6 = vmov %v1761_v6 }
 0x11c   : >>> { %v480_v62 = vadd.f32 %v479_v57, %v478_v55  ;;  %v519_v63 = vrot.slane %v518_v61, 4  ;;  %v597_v7 = vmov %v1763_v7  ;;  %vm584_vm12 = vcmp.eq.s32.totalorder %v582_v7, %v579_v6  ;;  %s1821_s24 = smov [#allocation22]  ;;  %s1827_s23 = smov [#allocation14] }
 0x11d   : >>> { %v500_v0 = vadd.f32 %v499_v60, %v498_v58  ;;  %vm599_vm13 = vcmp.eq.s32.totalorder %v597_v7, %v594_v6  ;;  %s829_s11 = smov [#allocation31]  ;;  %s1833_s27 = smov [#allocation18]  ;;  %v615_v55 = vld [vmem:[%s1821_s24] sm:$0x3]  ;;  %v692_v6 = vmov %v1761_v6  ;;  %v695_v7 = vmov %v1763_v7 }
 0x11e   : >>> { %v481_v1 = vrot.slane %v480_v62, 2  ;;  %v520_v2 = vadd.f32 %v519_v63, %v518_v61  ;;  %v838_v58 = vld [vmem:[%s1827_s23] sm:$0x3]  ;;  %s607_s26 = smov [#allocation32]  ;;  %s831_s25 = smov [#allocation32]  ;;  %v706_v6 = vmov %v1761_v6  ;;  %v709_v7 = vmov %v1763_v7 }
 0x11f   : >>> { %v501_v3 = vrot.slane %v500_v0, 2  ;;  %v840_v61 = vld [vmem:[%s1833_s27] sm:$0x3]  ;;  %vm699_vm0 = vcmp.eq.s32.totalorder %v695_v7, %v692_v6  ;;  %v665_v6 = vmov %v1761_v6  ;;  %v668_v7 = vmov %v1763_v7  ;;  %s465_s20 = sadd.s32 1, %s1649_s20  }
 0x120   : >>> { %v482_v4 = vadd.f32 %v481_v1, %v480_v62  ;;  %v521_v5 = vrot.slane %v520_v2, 2  ;;  %v679_v6 = vmov %v1761_v6  ;;  %v682_v7 = vmov %v1763_v7  ;;  %p462_p9 = scmp.ge.s32.totalorder %s465_s20, 3  }
 0x121   : >>> { %v502_v8 = vadd.f32 %v501_v3, %v500_v0  ;;  %vm714_vm1 = vcmp.eq.s32.totalorder %v709_v7, %v706_v6  ;;  %vm673_vm3 = vcmp.eq.s32.totalorder %v668_v7, %v665_v6  ;;  %vm686_vm4 = vcmp.eq.s32.totalorder %v682_v7, %v679_v6 }
 0x122   : >>> { %v483_v9 = vrot.slane %v482_v4, 1  ;;  %v522_v10 = vadd.f32 %v521_v5, %v520_v2  ;;  %vm728_vm5 = vcmp.eq.s32.totalorder %v1761_v6, 0  ;;  %vm732_vm6 = vcmp.eq.s32.totalorder %v1761_v6, 1 }
 0x123   : >>> { %v503_v11 = vrot.slane %v502_v8, 1  ;;  %v366_v6 = vmov (%p462_p9), %v1761_v6  ;;  %v369_v7 = vmov (%p462_p9), %v1763_v7 }
 0x124   : >>> { %v484_v12 = vadd.f32 %v483_v9, %v482_v4  ;;  %v523_v13 = vrot.slane %v522_v10, 1  ;;  %v419_v6 = vmov (%p462_p9), %v1761_v6  ;;  %vm381_vm7 = vcmp.eq.s32.totalorder (%p462_p9), %v369_v7, %v366_v6 }
 0x125   : >>> { %v504_v14 = vadd.f32 %v503_v11, %v502_v8  ;;  %v422_v7 = vmov (%p462_p9), %v1763_v7  ;;  %v385_v6 = vmov (%p462_p9), %v1761_v6 }
 0x126   : >>> { %485 = vst [vmem:[%s467_s29] sm:$0x1] %v484_v12  ;;  %v524_v15 = vadd.f32 %v523_v13, %v522_v10  ;;  %s569_s29 = smov [#allocation28]  ;;  %v388_v7 = vmov (%p462_p9), %v1763_v7  ;;  %v402_v6 = vmov (%p462_p9), %v1761_v6 }
 0x127   : >>> { %505 = vst [vmem:[%s487_s14] sm:$0x1] %v504_v14  ;;  %s526_s14 = smov [#allocation29]  ;;  %v405_v7 = vmov (%p462_p9), %v1763_v7 }
 0x128   : >>> { %525 = vst [vmem:[%s507_s15] sm:$0x1] %v524_v15  ;;  %s527_s15 = smov [#allocation30]  ;;  %s571_s14 = smov %s526_s14 }
 0x129   : >>> { %s573_s15 = smov %s527_s15 }
 0x12d   : >>> { %v529_v18 = vld [vmem:[%s528_s30] sm:$0xff]  ;;  %s590_s30 = smov [#allocation30] }
 0x12e   : >>> { %v531_v16 = vld [vmem:[%s530_s16] sm:$0xff]  ;;  %v552_v31 = vand.u32 2147483647, %v529_v18  ;;  %s575_s16 = smov [#allocation29] }
 0x12f   : >>> { %v535_v17 = vmul.f32 2.0, %v531_v16  ;;  %v533_v19 = vld [vmem:[%s532_s21] sm:$0xff]  ;;  %v553_v36 = vand.u32 2147483647, %v531_v16  ;;  %s588_s21 = smov [#allocation31] }
 0x130   : >>> { %v534_v20 = vsub.f32 %v533_v19, %v529_v18  ;;  %v554_v32 = vand.u32 2147483647, %v533_v19 }
 0x131   : >>> { %1603 = vrcp.f32 %v535_v17 }
 0x132   : >>> { %v555_v35 = vmin.f32 %v552_v31, %v554_v32 }
 0x134   : >>> { %v556_v37 = vmul.f32 1.1920929e-08, %v555_v35 }
 0x136   : >>> { %vm557_vm11 = vcmp.le.f32.partialorder %v553_v36, %v556_v37 }
 0x13b   : >>> { %v1604_v21 = vpop.eup %1603 }
 0x13c   : >>> { %v537_v22 = vmul.f32 %v1604_v21, %v534_v20 }
 0x13e   : >>> { %v539_v23 = vmul.f32 %v537_v22, %v537_v22  ;;  %vm538_vm10 = vcmp.ge.f32.partialorder %v537_v22, 0.0 }
 0x140   : >>> { %v540_v24 = vadd.f32 1.0, %v539_v23 }
 0x142   : >>> { %1605 = vrsqrt.f32 %v540_v24  ;;  %vm543_vm8 = vcmp.eq.f32.partialorder %v540_v24, inf  ;;  %v546_v26 = vand.u32 2147483648, %v540_v24  ;;  %vm545_vm9 = vcmp.eq.f32.partialorder %v540_v24, 0.0 }
 0x14c   : >>> { %v1606_v25 = vpop.eup %1605 }
 0x14d   : >>> { %v542_v27 = vmul.f32 %v1606_v25, %v540_v24 }
 0x14f   : >>> { %v544_v28 = vsel %vm543_vm8, %v540_v24, %v542_v27  ;;  %vm434_vm8 = vcmp.eq.s32.totalorder (%p462_p9), %v422_v7, %v419_v6 }
 0x150   : >>> { %v547_v29 = vsel %vm545_vm9, %v546_v26, %v544_v28 }
 0x151   : >>> { %v548_v30 = vxor.u32 2147483648, %v547_v29 }
 0x153   : >>> { %v549_v33 = vsel %vm538_vm10, %v547_v29, %v548_v30 }
 0x154   : >>> { %v550_v34 = vadd.f32 %v549_v33, %v537_v22 }
 0x156   : >>> { %1607 = vrcp.f32 %v550_v34 }
 0x160   : >>> { %v1608_v38 = vpop.eup %1607 }
 0x161   : >>> { %v558_v39 = vsel %vm557_vm11, 0.0, %v1608_v38 }
 0x162   : >>> { %v559_v40 = vmul.f32 %v558_v39, %v558_v39  ;;  %v563_v41 = vmul.f32 %v558_v39, %v531_v16 }
 0x164   : >>> { %v560_v42 = vadd.f32 1.0, %v559_v40  ;;  %v564_v43 = vsub.f32 %v529_v18, %v563_v41  ;;  %v566_v44 = vadd.f32 %v563_v41, %v533_v19 }
 0x166   : >>> { %1609 = vrsqrt.f32 %v560_v42  ;;  %568 = vst [vmem:[%s567_s22] sm:$0xff] %v564_v43  ;;  %570 = vst [vmem:[%s569_s29] sm:$0xff] %v566_v44  ;;  %s605_s22 = smov [#allocation31]  ;;  %s1817_s29 = smov [#allocation20] }
 0x167   : >>> { %v613_v53 = vld [vmem:[%s1817_s29] sm:$0x3] }
 0x170   : >>> { %v1610_v45 = vpop.eup %1609 }
 0x171   : >>> { %572 = vst [vmem:[%s571_s14] sm:$0xff] %v1610_v45  ;;  %v562_v46 = vmul.f32 %v1610_v45, %v558_v39  ;;  %s603_s14 = smov [#allocation32] }
 0x173   : >>> { %574 = vst [vmem:[%s573_s15] sm:$0xff] %v562_v46  ;;  %s1819_s15 = smov [#allocation21] }
 0x174   : >>> { %v614_v54 = vld [vmem:[%s1819_s15] sm:$0x3] }
 0x178   : >>> { %v576_v47 = vld [vmem:[%s575_s16] ss:$0 sm:$0xff]  ;;  %s1823_s16 = smov [#allocation23] }
 0x179   : >>> { %v585_v48 = vsel %vm584_vm12, %v576_v47, 0.0  ;;  %v616_v56 = vld [vmem:[%s1823_s16] sm:$0x3] }
 0x17a   : >>> { %586 = vadd.xlane.f32.xlu0 %v585_v48  ;;  %v591_v49 = vld [vmem:[%s590_s30] ss:$0 sm:$0xff]  ;;  %s1825_s30 = smov [#allocation12] }
 0x17b   : >>> { %v600_v50 = vsel %vm599_vm13, %v591_v49, 0.0  ;;  %v837_v57 = vld [vmem:[%s1825_s30] sm:$0x3] }
 0x17e   : >>> { %601 = vadd.xlane.f32.xlu0 %v600_v50 }
 0x207   : >>> { %v587_v51 = vpop.xlane.xlu0 %586 }
 0x208   : >>> { %589 = vst [vmem:[%s588_s21] sm:$0xff] %v587_v51  ;;  %s1829_s21 = smov [#allocation16] }
 0x209   : >>> { %v839_v59 = vld [vmem:[%s1829_s21] sm:$0x3] }
 0x20b   : >>> { %v602_v52 = vpop.xlane.xlu0 %601 }
 0x20c   : >>> { %604 = vst [vmem:[%s603_s14] sm:$0xff] %v602_v52  ;;  %s1853_s14 = smov [#allocation23] }
 0x20f   : >>> { %v606_v60 = vld [vmem:[%s605_s22] sm:$0xff]  ;;  %s1851_s22 = smov [#allocation22] }
 0x210   : >>> { %v830_v62 = vld [vmem:[%s829_s11] sm:$0xff]  ;;  %v617_v63 = vmul.f32 %v613_v53, %v606_v60  ;;  %v620_v0 = vmul.f32 %v614_v54, %v606_v60  ;;  %v624_v1 = vmul.f32 %v615_v55, %v606_v60  ;;  %v627_v2 = vmul.f32 %v616_v56, %v606_v60  ;;  %s1849_s11 = smov [#allocation12] }
 0x211   : >>> { %v841_v3 = vmul.f32 %v837_v57, %v830_v62  ;;  %v844_v4 = vmul.f32 %v838_v58, %v830_v62  ;;  %v848_v5 = vmul.f32 %v839_v59, %v830_v62  ;;  %v851_v8 = vmul.f32 %v840_v61, %v830_v62 }
 0x213   : >>> { %v608_v9 = vld [vmem:[%s607_s26] sm:$0xff]  ;;  %s635_s26 = smov [#allocation30] }
 0x214   : >>> { %v832_v10 = vld [vmem:[%s831_s25] sm:$0xff]  ;;  %v618_v11 = vmul.f32 %v615_v55, %v608_v9  ;;  %v621_v12 = vmul.f32 %v616_v56, %v608_v9  ;;  %v623_v13 = vmul.f32 %v613_v53, %v608_v9  ;;  %v626_v14 = vmul.f32 %v614_v54, %v608_v9  ;;  %s633_s25 = smov [#allocation29] }
 0x215   : >>> { %v842_v15 = vmul.f32 %v839_v59, %v832_v10  ;;  %v845_v16 = vmul.f32 %v840_v61, %v832_v10  ;;  %v847_v17 = vmul.f32 %v837_v57, %v832_v10  ;;  %v850_v18 = vmul.f32 %v838_v58, %v832_v10  ;;  %v634_v27 = vld [vmem:[%s633_s25] ss:$0 sm:$0xff]  ;;  %s662_s25 = smov [#allocation27] }
 0x216   : >>> { %v619_v19 = vsub.f32 %v617_v63, %v618_v11  ;;  %v622_v20 = vsub.f32 %v620_v0, %v621_v12  ;;  %v625_v21 = vadd.f32 %v624_v1, %v623_v13  ;;  %v628_v22 = vadd.f32 %v627_v2, %v626_v14  ;;  %v636_v28 = vld [vmem:[%s635_s26] ss:$0 sm:$0xff]  ;;  %s661_s26 = smov [#allocation20] }
 0x217   : >>> { %v843_v23 = vsub.f32 %v841_v3, %v842_v15  ;;  %v846_v24 = vsub.f32 %v844_v4, %v845_v16  ;;  %v849_v25 = vadd.f32 %v848_v5, %v847_v17  ;;  %v852_v26 = vadd.f32 %v851_v8, %v850_v18  ;;  %v669_v63 = vld [vmem:[%s662_s25] ss:$0 sm:$0xff]  ;;  %s905_s25 = sadd.s32 (%p462_p9), 1, %s1645_s17  }
 0x218   : >>> { %630 = vst [vmem:[%s1819_s15] sm:$0x3] %v622_v20  ;;  %632 = vst [vmem:[%s1823_s16] sm:$0x3] %v628_v22  ;;  %s1855_s15 = smov [#allocation20]  ;;  %s703_s16 = smov [#allocation28] }
 0x219   : >>> { %629 = vst [vmem:[%s1817_s29] sm:$0x3] %v619_v19  ;;  %631 = vst [vmem:[%s1821_s24] sm:$0x3] %v625_v21  ;;  %s1857_s24 = smov [#allocation16]  ;;  %s1865_s29 = smov [#allocation21]  ;;  %v710_v59 = vld [vmem:[%s703_s16] ss:$0 sm:$0xff] }
 0x21a   : >>> { %853 = vst [vmem:[%s1825_s30] sm:$0x3] %v843_v23  ;;  %854 = vst [vmem:[%s1827_s23] sm:$0x3] %v846_v24  ;;  %s1859_s23 = smov [#allocation14]  ;;  %s689_s30 = smov [#allocation22] }
 0x21b   : >>> { %855 = vst [vmem:[%s1829_s21] sm:$0x3] %v849_v25  ;;  %856 = vst [vmem:[%s1833_s27] sm:$0x3] %v852_v26  ;;  %s1863_s27 = smov [#allocation18]  ;;  %s702_s21 = smov [#allocation23] }
 0x21c   : >>> { %s805_s16 = smov [#allocation21]  ;;  %p458_p10 = scmp.ge.s32.totalorder (%p462_p9), %s905_s25, 15 }
 0x21d   : >> { %s2042_s17 = smov (%p462_p9), %s905_s25 }
 0x21f   : >>> { %v644_v30 = vld [vmem:[%s1853_s14] sm:$0x3] }
 0x220   : >>> { %v643_v29 = vld [vmem:[%s1851_s22] sm:$0x3]  ;;  %v652_v36 = vmul.f32 %v644_v30, %v636_v28  ;;  %v655_v42 = vmul.f32 %v644_v30, %v634_v27 }
 0x221   : >>> { %v641_v31 = vld [vmem:[%s1855_s15] sm:$0x3]  ;;  %v651_v35 = vmul.f32 %v643_v29, %v634_v27  ;;  %v654_v37 = vmul.f32 %v643_v29, %v636_v28 }
 0x222   : >>> { %v859_v32 = vld [vmem:[%s1849_s11] ss:$0 sm:$0xff]  ;;  %v1531_v34 = vld [vmem:[%s1849_s11 + $0x1] ss:$0 sm:$0xff]  ;;  %v645_v48 = vmul.f32 %v641_v31, %v634_v27  ;;  %v648_v49 = vmul.f32 %v641_v31, %v636_v28 }
 0x223   : >>> { %v1530_v33 = vld [vmem:[%s1849_s11 - $0x1] sm:$0x2]  ;;  %v1533_v40 = vld [vmem:[%s1857_s24 + $0x1] sm:$0x1]  ;;  %v653_v47 = vsub.f32 %v651_v35, %v652_v36  ;;  %v656_v53 = vadd.f32 %v655_v42, %v654_v37 }
 0x224   : >>> { %v866_v38 = vsel %vm789_vm14, %v859_v32, %v1530_v33  ;;  %v870_v39 = vld [vmem:[%s1857_s24] ss:$0 sm:$0xff]  ;;  %v878_v43 = vsel %vm801_vm15, %v1531_v34, %v1533_v40  ;;  %v1535_v45 = vld [vmem:[%s1859_s23 + $0x1] ss:$0 sm:$0xff] }
 0x225   : >>> { %v883_v41 = vld [vmem:[%s1859_s23] ss:$0 sm:$0xff]  ;;  %869 = vst [vmem:[%s1849_s11] sm:$0x3] %v866_v38  ;;  %880 = vst [vmem:[%s1857_s24] sm:$0x3] %v878_v43  ;;  %v1537_v51 = vld [vmem:[%s1863_s27 + $0x1] sm:$0x1] }
 0x226   : >>> { %v1534_v44 = vld [vmem:[%s1859_s23 - $0x1] sm:$0x2]  ;;  %1532 = vst [vmem:[%s1849_s11 + $0x1] sm:$0x1] %v870_v39  ;;  %v902_v54 = vsel %vm801_vm15, %v1535_v45, %v1537_v51  ;;  %659 = vst [vmem:[%s1851_s22] sm:$0x3] %v653_v47  ;;  %s676_s11 = smov [#allocation21] }
 0x227   : >>> { %v894_v46 = vld [vmem:[%s1863_s27] ss:$0 sm:$0xff]  ;;  %v890_v50 = vsel %vm789_vm14, %v883_v41, %v1534_v44  ;;  %660 = vst [vmem:[%s1853_s14] sm:$0x3] %v656_v53  ;;  %s1907_s22 = smov [#allocation22]  ;;  %s1652_s14 = smov 1  }
 0x228   : >>> { %v642_v52 = vld [vmem:[%s1865_s29] sm:$0x3]  ;;  %893 = vst [vmem:[%s1859_s23] sm:$0x3] %v890_v50  ;;  %904 = vst [vmem:[%s1863_s27] sm:$0x3] %v902_v54  ;;  %s718_s24 = smov [#allocation21]  ;;  %s1910_s27 = smov [#allocation23] }
 0x229   : >>> { %v646_v55 = vmul.f32 %v642_v52, %v636_v28  ;;  %v649_v56 = vmul.f32 %v642_v52, %v634_v27  ;;  %1536 = vst [vmem:[%s1859_s23 + $0x1] sm:$0x1] %v894_v46  ;;  %s1653_s23 = smov 127  }
 0x22b   : >>> { %v647_v57 = vsub.f32 %v645_v48, %v646_v55  ;;  %v650_v58 = vadd.f32 %v649_v56, %v648_v49 }
 0x22d   : >>> { %657 = vst [vmem:[%s1855_s15] sm:$0x3] %v647_v57  ;;  %658 = vst [vmem:[%s1865_s29] sm:$0x3] %v650_v58  ;;  %v696_v60 = vld [vmem:[%s689_s30] sm:$0x3]  ;;  %s717_s15 = smov [#allocation20]  ;;  %s781_s29 = smov [#allocation20] }
 0x22e   : >>> { %v700_v61 = vsel %vm699_vm0, 0.0, %v696_v60  ;;  %v711_v62 = vld [vmem:[%s702_s21] sm:$0x3] }
 0x22f   : >>> { %701 = vst [vmem:[%s689_s30] sm:$0x3] %v700_v61  ;;  %v715_v0 = vsel %vm714_vm1, %v710_v59, %v711_v62  ;;  %s782_s30 = smov [#allocation22] }
 0x230   : >>> { %716 = vst [vmem:[%s702_s21] sm:$0x3] %v715_v0  ;;  %s806_s21 = smov [#allocation23] }
 0x234   : >>> { %v670_v1 = vld [vmem:[%s661_s26] sm:$0x3] }
 0x235   : >>> { %v683_v2 = vld [vmem:[%s676_s11] sm:$0x3]  ;;  %v674_v3 = vsel %vm673_vm3, %v669_v63, %v670_v1 }
 0x236   : >>> { %v687_v4 = vsel %vm686_vm4, 0.0, %v683_v2  ;;  %675 = vst [vmem:[%s661_s26] sm:$0x3] %v674_v3  ;;  %v755_v5 = vld [vmem:[%s1907_s22] sm:$0x3]  ;;  %s370_s26 = smov (%p462_p9), [#allocation20] }
 0x237   : >>> { %688 = vst [vmem:[%s676_s11] sm:$0x3] %v687_v4  ;;  %756 = vrot.lane.b32.xlu0 %v755_v5, %s1652_s14  ;;  %v751_v11 = vld [vmem:[%s1910_s27] sm:$0x3]  ;;  %s389_s11 = smov (%p462_p9), [#allocation21] }
 0x238   : >>> { %v772_v12 = vld [vmem:[%s1910_s27] sm:$0x3] }
 0x239   : >>> { %v754_v30 = vld [vmem:[%s1907_s22] sm:$0x3] }
 0x23d   : >>> { %v723_v8 = vld [vmem:[%s717_s15] sm:$0x3] }
 0x23e   : >>> { %724 = vrot.lane.b32.xlu1 %v723_v8, %s1652_s14  ;;  %v719_v9 = vld [vmem:[%s718_s24] sm:$0x3] }
 0x23f   : >>> { %v740_v10 = vld [vmem:[%s718_s24] sm:$0x3] }
 0x240   : >>> { %v722_v18 = vld [vmem:[%s717_s15] sm:$0x3] }
 0x242   : >>> { %720 = vrot.lane.b32.xlu1 %v719_v9, %s1652_s14 }
 0x246   : >>> { %741 = vrot.lane.b32.xlu1 %v740_v10, %s1653_s23 }
 0x24a   : >>> { %752 = vrot.lane.b32.xlu1 %v751_v11, %s1652_s14  ;;  %s423_s14 = smov (%p462_p9), [#allocation23] }
 0x24e   : >>> { %773 = vrot.lane.b32.xlu1 %v772_v12, %s1653_s23 }
 0x2a9   : >>> { %v757_v20 = vpop.permute.xlu0 %756 }
 0x2aa   : >>> { %v761_v22 = vsel %vm728_vm5, %v755_v5, %v757_v20 }
 0x2b0   : >>> { %v725_v13 = vpop.permute.xlu1 %724 }
 0x2b1   : >>> { %v729_v14 = vsel %vm728_vm5, %v723_v8, %v725_v13 }
 0x2b4   : >>> { %v721_v15 = vpop.permute.xlu1 %720 }
 0x2b5   : >>> { %v733_v16 = vsel %vm732_vm6, %v721_v15, %v729_v14 }
 0x2b6   : >>> { %v739_v17 = vsel %vm1391_vm2, %v733_v16, 0.0 }
 0x2b7   : >>> { %747 = vst [vmem:[%s717_s15] sm:$0x3] %v739_v17 }
 0x2b8   : >>> { %v742_v19 = vpop.permute.xlu1 %741 }
 0x2b9   : >>> { %v746_v21 = vsel %vm732_vm6, %v722_v18, %v742_v19 }
 0x2ba   : >>> { %748 = vst [vmem:[%s718_s24] sm:$0x3] %v746_v21 }
 0x2bc   : >>> { %v753_v23 = vpop.permute.xlu1 %752 }
 0x2bd   : >>> { %v765_v24 = vsel %vm732_vm6, %v753_v23, %v761_v22 }
 0x2be   : >>> { %v783_v25 = vld [vmem:[%s781_s29] ss:$0 sm:$0xff]  ;;  %v1523_v27 = vld [vmem:[%s781_s29 + $0x1] ss:$0 sm:$0xff]  ;;  %v771_v29 = vsel %vm1391_vm2, %v765_v24, 0.0 }
 0x2bf   : >>> { %v1522_v26 = vld [vmem:[%s781_s29 - $0x1] sm:$0x2]  ;;  %779 = vst [vmem:[%s1907_s22] sm:$0x3] %v771_v29  ;;  %s406_s22 = smov (%p462_p9), [#allocation22] }
 0x2c0   : >>> { %v790_v28 = vsel %vm789_vm14, %v783_v25, %v1522_v26  ;;  %v774_v31 = vpop.permute.xlu1 %773 }
 0x2c1   : >>> { %793 = vst [vmem:[%s781_s29] sm:$0x3] %v790_v28  ;;  %v807_v32 = vld [vmem:[%s805_s16] ss:$0 sm:$0xff]  ;;  %v1527_v34 = vld [vmem:[%s805_s16 + $0x1] ss:$0 sm:$0xff]  ;;  %v778_v35 = vsel %vm732_vm6, %v754_v30, %v774_v31 }
 0x2c2   : >>> { %v1526_v33 = vld [vmem:[%s805_s16 - $0x1] sm:$0x2]  ;;  %780 = vst [vmem:[%s1910_s27] sm:$0x3] %v778_v35 }
 0x2c3   : >>> { %v814_v36 = vsel %vm789_vm14, %v807_v32, %v1526_v33 }
 0x2c4   : >>> { %817 = vst [vmem:[%s805_s16] sm:$0x3] %v814_v36 }
 0x2c6   : >>> { %v794_v37 = vld [vmem:[%s782_s30] ss:$0 sm:$0xff]  ;;  %v1525_v38 = vld [vmem:[%s782_s30 + $0x1] sm:$0x1] }
 0x2c7   : >>> { %1524 = vst [vmem:[%s781_s29 + $0x1] sm:$0x1] %v794_v37  ;;  %v802_v39 = vsel %vm801_vm15, %v1523_v27, %v1525_v38  ;;  %464 = sbr.rel (!%p462_p9) target bundleno = 279 (0x117), region = 462 }
 0x2c8   : >>> { %804 = vst [vmem:[%s782_s30] sm:$0x3] %v802_v39 }
 0x2c9   : >>> { %v818_v40 = vld [vmem:[%s806_s21] ss:$0 sm:$0xff]  ;;  %v1529_v41 = vld [vmem:[%s806_s21 + $0x1] sm:$0x1] }
 0x2ca   : >>> { %1528 = vst [vmem:[%s805_s16 + $0x1] sm:$0x1] %v818_v40  ;;  %v826_v42 = vsel %vm801_vm15, %v1527_v34, %v1529_v41 }
 0x2cb   : >>> { %828 = vst [vmem:[%s806_s21] sm:$0x3] %v826_v42 }
 0x2ce   : >> { %v376_v43 = vld [vmem:[%s370_s26] sm:$0x3] }
 0x2cf   : >> { %v377_v45 = vsel %vm1391_vm2, %v376_v43, 0.0  ;;  %v412_v47 = vld [vmem:[%s406_s22] sm:$0x3] }
 0x2d0   : >> { %v378_v49 = vmul.f32 %v377_v45, %v377_v45  ;;  %v413_v51 = vsel %vm1391_vm2, %v412_v47, 0.0 }
 0x2d1   : >> { %v395_v44 = vld [vmem:[%s389_s11] sm:$0x3]  ;;  %v414_v53 = vmul.f32 %v413_v51, %v413_v51 }
 0x2d2   : >> { %v396_v46 = vsel %vm1391_vm2, %v395_v44, 0.0  ;;  %v429_v48 = vld [vmem:[%s423_s14] sm:$0x3]  ;;  %v382_v56 = vsel %vm381_vm7, 0.0, %v378_v49 }
 0x2d3   : >> { %v397_v50 = vmul.f32 %v396_v46, %v396_v46  ;;  %v430_v52 = vsel %vm1391_vm2, %v429_v48, 0.0 }
 0x2d4   : >> { %v431_v55 = vmul.f32 %v430_v52, %v430_v52 }
 0x2d5   : >> { %v399_v54 = vadd.f32 %v397_v50, %v378_v49  ;;  %v398_v57 = vadd.f32 %v397_v50, %v382_v56 }
 0x2d6   : >> { %v435_v60 = vsel %vm434_vm8, 0.0, %v431_v55 }
 0x2d7   : >> { %v416_v58 = vadd.f32 %v414_v53, %v399_v54  ;;  %v415_v59 = vadd.f32 %v414_v53, %v398_v57 }
 0x2d9   : >> { %v437_v61 = vadd.f32 %v431_v55, %v416_v58  ;;  %v436_v62 = vadd.f32 %v435_v60, %v415_v59 }
 0x2db   : >> { %438 = vadd.xlane.f32.xlu0 %v437_v61 }
 0x2df   : >> { %446 = vadd.xlane.f32.xlu0 %v436_v62 }
 0x368   : >> { %v439_v63 = vpop.xlane.xlu0 %438 }
 0x369   : >> { %v440_v0 = vrot.slane %v439_v63, 4 }
 0x36b   : >> { %v441_v1 = vadd.f32 %v440_v0, %v439_v63 }
 0x36c   : >> { %v447_v2 = vpop.xlane.xlu0 %446 }
 0x36d   : >> { %v442_v3 = vrot.slane %v441_v1, 2  ;;  %v448_v4 = vrot.slane %v447_v2, 4 }
 0x36f   : >> { %v449_v5 = vadd.f32 %v448_v4, %v447_v2  ;;  %v443_v8 = vadd.f32 %v442_v3, %v441_v1 }
 0x371   : >> { %v450_v9 = vrot.slane %v449_v5, 2  ;;  %v444_v11 = vrot.slane %v443_v8, 1 }
 0x373   : >> { %v451_v10 = vadd.f32 %v450_v9, %v449_v5  ;;  %v445_v14 = vadd.f32 %v444_v11, %v443_v8 }
 0x375   : >> { %v452_v12 = vrot.slane %v451_v10, 1 }
 0x377   : >> { %v453_v13 = vadd.f32 %v452_v12, %v451_v10 }
 0x379   : >> { %1556 = vpush %v453_v13 }
 0x37a   : >> { %1558 = vpush %v445_v14 }
 0x3aa   : >> { %s1557_s20 = spop %1556 }
 0x3ab   : >> { %s1559_s15 = spop %1558 }
 0x3ac   : >> { %s456_s24 = smul.f32 1e-10, %s1559_s15 }
 0x3ae   : >> { %p457_p11 = scmp.le.f32.partialorder %s1557_s20, %s456_s24 }
 0x3b0   : >> { %p459_p12 = por %p458_p10, %p457_p11 }
 0x3b2   : > { %907 = sbr.rel (!%p459_p12) target bundleno = 278 (0x116), region = 473 }
 0x3b9 PF: > { %s912_s23 = smov [#allocation20]  ;;  %v916_v6 = vmov %v1761_v6  ;;  %v919_v7 = vmov %v1763_v7  ;;  %v967_v15 = vld [vmem:[#allocation12] sm:$0x3]  ;;  %v973_v16 = vld [vmem:[#allocation14] sm:$0x3]  ;;  %s2043_s17 = scalar_lea.vmem [#allocation13], %s1757_s28 }
 0x3ba   : > { %v936_v6 = vmov %v1761_v6  ;;  %v939_v7 = vmov %v1763_v7  ;;  %v920_v17 = vld [vmem:[%s912_s23] sm:$0x3]  ;;  %vm923_vm9 = vcmp.eq.s32.totalorder %v919_v7, %v916_v6  ;;  %969 = vst [vmem:[%s2043_s17] sm:$0x3] %v967_v15  ;;  %s2044_s27 = scalar_lea.vmem [#allocation15], %s1757_s28  ;;  %s932_s29 = smov [#allocation23] }
 0x3bb   : > { %vm943_vm10 = vcmp.eq.s32.totalorder %v939_v7, %v936_v6  ;;  %975 = vst [vmem:[%s2044_s27] sm:$0x3] %v973_v16  ;;  %v979_v18 = vld [vmem:[#allocation16] sm:$0x3]  ;;  %v924_v19 = vsel %vm923_vm9, %v920_v17, 0.0  ;;  %s2045_s16 = scalar_lea.vmem [#allocation17], %s1757_s28  ;;  %s2046_s30 = scalar_lea.vmem [#allocation19], %s1757_s28 }
 0x3bc   : > { %981 = vst [vmem:[%s2045_s16] sm:$0x3] %v979_v18  ;;  %v985_v20 = vld [vmem:[#allocation18] sm:$0x3]  ;;  %v925_v21 = vrot.slane %v924_v19, 4  ;;  %v940_v22 = vld [vmem:[%s932_s29] sm:$0x3] }
 0x3bd   : > { %987 = vst [vmem:[%s2046_s30] sm:$0x3] %v985_v20  ;;  %v944_v23 = vsel %vm943_vm10, %v940_v22, 0.0  ;;  %s908_s21 = sand.u32 7, %s1720_s12   ;;  %s2047_s11 = scalar_lea.vmem [#allocation9], %s1759_s18 }
 0x3be   : > { %v926_v24 = vadd.f32 %v925_v21, %v924_v19  ;;  %v945_v25 = vrot.slane %v944_v23, 4  ;;  %s909_s25 = scalar_lea.vmem [#allocation8], %s908_s21  ;;  %s911_s26 = scalar_lea.vmem [#allocation10], %s908_s21 }
 0x3bf   : > { %s913_s25 = smov %s909_s25  ;;  %s933_s26 = smov %s911_s26 }
 0x3c0   : > { %v927_v26 = vrot.slane %v926_v24, 2  ;;  %v946_v6 = vadd.f32 %v945_v25, %v944_v23  ;;  %s2048_s22 = scalar_lea.vmem [#allocation11], %s1759_s18  ;;  %s1015_s14 = sshrl.u32 (%p1734_p3), %s1720_s12, 3 }
 0x3c1   : > { %s2049_s20 = scalar_lea.vmem (%p1734_p3), [#allocation9], %s1759_s18  ;;  %s1544_s15 = sshll.u32 (%p1734_p3), %s1015_s14, 1 }
 0x3c2   : > { %v928_v7 = vadd.f32 %v927_v26, %v926_v24  ;;  %v947_v27 = vrot.slane %v946_v6, 2  ;;  %s1017_s17 = scalar_lea.vmem (%p1734_p3), %s2034_s4, %s1544_s15 }
 0x3c4   : > { %v929_v28 = vrot.slane %v928_v7, 1  ;;  %v948_v29 = vadd.f32 %v947_v27, %v946_v6 }
 0x3c6   : > { %v930_v30 = vadd.f32 %v929_v28, %v928_v7  ;;  %v949_v31 = vrot.slane %v948_v29, 1 }
 0x3c8   : > { %931 = vst [vmem:[%s913_s25] sm:$0x1] %v930_v30  ;;  %v950_v32 = vadd.f32 %v949_v31, %v948_v29 }
 0x3ca   : > { %951 = vst [vmem:[%s933_s26] sm:$0x1] %v950_v32 }
 0x3cc   : > { %1014 = sbr.rel (!%p1734_p3) target bundleno = 985 (0x3d9), region = 158 }
 0x3cf   : > { %v955_v33 = vld [vmem:[#allocation8] sm:$0x3] }
 0x3d0   : > { %957 = vst [vmem:[%s2047_s11] sm:$0x3] %v955_v33 }
 0x3d1   : > { %v961_v34 = vld [vmem:[#allocation10] sm:$0x3] }
 0x3d2   : > { %963 = vst [vmem:[%s2048_s22] sm:$0x3] %v961_v34 }
 0x3d7   : > { %v1033_v35 = vld [vmem:[%s2049_s20] sm:$0x3] }
 0x3d8   : > { %1034 = vst [vmem:[%s1017_s17] sm:$0x3] %v1033_v35 }
 0x3d9 PF: > { %1051 = sbr.rel (!%p1734_p3) target bundleno = 993 (0x3e1), region = 192  ;;  %s1052_s27 = sshrl.u32 (%p1734_p3), %s1720_s12, 3 }
 0x3da   : > { %s2050_s29 = scalar_lea.vmem (%p1734_p3), [#allocation11], %s1759_s18  ;;  %s1545_s16 = sshll.u32 (%p1734_p3), %s1052_s27, 1 }
 0x3db   : > { %s1054_s25 = scalar_lea.vmem (%p1734_p3), %s2035_s5, %s1545_s16 }
 0x3df   : > { %v1070_v36 = vld [vmem:[%s2050_s29] sm:$0x3] (%p1734_p3) }
 0x3e0   : > { %1071 = vst [vmem:[%s1054_s25] sm:$0x3] %v1070_v36 }
 0x3e1 PF: > { %s1546_s26 = sshll.u32 %s1720_s12, 1  ;;  %s2051_s19 = scalar_lea.vmem [#allocation13], %s1757_s28 }
 0x3e2   : > { %v1103_v37 = vld [vmem:[%s2051_s19] sm:$0x3]  ;;  %s2052_s11 = scalar_lea.vmem [#allocation15], %s1757_s28  ;;  %s1087_s14 = scalar_lea.vmem %s2036_s6, %s1546_s26 }
 0x3e3   : > { %v1136_v38 = vld [vmem:[%s2052_s11] sm:$0x3]  ;;  %s1120_s24 = scalar_lea.vmem %s2037_s7, %s1546_s26  ;;  %s2053_s23 = scalar_lea.vmem [#allocation17], %s1757_s28  ;;  %1104 = vst [vmem:[%s1087_s14] sm:$0x3] %v1103_v37 }
 0x3e4   : > { %v1169_v39 = vld [vmem:[%s2053_s23] sm:$0x3]  ;;  %s2054_s17 = scalar_lea.vmem [#allocation19], %s1757_s28  ;;  %1137 = vst [vmem:[%s1120_s24] sm:$0x3] %v1136_v38  ;;  %s1153_s29 = scalar_lea.vmem %s2038_s8, %s1546_s26 }
 0x3e5   : > { %v1202_v40 = vld [vmem:[%s2054_s17] sm:$0x3]  ;;  %s1186_s21 = scalar_lea.vmem %s2039_s9, %s1546_s26  ;;  %1170 = vst [vmem:[%s1153_s29] sm:$0x3] %v1169_v39 }
 0x3e6   : > { %1203 = vst [vmem:[%s1186_s21] sm:$0x3] %v1202_v40 }
 0x3e7 PF: > { %s2055_s25 = sld [smem:[#allocation33_spill]]  ;;  %p13_p13 = scmp.ge.s32.totalorder %s1723_s13, 4  }
 0x3e8   : > { %s2056_s30 = smov %s1637_s10  ;;  %s2058_s11 = smov %s1723_s13 }
 0x3e9   :  { %15 = sbr.rel (!%p13_p13) target bundleno = 2 (0x2), region = 484 }
 0x3ed   : > { %s2057_s10 = smov %s2055_s25 }

// kernel: reverse
= control target key start
LH: loop header
LB: loop body
LE: loop exit
PB: predicated region body
PF: predicated region fallthrough
CT: control target
= control target key end

     0   :  { %v2_v0 = vlaneseq  ;;  %s105_s0 = inlined_call_operand.vmem [shape: f32[2,3], index: 0, kind: input, shape index: {}]   ;;  %s106_s1 = inlined_call_operand.vmem [shape: f32[2,3], index: 1, kind: output, shape index: {}]  }
   0x2   :  { %v3_v1 = vsub.s32 2, %v2_v0 }
   0x4   :  { %4 = vset.pattern.permute.xlu0 %v3_v1 }
   0x5   :  { %v20_v2 = vld [vmem:[%s105_s0] sm:$0x3] }
   0x6   :  { %21 = vst [vmem:[#allocation1] sm:$0x3] %v20_v2 }
   0xd   :  { %v38_v3 = vld [vmem:[#allocation1] sm:$0x3] }
   0xe   :  { %39 = vst [vmem:[#allocation0] sm:$0x3] %v38_v3 }
  0x15   :  { %v40_v4 = vld [vmem:[#allocation0] sm:$0xff] }
  0x16   :  { %41 = vperm.xlu0 %4, %v40_v4  }
  0x95   :  { %v42_v5 = vpop.permute.xlu0 %41 }
  0x96   :  { %43 = vst [vmem:[#allocation2] sm:$0xff] %v42_v5 }
  0x9d   :  { %v47_v6 = vld [vmem:[#allocation2] sm:$0x3] }
  0x9e   :  { %49 = vst [vmem:[#allocation3] sm:$0x3] %v47_v6 }
  0xa5   :  { %v65_v7 = vld [vmem:[#allocation3] sm:$0x3] }
  0xa6   :  { %66 = vst [vmem:[%s106_s1] sm:$0x3] %v65_v7 }

// kernel: custom-call.16
= control target key start
LH: loop header
LB: loop body
LE: loop exit
PB: predicated region body
PF: predicated region fallthrough
CT: control target
= control target key end

     0   :  { %s653_s9 = smov 0   ;;  %s655_s10 = smov 0   ;;  %s799_s0 = inlined_call_operand.vmem [shape: f32[2,3,3], index: 0, kind: input, shape index: {}]   ;;  %s800_s1 = inlined_call_operand.vmem [shape: f32[2,3,3], index: 1, kind: output, shape index: {0}]   ;;  %s801_s2 = inlined_call_operand.vmem [shape: f32[2,3], index: 2, kind: output, shape index: {1}]  }
   0x1   :  { %s657_s11 = smov 0   ;;  %s659_s12 = smov 0  }
   0x2   :  { %s661_s13 = smov 0  }
   0x3 LB: > { %s28_s14 = sadd.s32 1, %s626_s12  ;;  %s508_s15 = sadd.s32 4294967295, %s630_s13   ;;  %s630_s13 = sphi %s661_s13, %s9_s13   ;;  %s626_s12 = sphi %s659_s12, %s808_s12   ;;  %s622_s11 = sphi %s657_s11, %s807_s11   ;;  %s618_s10 = sphi %s655_s10, %s806_s10   ;;  %s614_s9 = sphi %s653_s9, %s805_s9  }
   0x4   : > { %p30_p0 = scmp.ge.s32.totalorder %s28_s14, 2  ;;  %s33_s16 = ssub.s32 0, %s626_s12 }
   0x5   : > { %s510_s17 = smin.u32 %s626_s12, %s33_s16  ;;  %p57_p1 = scmp.ne.s32.totalorder %s618_s10, %s614_s9 }
   0x6   : > { %s810_s14 = smov (%p30_p0, %s28_s14), 0  ;;  %s35_s18 = sshrl.u32 %s510_s17, 3 }
   0x7   : > { %s39_s19 = ssub.s32 0, %s810_s14  ;;  %p58_p2 = scmp.eq.s32.totalorder %s508_s15, 1 }
   0x8   : > { %s511_s20 = smin.u32 %s39_s19, %s810_s14  ;;  %s47_s24 = sadd.s32 1, %s618_s10 }
   0x9   : > { %s41_s21 = sshrl.u32 %s511_s20, 3  ;;  %p688_p3 = por %p58_p2, %p57_p1 }
   0xa   : > { %s44_s23 = ssub.s32 %s35_s18, %s41_s21  ;;  %p513_p5 = scmp.ge.s32.totalorder %s630_s13, 2 }
   0xb   : > { %p45_p4 = scmp.eq.s32.totalorder %s44_s23, 0  ;;  %s82_s26 = sand.u32 (!%p513_p5), 1, %s630_s13  }
   0xc   : > { %80 = sbr.rel (%p513_p5) target bundleno = 19 (0x13), region = 16  ;;  %s515_s27 = sshll.u32 (!%p513_p5), %s626_s12, 2 }
   0xd   : > { %s694_s25 = scalar_select %p45_p4, %s618_s10, %s47_s24  }
   0xe   : > { %s514_s28 = sshll.u32 (!%p513_p5), %s82_s26, 2  ;;  %s88_s3 = scalar_lea.vmem (!%p513_p5), %s799_s0, %s515_s27 }
   0xf   : > { %v104_v0 = vld [vmem:[%s88_s3] sm:$0xf] (!%p513_p5)  ;;  %s84_s4 = scalar_lea.vmem (!%p513_p5), [#allocation1], %s514_s28 }
  0x10   : > { %105 = vst [vmem:[%s84_s4] sm:$0xf] (!%p513_p5), %v104_v0 }
  0x13 PF: > { %p516_p6 = scmp.ge.s32.totalorder %s630_s13, 1  ;;  %p121_p7 = scmp.lt.s32.totalorder %s630_s13, 3 }
  0x15   : > { %p122_p8 = pnand %p516_p6, %p121_p7 }
  0x17   : > { %125 = sbr.rel (%p122_p8) target bundleno = 346 (0x15a), region = 50 }
  0x1e   : > { %s132_s5 = sand.u32 1, %s508_s15   ;;  %s142_s6 = sand.u32 1, %s614_s9   ;;  %v636_v2 = vmov 0.0  }
  0x1f   : > { %s517_s7 = sshll.u32 %s132_s5, 2  ;;  %s705_s8 = sshll.u32 %s142_s6, 1 }
  0x20   : > { %s134_s16 = scalar_lea.vmem [#allocation1], %s517_s7  ;;  %s155_s17 = sand.u32 7, %s622_s11  }
  0x21   : > { %v147_v1 = vld [vmem:[%s134_s16] sm:$0xf]  ;;  %s708_s18 = scalar_lea.vmem [#allocation4], %s155_s17  ;;  %s711_s19 = scalar_lea.vmem [#allocation3], %s517_s7 }
  0x22   : > { %148 = vst [vmem:[#allocation0] sm:$0xf] %v147_v1  ;;  %159 = vst [vmem:[%s708_s18] sm:$0x1] %v636_v2  ;;  %s144_s15 = scalar_lea.vmem [#allocation5], %s705_s8  ;;  %s714_s20 = smov 0  }
  0x29   : > { %v157_v3 = vld [vmem:[#allocation0] sm:$0xff] }
  0x2a   : > { %158 = vst [vmem:[#allocation2] sm:$0xff] %v157_v3 }
  0x2b LB: >> { %v167_v4 = vlaneseq  ;;  %v723_v6 = vstv %s634_s20  ;;  %s194_s9 = scalar_lea.vmem [#allocation2], %s634_s20  ;;  %s230_s21 = smov [#allocation2]  ;;  %v637_v60 = vmov 1.0   ;;  %v265_v61 = vld [vmem:[%s708_s18] ss:$0 sm:$0xff]  ;;  %s634_s20 = sphi %s714_s20, %s165_s20  }
  0x2c   : >> { %s252_s23 = scalar_lea.vmem [#allocation6], %s634_s20  ;;  %s268_s24 = smov [#allocation2] }
  0x2d   : >> { %v720_v5 = vshrl.u32 %v167_v4, 7  ;;  %v246_v49 = vand.u32 127, %v167_v4  ;;  %s269_s26 = smov [#allocation6] }
  0x2f   : >> { %vm171_vm0 = vcmp.gt.s32.totalorder %v720_v5, %v723_v6  ;;  %vm172_vm1 = vcmp.lt.s32.totalorder %v720_v5, 3  ;;  %v233_v5 = vmov %v720_v5  ;;  %vm738_vm12 = vcmp.eq.s32.totalorder %v246_v49, %v723_v6 }
  0x30   : >> { %vm173_vm2 = vmand %vm171_vm0, %vm172_vm1  ;;  %vm237_vm9 = vcmp.gt.s32.totalorder %v233_v5, %v723_v6  ;;  %vm238_vm10 = vcmp.lt.s32.totalorder %v233_v5, 3  ;;  %v272_v5 = vmov %v720_v5  ;;  %vm298_vm15 = vcmp.gt.s32.totalorder %v246_v49, %v723_v6 }
  0x31   : >> { %v166_v7 = vld [vmem:[#allocation2] sm:$0xff]  ;;  %v195_v16 = vld [vmem:[%s194_s9] ss:$0 sm:$0xff]  ;;  %vm239_vm11 = vmand %vm237_vm9, %vm238_vm10  ;;  %vm277_vm13 = vcmp.lt.s32.totalorder %v272_v5, 3  ;;  %v289_v5 = vmov %v720_v5 }
  0x32   : >> { %v174_v8 = vsel %vm173_vm2, %v166_v7, 0.0  ;;  %v196_v17 = vand.u32 2147483647, %v195_v16  ;;  %vm221_vm8 = vcmp.lt.f32.partialorder %v195_v16, 0.0  ;;  %v234_v46 = vld [vmem:[%s230_s21] sm:$0xff]  ;;  %vm306_vm14 = vcmp.ge.s32.totalorder %v289_v5, %v723_v6 }
  0x33   : >> { %v175_v9 = vmul.f32 %v174_v8, %v174_v8  ;;  %v240_v50 = vsel %vm239_vm11, %v234_v46, 0.0  ;;  %v275_v0 = vld [vmem:[%s268_s24] sm:$0xff]  ;;  %s285_s24 = smov %s268_s24  ;;  %vm307_vm0 = vmand %vm738_vm12, %vm306_vm14 }
  0x34   : >> { %v197_v22 = vmax.f32 %v196_v17, 0.0  ;;  %s310_s27 = scalar_lea.vmem %s285_s24, %s634_s20  ;;  %s165_s20 = sadd.s32 1, %s634_s20  }
  0x35   : >> { %v176_v10 = vrot.slane %v175_v9, 4  ;;  %p162_p9 = scmp.ge.s32.totalorder %s165_s20, 3  }
  0x36   : > { %s523_s28 = sshll.u32 (%p162_p9), %s622_s11, 2 }
  0x37   : >> { %v177_v11 = vadd.f32 %v176_v10, %v175_v9  ;;  %s341_s3 = scalar_lea.vmem (%p162_p9), %s800_s1, %s523_s28 }
  0x39   : >> { %v178_v12 = vrot.slane %v177_v11, 2 }
  0x3b   : >> { %v179_v13 = vadd.f32 %v178_v12, %v177_v11 }
  0x3d   : >> { %v180_v14 = vrot.slane %v179_v13, 1 }
  0x3f   : >> { %v181_v15 = vadd.f32 %v180_v14, %v179_v13  ;;  %v296_v14 = vld [vmem:[%s285_s24] sm:$0xff] }
  0x41   : >> { %578 = vrsqrt.f32 %v181_v15  ;;  %vm184_vm3 = vcmp.eq.f32.partialorder %v181_v15, inf  ;;  %v187_v19 = vand.u32 2147483648, %v181_v15  ;;  %vm186_vm4 = vcmp.eq.f32.partialorder %v181_v15, 0.0 }
  0x4b   : >> { %v579_v18 = vpop.eup %578 }
  0x4c   : >> { %v183_v20 = vmul.f32 %v579_v18, %v181_v15 }
  0x4e   : >> { %v185_v21 = vsel %vm184_vm3, %v181_v15, %v183_v20 }
  0x4f   : >> { %v188_v23 = vsel %vm186_vm4, %v187_v19, %v185_v21 }
  0x50   : >> { %v198_v24 = vand.u32 2147483647, %v188_v23 }
  0x52   : >> { %v199_v25 = vmax.f32 %v197_v22, %v198_v24 }
  0x54   : >> { %580 = vrcp.f32 %v199_v25  ;;  %vm211_vm7 = vcmp.eq.f32.partialorder %v199_v25, 0.0 }
  0x5e   : >> { %v581_v26 = vpop.eup %580 }
  0x5f   : >> { %v201_v27 = vmul.f32 %v581_v26, %v196_v17  ;;  %v204_v28 = vmul.f32 0.0, %v581_v26  ;;  %v208_v29 = vmul.f32 %v581_v26, %v198_v24 }
  0x61   : >> { %v202_v30 = vmul.f32 %v201_v27, %v201_v27  ;;  %v205_v31 = vmul.f32 %v204_v28, %v204_v28  ;;  %v209_v32 = vmul.f32 %v208_v29, %v208_v29 }
  0x63   : >> { %v206_v33 = vadd.f32 %v205_v31, %v202_v30 }
  0x65   : >> { %v210_v34 = vadd.f32 %v209_v32, %v206_v33 }
  0x67   : >> { %582 = vrsqrt.f32 %v210_v34  ;;  %vm214_vm5 = vcmp.eq.f32.partialorder %v210_v34, inf  ;;  %v217_v36 = vand.u32 2147483648, %v210_v34  ;;  %vm216_vm6 = vcmp.eq.f32.partialorder %v210_v34, 0.0 }
  0x71   : >> { %v583_v35 = vpop.eup %582 }
  0x72   : >> { %v213_v37 = vmul.f32 %v583_v35, %v210_v34 }
  0x74   : >> { %v215_v38 = vsel %vm214_vm5, %v210_v34, %v213_v37 }
  0x75   : >> { %v218_v39 = vsel %vm216_vm6, %v217_v36, %v215_v38 }
  0x76   : >> { %v219_v40 = vmul.f32 %v218_v39, %v199_v25 }
  0x78   : >> { %v220_v41 = vsel %vm211_vm7, 0.0, %v219_v40 }
  0x79   : >> { %v222_v42 = vxor.u32 2147483648, %v220_v41 }
  0x7b   : >> { %v223_v43 = vsel %vm221_vm8, %v220_v41, %v222_v42 }
  0x7c   : >> { %v731_v44 = vsel %vm186_vm4, %v195_v16, %v223_v43  ;;  %584 = vrcp.f32 %v223_v43  ;;  %v224_v47 = vsub.f32 %v223_v43, %v195_v16 }
  0x7d   : >> { %v229_v45 = vsub.f32 %v195_v16, %v731_v44 }
  0x7f   : >> { %586 = vrcp.f32 %v229_v45 }
  0x86   : >> { %v585_v48 = vpop.eup %584 }
  0x87   : >> { %v226_v51 = vmul.f32 %v585_v48, %v224_v47 }
  0x89   : >> { %v587_v52 = vpop.eup %586  ;;  %v228_v56 = vsel %vm186_vm4, 0.0, %v226_v51 }
  0x8a   : >> { %v242_v53 = vmul.f32 %v587_v52, %v240_v50  ;;  %v258_v58 = vsel %vm738_vm12, %v228_v56, 0.0 }
  0x8c   : >> { %v243_v55 = vsel %vm186_vm4, 0.0, %v242_v53 }
  0x8d   : >> { %v248_v57 = vsel %vm738_vm12, %v243_v55, 0.0 }
  0x8e   : >> { %249 = vadd.xlane.f32.xlu0 %v248_v57 }
  0x92   : >> { %259 = vadd.xlane.f32.xlu0 %v258_v58 }
 0x11b   : >> { %v250_v59 = vpop.xlane.xlu0 %249 }
 0x11c   : >> { %251 = vst [vmem:[#allocation6] sm:$0xff] %v250_v59 }
 0x11d   : >> { %253 = vst [vmem:[%s252_s23] sm:$0x1] %v637_v60 }
 0x11f   : >> { %v260_v62 = vpop.xlane.xlu0 %259 }
 0x120   : >> { %v266_v63 = vsel %vm738_vm12, %v260_v62, %v265_v61 }
 0x121   : >> { %267 = vst [vmem:[%s708_s18] sm:$0x1] %v266_v63 }
 0x124   : >> { %v274_v1 = vld [vmem:[%s269_s26] sm:$0xff]  ;;  %s286_s26 = smov %s269_s26 }
 0x125   : >> { %v276_v2 = vmul.f32 %v275_v0, %v274_v1  ;;  %v294_v13 = vld [vmem:[%s286_s26] sm:$0xff] }
 0x127   : >> { %v278_v3 = vsel %vm277_vm13, %v276_v2, 0.0 }
 0x128   : >> { %v279_v4 = vrot.slane %v278_v3, 4  ;;  %v327_v6 = vld [vmem:[#allocation4] sm:$0x3] (%p162_p9) }
 0x129   : > { %329 = vst [vmem:[%s144_s15] sm:$0x3] (%p162_p9), %v327_v6 }
 0x12a   : >> { %v280_v7 = vadd.f32 %v279_v4, %v278_v3 }
 0x12c   : >> { %v281_v8 = vrot.slane %v280_v7, 2 }
 0x12e   : >> { %v282_v9 = vadd.f32 %v281_v8, %v280_v7 }
 0x130   : >> { %v283_v10 = vrot.slane %v282_v9, 1 }
 0x132   : >> { %v284_v11 = vadd.f32 %v283_v10, %v282_v9 }
 0x134   : >> { %v290_v12 = vmul.f32 %v284_v11, %v260_v62 }
 0x136   : >> { %v295_v15 = vmul.f32 %v294_v13, %v290_v12 }
 0x138   : >> { %v299_v16 = vsub.f32 %v296_v14, %v295_v15 }
 0x13a   : >> { %v300_v17 = vsel %vm298_vm15, %v299_v16, %v296_v14 }
 0x13b   : >> { %v308_v18 = vsel %vm307_vm0, %v294_v13, %v300_v17 }
 0x13c   : >> { %309 = vst [vmem:[%s285_s24] sm:$0xff] %v308_v18 }
 0x13f   : > { %164 = sbr.rel (!%p162_p9) target bundleno = 43 (0x2b), region = 167 }
 0x143   : >> { %v311_v19 = vld [vmem:[%s310_s27] ss:$0 sm:$0xff] }
 0x144   : >> { %v316_v20 = vsel %vm738_vm12, %v731_v44, %v311_v19 }
 0x145   : >> { %317 = vst [vmem:[%s310_s27] sm:$0x1] %v316_v20 }
 0x146   : > { %p376_p10 = scmp.lt.s32.totalorder (%p688_p3), %s622_s11, 0  ;;  %s377_s4 = ssub.s32 (%p688_p3), 0, %s622_s11  ;;  %v399_v22 = vld [vmem:[%s144_s15] sm:$0x3] (%p688_p3) }
 0x147   : > { %s524_s5 = smin.u32 (%p688_p3), %s622_s11, %s377_s4 }
 0x148   : > { %s379_s6 = sshrl.u32 (%p688_p3), %s524_s5, 3 }
 0x149   : > { %s380_s7 = ssub.s32 (%p688_p3), 0, %s379_s6 }
 0x14c   : > { %v321_v5 = vld [vmem:[#allocation2] sm:$0xf] }
 0x14d   : > { %323 = vst [vmem:[%s711_s19] sm:$0xf] %v321_v5 }
 0x14f   : > { %375 = sbr.rel (!%p688_p3) target bundleno = 346 (0x15a), region = 91 }
 0x154   : > { %v357_v21 = vld [vmem:[%s711_s19] sm:$0xf] }
 0x155   : > { %358 = vst [vmem:[%s341_s3] sm:$0xf] %v357_v21 }
 0x156   : > { %s812_s7 = smov (!%p376_p10, %s380_s7), %s379_s6 }
 0x157   : > { %s525_s16 = sshll.u32 %s812_s7, 1 }
 0x158   : > { %s383_s19 = scalar_lea.vmem %s801_s2, %s525_s16 }
 0x159   : > { %400 = vst [vmem:[%s383_s19] sm:$0x3] %v399_v22 }
 0x15a PF: > { %s9_s13 = sadd.s32 1, %s630_s13   ;;  %s805_s9 = smov %s618_s10 }
 0x15b   : > { %p6_p11 = scmp.ge.s32.totalorder %s9_s13, 4   ;;  %s806_s10 = smov %s694_s25 }
 0x15c   : > { %s807_s11 = smov %s626_s12  ;;  %s808_s12 = smov %s810_s14 }
 0x15d   :  { %8 = sbr.rel (!%p6_p11) target bundleno = 3 (0x3), region = 178 }

</bundles_post_ra>
